<compile_context>
chip_gen: v7x
topology: tpu7x:2x2x1
jax: 0.10.0
libtpu: 0.0.40
codegen_flags: <defaults>
</compile_context>

<pallas_src>
import functools

import jax
import jax.numpy as jnp
from jax.experimental import pallas as pl
from jax.experimental.pallas import tpu as pltpu


# Tile ceilings: MXU-friendly, and small enough (<~1 MiB per buffer) to
# double-buffer comfortably within the scoped-VMEM limits of v5e (16 MiB
# default, raised explicitly), v6e (32 MiB) and v7x (64 MiB physical).
_TM_MAX = 512
_TN_MAX = 256
_TK_MAX = 512
_VMEM_LIMIT = 48 * 1024 * 1024   # explicit, with headroom below v7x's 64 MiB


def _round_up(x, m):
    return (x + m - 1) // m * m


def _tile(dim, max_tile, align):
    """Tile size (multiple of `align`, <= max_tile) and the padded extent."""
    padded = _round_up(dim, align)
    if padded <= max_tile:
        return padded, padded
    return max_tile, _round_up(dim, max_tile)


# ----------------------------- Pallas kernels ------------------------------ #

def _matmul_kernel(p_ref, w_ref, *refs, apply_bias, apply_leaky):
    # p_ref: (tm, tk) bf16 patches, w_ref: (tk, tn) bf16 weights,
    # optional b_ref: (1, tn) f32, o_ref: (tm, tn) f32 or bf16,
    # acc_ref: (tm, tn) f32 scratch.
    if apply_bias:
        b_ref, o_ref, acc_ref = refs
    else:
        b_ref = None
        o_ref, acc_ref = refs

    k = pl.program_id(2)

    @pl.when(k == 0)
    def _():
        acc_ref[...] = jnp.zeros_like(acc_ref)

    acc_ref[...] += jnp.dot(p_ref[...], w_ref[...],
                            preferred_element_type=jnp.float32)

    @pl.when(k == pl.num_programs(2) - 1)
    def _():
        acc = acc_ref[...]
        if apply_bias:
            acc = acc + b_ref[...]
        if apply_leaky:
            acc = jnp.where(acc >= 0, acc, 0.2 * acc)
        o_ref[...] = acc.astype(o_ref.dtype)


def _inorm_lrelu_kernel(x_ref, o_ref):
    # x_ref: (1, HW, tc) f32.  InstanceNorm2d (affine=False, biased variance,
    # eps=1e-5) followed by LeakyReLU(0.2), matching PyTorch semantics.
    # Output is bf16 (consumed by the next conv's bf16 matmul anyway).
    x = x_ref[...]
    mean = jnp.mean(x, axis=1, keepdims=True)
    var = jnp.mean(jnp.square(x - mean), axis=1, keepdims=True)
    y = (x - mean) * jax.lax.rsqrt(var + 1e-5)
    y = jnp.where(y >= 0, y, 0.2 * y)
    o_ref[...] = y.astype(o_ref.dtype)


def _dot_reduce_kernel(p_ref, w_ref, b_ref, o_ref, acc_ref):
    # Final Cout=1 conv: VPU multiply + lane reduction (no MXU column waste).
    # p_ref: (tm, tk) bf16, w_ref: (1, tk) bf16, b_ref: (1, 1) f32,
    # o_ref/acc_ref: (tm, 1) f32.
    k = pl.program_id(1)

    @pl.when(k == 0)
    def _():
        acc_ref[...] = jnp.zeros_like(acc_ref)

    prod = p_ref[...].astype(jnp.float32) * w_ref[...].astype(jnp.float32)
    acc_ref[...] += jnp.sum(prod, axis=1, keepdims=True)

    @pl.when(k == pl.num_programs(1) - 1)
    def _():
        o_ref[...] = acc_ref[...] + b_ref[...]


# ------------------------------- JAX glue ---------------------------------- #

def _im2col(x_nhwc, k, stride, pad):
    """Patch matrix (N*OH*OW, k*k*C) with K ordered (dh, dw, cin).

    Built from a bf16 input so the materialized patches are bf16 (half the
    HBM footprint of an f32 im2col)."""
    N, H, W, C = x_nhwc.shape
    xp = jnp.pad(x_nhwc, ((0, 0), (pad, pad), (pad, pad), (0, 0)))
    OH = (H + 2 * pad - k) // stride + 1
    OW = (W + 2 * pad - k) // stride + 1
    cols = []
    for dh in range(k):
        for dw in range(k):
            cols.append(xp[:, dh:dh + stride * OH:stride,
                           dw:dw + stride * OW:stride, :])
    p = jnp.stack(cols, axis=3)                      # (N, OH, OW, k*k, C)
    return p.reshape(N * OH * OW, k * k * C), OH, OW


def _k_tiling(K):
    # Single full-extent K block when it fits (no padding, e.g. K=48 layer 1);
    # otherwise tile by _TK_MAX (128-lane aligned).
    if K <= _TK_MAX:
        return K, K
    return _TK_MAX, _round_up(K, _TK_MAX)


def conv2d_pallas(x_nhwc, w_oihw, b, stride, *, apply_bias, apply_leaky,
                  out_dtype):
    """Conv2d(k=4, pad=1) via im2col + tiled MXU matmul. Epilogue fuses
    bias (skipped for layers feeding InstanceNorm) and LeakyReLU."""
    kh = w_oihw.shape[2]
    cout = w_oihw.shape[0]
    patches, OH, OW = _im2col(x_nhwc.astype(jnp.bfloat16), kh, stride, pad=1)
    M, K = patches.shape
    # (Cout, Cin, KH, KW) -> (KH, KW, Cin, Cout) -> (K, Cout); matches the
    # (tap, cin) K-ordering produced by _im2col.
    w2d = jnp.transpose(w_oihw, (2, 3, 1, 0)).reshape(K, cout)

    tm, Mp = _tile(M, _TM_MAX, 16)       # 16: bf16 sublane packing
    tn, Np = _tile(cout, _TN_MAX, 128)   # 128: lane width
    tk, Kp = _k_tiling(K)

    p = patches
    w = w2d.astype(jnp.bfloat16)
    if (Mp, Kp) != (M, K):
        p = jnp.pad(p, ((0, Mp - M), (0, Kp - K)))
    if (Kp, Np) != (K, cout):
        w = jnp.pad(w, ((0, Kp - K), (0, Np - cout)))

    in_specs = [pl.BlockSpec((tm, tk), lambda i, j, k: (i, k)),
                pl.BlockSpec((tk, tn), lambda i, j, k: (k, j))]
    args = [p, w]
    if apply_bias:
        bias = b.astype(jnp.float32).reshape(1, cout)
        if Np != cout:
            bias = jnp.pad(bias, ((0, 0), (0, Np - cout)))
        in_specs.append(pl.BlockSpec((1, tn), lambda i, j, k: (0, j)))
        args.append(bias)

    out = pl.pallas_call(
        functools.partial(_matmul_kernel,
                          apply_bias=apply_bias, apply_leaky=apply_leaky),
        out_shape=jax.ShapeDtypeStruct((Mp, Np), out_dtype),
        grid_spec=pltpu.PrefetchScalarGridSpec(
            num_scalar_prefetch=0,
            grid=(Mp // tm, Np // tn, Kp // tk),      # K (reduction) last
            in_specs=in_specs,
            out_specs=pl.BlockSpec((tm, tn), lambda i, j, k: (i, j)),
            scratch_shapes=[pltpu.VMEM((tm, tn), jnp.float32)]),
        compiler_params=pltpu.CompilerParams(
            dimension_semantics=("parallel", "parallel", "arbitrary"),
            vmem_limit_bytes=_VMEM_LIMIT),
    )(*args)

    if (Mp, Np) != (M, cout):
        out = out[:M, :cout]
    N = x_nhwc.shape[0]
    return out.reshape(N, OH, OW, cout)


def conv2d_cout1_pallas(x_nhwc, w_oihw, b, stride):
    """Final Cout=1 conv: im2col + VPU dot-product reduction over K tiles."""
    kh = w_oihw.shape[2]
    patches, OH, OW = _im2col(x_nhwc.astype(jnp.bfloat16), kh, stride, pad=1)
    M, K = patches.shape
    w_row = jnp.transpose(w_oihw, (2, 3, 1, 0)).reshape(1, K)

    tm, Mp = _tile(M, _TM_MAX, 16)
    tk, Kp = _k_tiling(K)

    p = patches
    w = w_row.astype(jnp.bfloat16)
    if (Mp, Kp) != (M, K):
        p = jnp.pad(p, ((0, Mp - M), (0, Kp - K)))
    if Kp != K:
        w = jnp.pad(w, ((0, 0), (0, Kp - K)))
    bias = b.astype(jnp.float32).reshape(1, 1)

    out = pl.pallas_call(
        _dot_reduce_kernel,
        out_shape=jax.ShapeDtypeStruct((Mp, 1), jnp.float32),
        grid_spec=pltpu.PrefetchScalarGridSpec(
            num_scalar_prefetch=0,
            grid=(Mp // tm, Kp // tk),
            in_specs=[pl.BlockSpec((tm, tk), lambda i, k: (i, k)),
                      pl.BlockSpec((1, tk), lambda i, k: (0, k)),
                      pl.BlockSpec((1, 1), lambda i, k: (0, 0))],
            out_specs=pl.BlockSpec((tm, 1), lambda i, k: (i, 0)),
            scratch_shapes=[pltpu.VMEM((tm, 1), jnp.float32)]),
        compiler_params=pltpu.CompilerParams(
            dimension_semantics=("parallel", "arbitrary"),
            vmem_limit_bytes=_VMEM_LIMIT),
    )(p, w, bias)

    if Mp != M:
        out = out[:M, :]
    N = x_nhwc.shape[0]
    return out.reshape(N, OH, OW, 1)


def instance_norm_lrelu_pallas(x_nhwc):
    """InstanceNorm2d(affine=False) + LeakyReLU(0.2), tiled over (batch, C).
    Output is bf16 (fed straight into the next bf16 matmul)."""
    N, H, W, C = x_nhwc.shape
    HW = H * W
    x3 = x_nhwc.reshape(N, HW, C)
    if C % 256 == 0:
        tc = 256
    elif C % 128 == 0:
        tc = 128
    else:
        tc = C   # full-extent channel block (always legal)

    out = pl.pallas_call(
        _inorm_lrelu_kernel,
        out_shape=jax.ShapeDtypeStruct((N, HW, C), jnp.bfloat16),
        grid_spec=pltpu.PrefetchScalarGridSpec(
            num_scalar_prefetch=0,
            grid=(N, C // tc),
            in_specs=[pl.BlockSpec((1, HW, tc), lambda n, c: (n, 0, c))],
            out_specs=pl.BlockSpec((1, HW, tc), lambda n, c: (n, 0, c))),
        compiler_params=pltpu.CompilerParams(
            dimension_semantics=("parallel", "parallel"),
            vmem_limit_bytes=_VMEM_LIMIT),
    )(x3)
    return out.reshape(N, H, W, C)


# ----------------------------- Model definition ----------------------------- #

LAYER_CFG = [
    # (in_ch, out_ch, stride, apply_norm)
    (3,   64,  2, False),
    (64,  128, 2, True),
    (128, 256, 2, True),
    (256, 512, 1, True),
    (512, 1,   1, False),   # final bare Conv2d, no norm / no activation
]


def init_params(key):
    params = []
    for i, (cin, cout, _, _) in enumerate(LAYER_CFG):
        kw, kb = jax.random.split(jax.random.fold_in(key, i))
        w = jax.random.normal(kw, (cout, cin, 4, 4), jnp.float32) * 0.05
        b = jax.random.normal(kb, (cout,), jnp.float32) * 0.05
        params.append((w, b))
    return params


def patch_discriminator(x_nchw, params):
    x = jnp.transpose(x_nchw, (0, 2, 3, 1))      # NCHW -> NHWC
    last = len(LAYER_CFG) - 1
    for idx, ((w, b), (cin, cout, stride, norm)) in enumerate(zip(params, LAYER_CFG)):
        if idx == last:
            x = conv2d_cout1_pallas(x, w, b, stride)
        else:
            # PyTorch order: Conv -> [InstanceNorm] -> LeakyReLU.
            # Bias before InstanceNorm cancels exactly (mean subtraction), so
            # it is skipped; LeakyReLU is fused into the conv epilogue when
            # there is no norm, and into the norm kernel otherwise.  Layers
            # feeding InstanceNorm keep f32 outputs (exact statistics);
            # everything else is stored bf16 to halve activation HBM traffic.
            x = conv2d_pallas(x, w, b, stride,
                              apply_bias=not norm,
                              apply_leaky=not norm,
                              out_dtype=jnp.float32 if norm else jnp.bfloat16)
            if norm:
                x = instance_norm_lrelu_pallas(x)
    return jnp.transpose(x, (0, 3, 1, 2))        # NHWC -> NCHW


if __name__ == "__main__":
    key = jax.random.PRNGKey(0)
    pkey, xkey = jax.random.split(key)
    params = init_params(pkey)
    # Small but valid input: 32x32 so the spatial chain
    # 32 -> 16 -> 8 -> 4 -> 3 -> 2 keeps every conv output >= 1.
    x = jax.random.normal(xkey, (2, 3, 32, 32), jnp.float32)

    out = jax.jit(patch_discriminator)(x, params)
    jax.block_until_ready(out)
    assert out.shape == (2, 1, 2, 2), out.shape
    assert bool(jnp.isfinite(out).all())
    print("KERNEL_OK")
</pallas_src>

<mosaic_0001>
module attributes {stable_mosaic.version = 11 : i64} {
  func.func @_matmul_kernel(%arg0: i32, %arg1: i32, %arg2: i32, %arg3: memref<512x48xbf16, #tpu.memory_space<vmem>>, %arg4: memref<48x128xbf16, #tpu.memory_space<vmem>>, %arg5: memref<1x128xf32, #tpu.memory_space<vmem>>, %arg6: memref<512x128xbf16, #tpu.memory_space<vmem>>, %arg7: memref<512x128xf32, #tpu.memory_space<vmem>>) attributes {dimension_semantics = [#tpu.dimension_semantics<parallel>, #tpu.dimension_semantics<parallel>, #tpu.dimension_semantics<arbitrary>], iteration_bounds = array<i64: 1, 1, 1>, scalar_prefetch = 0 : i64, scratch_operands = 1 : i64, tpu.core_type = #tpu.core_type<tc>, window_params = [{transform_indices = @transform_0, window_bounds = array<i64: 512, 48>}, {transform_indices = @transform_1, window_bounds = array<i64: 48, 128>}, {transform_indices = @transform_2, window_bounds = array<i64: 1, 128>}, {transform_indices = @transform_3, window_bounds = array<i64: 512, 128>}]} {
    %c0_i32 = arith.constant 0 : i32
    %0 = arith.cmpi eq, %arg2, %c0_i32 : i32
    %1 = arith.extui %0 : i1 to i32
    %c0_i32_0 = arith.constant 0 : i32
    %2 = arith.cmpi ne, %1, %c0_i32_0 : i32
    scf.if %2 {
      %cst_10 = arith.constant 0.000000e+00 : f32
      %12 = vector.broadcast %cst_10 : f32 to vector<512x128xf32>
      %c0_11 = arith.constant 0 : index
      %c0_12 = arith.constant 0 : index
      %13 = vector.load %arg7[%c0_11, %c0_12] : memref<512x128xf32, #tpu.memory_space<vmem>>, vector<512x128xf32>
      tpu.vector_store %arg7[%c0_11, %c0_12], %12 {strides = array<i32>} : memref<512x128xf32, #tpu.memory_space<vmem>>, vector<512x128xf32>,
    } else {
    }
    %c0 = arith.constant 0 : index
    %c0_1 = arith.constant 0 : index
    %3 = vector.load %arg7[%c0, %c0_1] : memref<512x128xf32, #tpu.memory_space<vmem>>, vector<512x128xf32>
    %c0_2 = arith.constant 0 : index
    %c0_3 = arith.constant 0 : index
    %4 = vector.load %arg3[%c0_2, %c0_3] : memref<512x48xbf16, #tpu.memory_space<vmem>>, vector<512x48xbf16>
    %c0_4 = arith.constant 0 : index
    %c0_5 = arith.constant 0 : index
    %5 = vector.load %arg4[%c0_4, %c0_5] : memref<48x128xbf16, #tpu.memory_space<vmem>>, vector<48x128xbf16>
    %cst = arith.constant dense<0.000000e+00> : vector<512x128xf32>
    %6 = tpu.matmul %4, %5, %cst {dimension_numbers = #tpu.dot_dimension_numbers<[1], [0], [0], [1], [0, 0, 1, 1], [], []>} : vector<512x48xbf16>, vector<48x128xbf16>, vector<512x128xf32> -> vector<512x128xf32>
    %7 = arith.addf %3, %6 : vector<512x128xf32>
    %c0_6 = arith.constant 0 : index
    %c0_7 = arith.constant 0 : index
    %8 = vector.load %arg7[%c0_6, %c0_7] : memref<512x128xf32, #tpu.memory_space<vmem>>, vector<512x128xf32>
    tpu.vector_store %arg7[%c0_6, %c0_7], %7 {strides = array<i32>} : memref<512x128xf32, #tpu.memory_space<vmem>>, vector<512x128xf32>,
    %c0_i32_8 = arith.constant 0 : i32
    %9 = arith.cmpi eq, %arg2, %c0_i32_8 : i32
    %10 = arith.extui %9 : i1 to i32
    %c0_i32_9 = arith.constant 0 : i32
    %11 = arith.cmpi ne, %10, %c0_i32_9 : i32
    scf.if %11 {
      %c0_10 = arith.constant 0 : index
      %c0_11 = arith.constant 0 : index
      %12 = vector.load %arg7[%c0_10, %c0_11] : memref<512x128xf32, #tpu.memory_space<vmem>>, vector<512x128xf32>
      %c0_12 = arith.constant 0 : index
      %c0_13 = arith.constant 0 : index
      %13 = vector.load %arg5[%c0_12, %c0_13] : memref<1x128xf32, #tpu.memory_space<vmem>>, vector<1x128xf32>
      %14 = vector.broadcast %13 : vector<1x128xf32> to vector<512x128xf32>
      %15 = arith.addf %12, %14 : vector<512x128xf32>
      %cst_14 = arith.constant 0.000000e+00 : f32
      %16 = vector.broadcast %cst_14 : f32 to vector<512x128xf32>
      %17 = arith.cmpf oge, %15, %16 : vector<512x128xf32>
      %cst_15 = arith.constant 2.000000e-01 : f32
      %18 = vector.broadcast %cst_15 : f32 to vector<512x128xf32>
      %19 = arith.mulf %18, %15 : vector<512x128xf32>
      %20 = arith.select %17, %15, %19 : vector<512x128xi1>, vector<512x128xf32>
      %21 = arith.truncf %20 : vector<512x128xf32> to vector<512x128xbf16>
      %c0_16 = arith.constant 0 : index
      %c0_17 = arith.constant 0 : index
      %22 = vector.load %arg6[%c0_16, %c0_17] : memref<512x128xbf16, #tpu.memory_space<vmem>>, vector<512x128xbf16>
      tpu.vector_store %arg6[%c0_16, %c0_17], %21 {strides = array<i32>} : memref<512x128xbf16, #tpu.memory_space<vmem>>, vector<512x128xbf16>,
    } else {
    }
    return
  }
  func.func @transform_0(%arg0: i32, %arg1: i32, %arg2: i32) -> (i32, i32) {
    %c0_i32 = arith.constant 0 : i32
    return %arg0, %arg2 : i32, i32
  }
  func.func @transform_1(%arg0: i32, %arg1: i32, %arg2: i32) -> (i32, i32) {
    %c0_i32 = arith.constant 0 : i32
    return %arg2, %arg1 : i32, i32
  }
  func.func @transform_2(%arg0: i32, %arg1: i32, %arg2: i32) -> (i32, i32) {
    %c0_i32 = arith.constant 0 : i32
    %c0_i32_0 = arith.constant 0 : i32
    return %c0_i32, %arg1 : i32, i32
  }
  func.func @transform_3(%arg0: i32, %arg1: i32, %arg2: i32) -> (i32, i32) {
    %c0_i32 = arith.constant 0 : i32
    return %arg0, %arg1 : i32, i32
  }
}

module attributes {stable_mosaic.version = 11 : i64} {
  func.func @_matmul_kernel(%arg0: i32, %arg1: i32, %arg2: i32, %arg3: memref<128x512xbf16, #tpu.memory_space<vmem>>, %arg4: memref<512x128xbf16, #tpu.memory_space<vmem>>, %arg5: memref<128x128xf32, #tpu.memory_space<vmem>>, %arg6: memref<128x128xf32, #tpu.memory_space<vmem>>) attributes {dimension_semantics = [#tpu.dimension_semantics<parallel>, #tpu.dimension_semantics<parallel>, #tpu.dimension_semantics<arbitrary>], iteration_bounds = array<i64: 1, 1, 2>, scalar_prefetch = 0 : i64, scratch_operands = 1 : i64, tpu.core_type = #tpu.core_type<tc>, window_params = [{transform_indices = @transform_0, window_bounds = array<i64: 128, 512>}, {transform_indices = @transform_1, window_bounds = array<i64: 512, 128>}, {transform_indices = @transform_2, window_bounds = array<i64: 128, 128>}]} {
    %c0_i32 = arith.constant 0 : i32
    %0 = arith.cmpi eq, %arg2, %c0_i32 : i32
    %1 = arith.extui %0 : i1 to i32
    %c0_i32_0 = arith.constant 0 : i32
    %2 = arith.cmpi ne, %1, %c0_i32_0 : i32
    scf.if %2 {
      %cst_9 = arith.constant 0.000000e+00 : f32
      %12 = vector.broadcast %cst_9 : f32 to vector<128x128xf32>
      %c0_10 = arith.constant 0 : index
      %c0_11 = arith.constant 0 : index
      %13 = vector.load %arg6[%c0_10, %c0_11] : memref<128x128xf32, #tpu.memory_space<vmem>>, vector<128x128xf32>
      tpu.vector_store %arg6[%c0_10, %c0_11], %12 {strides = array<i32>} : memref<128x128xf32, #tpu.memory_space<vmem>>, vector<128x128xf32>,
    } else {
    }
    %c0 = arith.constant 0 : index
    %c0_1 = arith.constant 0 : index
    %3 = vector.load %arg6[%c0, %c0_1] : memref<128x128xf32, #tpu.memory_space<vmem>>, vector<128x128xf32>
    %c0_2 = arith.constant 0 : index
    %c0_3 = arith.constant 0 : index
    %4 = vector.load %arg3[%c0_2, %c0_3] : memref<128x512xbf16, #tpu.memory_space<vmem>>, vector<128x512xbf16>
    %c0_4 = arith.constant 0 : index
    %c0_5 = arith.constant 0 : index
    %5 = vector.load %arg4[%c0_4, %c0_5] : memref<512x128xbf16, #tpu.memory_space<vmem>>, vector<512x128xbf16>
    %cst = arith.constant dense<0.000000e+00> : vector<128x128xf32>
    %6 = tpu.matmul %4, %5, %cst {dimension_numbers = #tpu.dot_dimension_numbers<[1], [0], [0], [1], [0, 0, 1, 1], [], []>} : vector<128x512xbf16>, vector<512x128xbf16>, vector<128x128xf32> -> vector<128x128xf32>
    %7 = arith.addf %3, %6 : vector<128x128xf32>
    %c0_6 = arith.constant 0 : index
    %c0_7 = arith.constant 0 : index
    %8 = vector.load %arg6[%c0_6, %c0_7] : memref<128x128xf32, #tpu.memory_space<vmem>>, vector<128x128xf32>
    tpu.vector_store %arg6[%c0_6, %c0_7], %7 {strides = array<i32>} : memref<128x128xf32, #tpu.memory_space<vmem>>, vector<128x128xf32>,
    %c1_i32 = arith.constant 1 : i32
    %9 = arith.cmpi eq, %arg2, %c1_i32 : i32
    %10 = arith.extui %9 : i1 to i32
    %c0_i32_8 = arith.constant 0 : i32
    %11 = arith.cmpi ne, %10, %c0_i32_8 : i32
    scf.if %11 {
      %c0_9 = arith.constant 0 : index
      %c0_10 = arith.constant 0 : index
      %12 = vector.load %arg6[%c0_9, %c0_10] : memref<128x128xf32, #tpu.memory_space<vmem>>, vector<128x128xf32>
      %c0_11 = arith.constant 0 : index
      %c0_12 = arith.constant 0 : index
      %13 = vector.load %arg5[%c0_11, %c0_12] : memref<128x128xf32, #tpu.memory_space<vmem>>, vector<128x128xf32>
      tpu.vector_store %arg5[%c0_11, %c0_12], %12 {strides = array<i32>} : memref<128x128xf32, #tpu.memory_space<vmem>>, vector<128x128xf32>,
    } else {
    }
    return
  }
  func.func @transform_0(%arg0: i32, %arg1: i32, %arg2: i32) -> (i32, i32) {
    %c0_i32 = arith.constant 0 : i32
    return %arg0, %arg2 : i32, i32
  }
  func.func @transform_1(%arg0: i32, %arg1: i32, %arg2: i32) -> (i32, i32) {
    %c0_i32 = arith.constant 0 : i32
    return %arg2, %arg1 : i32, i32
  }
  func.func @transform_2(%arg0: i32, %arg1: i32, %arg2: i32) -> (i32, i32) {
    %c0_i32 = arith.constant 0 : i32
    return %arg0, %arg1 : i32, i32
  }
}

module attributes {stable_mosaic.version = 11 : i64} {
  func.func @_inorm_lrelu_kernel(%arg0: i32, %arg1: i32, %arg2: memref<1x64x128xf32, #tpu.memory_space<vmem>>, %arg3: memref<1x64x128xbf16, #tpu.memory_space<vmem>>) attributes {dimension_semantics = [#tpu.dimension_semantics<parallel>, #tpu.dimension_semantics<parallel>], iteration_bounds = array<i64: 2, 1>, scalar_prefetch = 0 : i64, scratch_operands = 0 : i64, tpu.core_type = #tpu.core_type<tc>, window_params = [{transform_indices = @transform_0, window_bounds = array<i64: 1, 64, 128>}, {transform_indices = @transform_1, window_bounds = array<i64: 1, 64, 128>}]} {
    %c0 = arith.constant 0 : index
    %c0_0 = arith.constant 0 : index
    %c0_1 = arith.constant 0 : index
    %0 = vector.load %arg2[%c0, %c0_0, %c0_1] : memref<1x64x128xf32, #tpu.memory_space<vmem>>, vector<1x64x128xf32>
    %cst = arith.constant dense<0.000000e+00> : vector<1x128xf32>
    %1 = vector.multi_reduction <add>, %0, %cst [1] : vector<1x64x128xf32> to vector<1x128xf32>
    %2 = vector.shape_cast %1 : vector<1x128xf32> to vector<1x1x128xf32>
    %cst_2 = arith.constant 6.400000e+01 : f32
    %3 = vector.broadcast %cst_2 : f32 to vector<1x1x128xf32>
    %4 = arith.divf %2, %3 : vector<1x1x128xf32>
    %5 = vector.broadcast %4 : vector<1x1x128xf32> to vector<1x64x128xf32>
    %6 = arith.subf %0, %5 : vector<1x64x128xf32>
    %7 = arith.mulf %6, %6 : vector<1x64x128xf32>
    %cst_3 = arith.constant dense<0.000000e+00> : vector<1x128xf32>
    %8 = vector.multi_reduction <add>, %7, %cst_3 [1] : vector<1x64x128xf32> to vector<1x128xf32>
    %9 = vector.shape_cast %8 : vector<1x128xf32> to vector<1x1x128xf32>
    %cst_4 = arith.constant 6.400000e+01 : f32
    %10 = vector.broadcast %cst_4 : f32 to vector<1x1x128xf32>
    %11 = arith.divf %9, %10 : vector<1x1x128xf32>
    %12 = vector.broadcast %4 : vector<1x1x128xf32> to vector<1x64x128xf32>
    %13 = arith.subf %0, %12 : vector<1x64x128xf32>
    %cst_5 = arith.constant 9.99999974E-6 : f32
    %14 = vector.broadcast %cst_5 : f32 to vector<1x1x128xf32>
    %15 = arith.addf %11, %14 : vector<1x1x128xf32>
    %16 = math.rsqrt %15 : vector<1x1x128xf32>
    %17 = vector.broadcast %16 : vector<1x1x128xf32> to vector<1x64x128xf32>
    %18 = arith.mulf %13, %17 : vector<1x64x128xf32>
    %cst_6 = arith.constant 0.000000e+00 : f32
    %19 = vector.broadcast %cst_6 : f32 to vector<1x64x128xf32>
    %20 = arith.cmpf oge, %18, %19 : vector<1x64x128xf32>
    %cst_7 = arith.constant 2.000000e-01 : f32
    %21 = vector.broadcast %cst_7 : f32 to vector<1x64x128xf32>
    %22 = arith.mulf %21, %18 : vector<1x64x128xf32>
    %23 = arith.select %20, %18, %22 : vector<1x64x128xi1>, vector<1x64x128xf32>
    %24 = arith.truncf %23 : vector<1x64x128xf32> to vector<1x64x128xbf16>
    %c0_8 = arith.constant 0 : index
    %c0_9 = arith.constant 0 : index
    %c0_10 = arith.constant 0 : index
    %25 = vector.load %arg3[%c0_8, %c0_9, %c0_10] : memref<1x64x128xbf16, #tpu.memory_space<vmem>>, vector<1x64x128xbf16>
    tpu.vector_store %arg3[%c0_8, %c0_9, %c0_10], %24 {strides = array<i32>} : memref<1x64x128xbf16, #tpu.memory_space<vmem>>, vector<1x64x128xbf16>,
    return
  }
  func.func @transform_0(%arg0: i32, %arg1: i32) -> (i32, i32, i32) {
    %c0_i32 = arith.constant 0 : i32
    %c0_i32_0 = arith.constant 0 : i32
    return %arg0, %c0_i32, %arg1 : i32, i32, i32
  }
  func.func @transform_1(%arg0: i32, %arg1: i32) -> (i32, i32, i32) {
    %c0_i32 = arith.constant 0 : i32
    %c0_i32_0 = arith.constant 0 : i32
    return %arg0, %c0_i32, %arg1 : i32, i32, i32
  }
}

module attributes {stable_mosaic.version = 11 : i64} {
  func.func @_matmul_kernel(%arg0: i32, %arg1: i32, %arg2: i32, %arg3: memref<32x512xbf16, #tpu.memory_space<vmem>>, %arg4: memref<512x256xbf16, #tpu.memory_space<vmem>>, %arg5: memref<32x256xf32, #tpu.memory_space<vmem>>, %arg6: memref<32x256xf32, #tpu.memory_space<vmem>>) attributes {dimension_semantics = [#tpu.dimension_semantics<parallel>, #tpu.dimension_semantics<parallel>, #tpu.dimension_semantics<arbitrary>], iteration_bounds = array<i64: 1, 1, 4>, scalar_prefetch = 0 : i64, scratch_operands = 1 : i64, tpu.core_type = #tpu.core_type<tc>, window_params = [{transform_indices = @transform_0, window_bounds = array<i64: 32, 512>}, {transform_indices = @transform_1, window_bounds = array<i64: 512, 256>}, {transform_indices = @transform_2, window_bounds = array<i64: 32, 256>}]} {
    %c0_i32 = arith.constant 0 : i32
    %0 = arith.cmpi eq, %arg2, %c0_i32 : i32
    %1 = arith.extui %0 : i1 to i32
    %c0_i32_0 = arith.constant 0 : i32
    %2 = arith.cmpi ne, %1, %c0_i32_0 : i32
    scf.if %2 {
      %cst_9 = arith.constant 0.000000e+00 : f32
      %12 = vector.broadcast %cst_9 : f32 to vector<32x256xf32>
      %c0_10 = arith.constant 0 : index
      %c0_11 = arith.constant 0 : index
      %13 = vector.load %arg6[%c0_10, %c0_11] : memref<32x256xf32, #tpu.memory_space<vmem>>, vector<32x256xf32>
      tpu.vector_store %arg6[%c0_10, %c0_11], %12 {strides = array<i32>} : memref<32x256xf32, #tpu.memory_space<vmem>>, vector<32x256xf32>,
    } else {
    }
    %c0 = arith.constant 0 : index
    %c0_1 = arith.constant 0 : index
    %3 = vector.load %arg6[%c0, %c0_1] : memref<32x256xf32, #tpu.memory_space<vmem>>, vector<32x256xf32>
    %c0_2 = arith.constant 0 : index
    %c0_3 = arith.constant 0 : index
    %4 = vector.load %arg3[%c0_2, %c0_3] : memref<32x512xbf16, #tpu.memory_space<vmem>>, vector<32x512xbf16>
    %c0_4 = arith.constant 0 : index
    %c0_5 = arith.constant 0 : index
    %5 = vector.load %arg4[%c0_4, %c0_5] : memref<512x256xbf16, #tpu.memory_space<vmem>>, vector<512x256xbf16>
    %cst = arith.constant dense<0.000000e+00> : vector<32x256xf32>
    %6 = tpu.matmul %4, %5, %cst {dimension_numbers = #tpu.dot_dimension_numbers<[1], [0], [0], [1], [0, 0, 1, 1], [], []>} : vector<32x512xbf16>, vector<512x256xbf16>, vector<32x256xf32> -> vector<32x256xf32>
    %7 = arith.addf %3, %6 : vector<32x256xf32>
    %c0_6 = arith.constant 0 : index
    %c0_7 = arith.constant 0 : index
    %8 = vector.load %arg6[%c0_6, %c0_7] : memref<32x256xf32, #tpu.memory_space<vmem>>, vector<32x256xf32>
    tpu.vector_store %arg6[%c0_6, %c0_7], %7 {strides = array<i32>} : memref<32x256xf32, #tpu.memory_space<vmem>>, vector<32x256xf32>,
    %c3_i32 = arith.constant 3 : i32
    %9 = arith.cmpi eq, %arg2, %c3_i32 : i32
    %10 = arith.extui %9 : i1 to i32
    %c0_i32_8 = arith.constant 0 : i32
    %11 = arith.cmpi ne, %10, %c0_i32_8 : i32
    scf.if %11 {
      %c0_9 = arith.constant 0 : index
      %c0_10 = arith.constant 0 : index
      %12 = vector.load %arg6[%c0_9, %c0_10] : memref<32x256xf32, #tpu.memory_space<vmem>>, vector<32x256xf32>
      %c0_11 = arith.constant 0 : index
      %c0_12 = arith.constant 0 : index
      %13 = vector.load %arg5[%c0_11, %c0_12] : memref<32x256xf32, #tpu.memory_space<vmem>>, vector<32x256xf32>
      tpu.vector_store %arg5[%c0_11, %c0_12], %12 {strides = array<i32>} : memref<32x256xf32, #tpu.memory_space<vmem>>, vector<32x256xf32>,
    } else {
    }
    return
  }
  func.func @transform_0(%arg0: i32, %arg1: i32, %arg2: i32) -> (i32, i32) {
    %c0_i32 = arith.constant 0 : i32
    return %arg0, %arg2 : i32, i32
  }
  func.func @transform_1(%arg0: i32, %arg1: i32, %arg2: i32) -> (i32, i32) {
    %c0_i32 = arith.constant 0 : i32
    return %arg2, %arg1 : i32, i32
  }
  func.func @transform_2(%arg0: i32, %arg1: i32, %arg2: i32) -> (i32, i32) {
    %c0_i32 = arith.constant 0 : i32
    return %arg0, %arg1 : i32, i32
  }
}

module attributes {stable_mosaic.version = 11 : i64} {
  func.func @_inorm_lrelu_kernel(%arg0: i32, %arg1: i32, %arg2: memref<1x16x256xf32, #tpu.memory_space<vmem>>, %arg3: memref<1x16x256xbf16, #tpu.memory_space<vmem>>) attributes {dimension_semantics = [#tpu.dimension_semantics<parallel>, #tpu.dimension_semantics<parallel>], iteration_bounds = array<i64: 2, 1>, scalar_prefetch = 0 : i64, scratch_operands = 0 : i64, tpu.core_type = #tpu.core_type<tc>, window_params = [{transform_indices = @transform_0, window_bounds = array<i64: 1, 16, 256>}, {transform_indices = @transform_1, window_bounds = array<i64: 1, 16, 256>}]} {
    %c0 = arith.constant 0 : index
    %c0_0 = arith.constant 0 : index
    %c0_1 = arith.constant 0 : index
    %0 = vector.load %arg2[%c0, %c0_0, %c0_1] : memref<1x16x256xf32, #tpu.memory_space<vmem>>, vector<1x16x256xf32>
    %cst = arith.constant dense<0.000000e+00> : vector<1x256xf32>
    %1 = vector.multi_reduction <add>, %0, %cst [1] : vector<1x16x256xf32> to vector<1x256xf32>
    %2 = vector.shape_cast %1 : vector<1x256xf32> to vector<1x1x256xf32>
    %cst_2 = arith.constant 1.600000e+01 : f32
    %3 = vector.broadcast %cst_2 : f32 to vector<1x1x256xf32>
    %4 = arith.divf %2, %3 : vector<1x1x256xf32>
    %5 = vector.broadcast %4 : vector<1x1x256xf32> to vector<1x16x256xf32>
    %6 = arith.subf %0, %5 : vector<1x16x256xf32>
    %7 = arith.mulf %6, %6 : vector<1x16x256xf32>
    %cst_3 = arith.constant dense<0.000000e+00> : vector<1x256xf32>
    %8 = vector.multi_reduction <add>, %7, %cst_3 [1] : vector<1x16x256xf32> to vector<1x256xf32>
    %9 = vector.shape_cast %8 : vector<1x256xf32> to vector<1x1x256xf32>
    %cst_4 = arith.constant 1.600000e+01 : f32
    %10 = vector.broadcast %cst_4 : f32 to vector<1x1x256xf32>
    %11 = arith.divf %9, %10 : vector<1x1x256xf32>
    %12 = vector.broadcast %4 : vector<1x1x256xf32> to vector<1x16x256xf32>
    %13 = arith.subf %0, %12 : vector<1x16x256xf32>
    %cst_5 = arith.constant 9.99999974E-6 : f32
    %14 = vector.broadcast %cst_5 : f32 to vector<1x1x256xf32>
    %15 = arith.addf %11, %14 : vector<1x1x256xf32>
    %16 = math.rsqrt %15 : vector<1x1x256xf32>
    %17 = vector.broadcast %16 : vector<1x1x256xf32> to vector<1x16x256xf32>
    %18 = arith.mulf %13, %17 : vector<1x16x256xf32>
    %cst_6 = arith.constant 0.000000e+00 : f32
    %19 = vector.broadcast %cst_6 : f32 to vector<1x16x256xf32>
    %20 = arith.cmpf oge, %18, %19 : vector<1x16x256xf32>
    %cst_7 = arith.constant 2.000000e-01 : f32
    %21 = vector.broadcast %cst_7 : f32 to vector<1x16x256xf32>
    %22 = arith.mulf %21, %18 : vector<1x16x256xf32>
    %23 = arith.select %20, %18, %22 : vector<1x16x256xi1>, vector<1x16x256xf32>
    %24 = arith.truncf %23 : vector<1x16x256xf32> to vector<1x16x256xbf16>
    %c0_8 = arith.constant 0 : index
    %c0_9 = arith.constant 0 : index
    %c0_10 = arith.constant 0 : index
    %25 = vector.load %arg3[%c0_8, %c0_9, %c0_10] : memref<1x16x256xbf16, #tpu.memory_space<vmem>>, vector<1x16x256xbf16>
    tpu.vector_store %arg3[%c0_8, %c0_9, %c0_10], %24 {strides = array<i32>} : memref<1x16x256xbf16, #tpu.memory_space<vmem>>, vector<1x16x256xbf16>,
    return
  }
  func.func @transform_0(%arg0: i32, %arg1: i32) -> (i32, i32, i32) {
    %c0_i32 = arith.constant 0 : i32
    %c0_i32_0 = arith.constant 0 : i32
    return %arg0, %c0_i32, %arg1 : i32, i32, i32
  }
  func.func @transform_1(%arg0: i32, %arg1: i32) -> (i32, i32, i32) {
    %c0_i32 = arith.constant 0 : i32
    %c0_i32_0 = arith.constant 0 : i32
    return %arg0, %c0_i32, %arg1 : i32, i32, i32
  }
}

module attributes {stable_mosaic.version = 11 : i64} {
  func.func @_matmul_kernel(%arg0: i32, %arg1: i32, %arg2: i32, %arg3: memref<32x512xbf16, #tpu.memory_space<vmem>>, %arg4: memref<512x256xbf16, #tpu.memory_space<vmem>>, %arg5: memref<32x256xf32, #tpu.memory_space<vmem>>, %arg6: memref<32x256xf32, #tpu.memory_space<vmem>>) attributes {dimension_semantics = [#tpu.dimension_semantics<parallel>, #tpu.dimension_semantics<parallel>, #tpu.dimension_semantics<arbitrary>], iteration_bounds = array<i64: 1, 2, 8>, scalar_prefetch = 0 : i64, scratch_operands = 1 : i64, tpu.core_type = #tpu.core_type<tc>, window_params = [{transform_indices = @transform_0, window_bounds = array<i64: 32, 512>}, {transform_indices = @transform_1, window_bounds = array<i64: 512, 256>}, {transform_indices = @transform_2, window_bounds = array<i64: 32, 256>}]} {
    %c0_i32 = arith.constant 0 : i32
    %0 = arith.cmpi eq, %arg2, %c0_i32 : i32
    %1 = arith.extui %0 : i1 to i32
    %c0_i32_0 = arith.constant 0 : i32
    %2 = arith.cmpi ne, %1, %c0_i32_0 : i32
    scf.if %2 {
      %cst_9 = arith.constant 0.000000e+00 : f32
      %12 = vector.broadcast %cst_9 : f32 to vector<32x256xf32>
      %c0_10 = arith.constant 0 : index
      %c0_11 = arith.constant 0 : index
      %13 = vector.load %arg6[%c0_10, %c0_11] : memref<32x256xf32, #tpu.memory_space<vmem>>, vector<32x256xf32>
      tpu.vector_store %arg6[%c0_10, %c0_11], %12 {strides = array<i32>} : memref<32x256xf32, #tpu.memory_space<vmem>>, vector<32x256xf32>,
    } else {
    }
    %c0 = arith.constant 0 : index
    %c0_1 = arith.constant 0 : index
    %3 = vector.load %arg6[%c0, %c0_1] : memref<32x256xf32, #tpu.memory_space<vmem>>, vector<32x256xf32>
    %c0_2 = arith.constant 0 : index
    %c0_3 = arith.constant 0 : index
    %4 = vector.load %arg3[%c0_2, %c0_3] : memref<32x512xbf16, #tpu.memory_space<vmem>>, vector<32x512xbf16>
    %c0_4 = arith.constant 0 : index
    %c0_5 = arith.constant 0 : index
    %5 = vector.load %arg4[%c0_4, %c0_5] : memref<512x256xbf16, #tpu.memory_space<vmem>>, vector<512x256xbf16>
    %cst = arith.constant dense<0.000000e+00> : vector<32x256xf32>
    %6 = tpu.matmul %4, %5, %cst {dimension_numbers = #tpu.dot_dimension_numbers<[1], [0], [0], [1], [0, 0, 1, 1], [], []>} : vector<32x512xbf16>, vector<512x256xbf16>, vector<32x256xf32> -> vector<32x256xf32>
    %7 = arith.addf %3, %6 : vector<32x256xf32>
    %c0_6 = arith.constant 0 : index
    %c0_7 = arith.constant 0 : index
    %8 = vector.load %arg6[%c0_6, %c0_7] : memref<32x256xf32, #tpu.memory_space<vmem>>, vector<32x256xf32>
    tpu.vector_store %arg6[%c0_6, %c0_7], %7 {strides = array<i32>} : memref<32x256xf32, #tpu.memory_space<vmem>>, vector<32x256xf32>,
    %c7_i32 = arith.constant 7 : i32
    %9 = arith.cmpi eq, %arg2, %c7_i32 : i32
    %10 = arith.extui %9 : i1 to i32
    %c0_i32_8 = arith.constant 0 : i32
    %11 = arith.cmpi ne, %10, %c0_i32_8 : i32
    scf.if %11 {
      %c0_9 = arith.constant 0 : index
      %c0_10 = arith.constant 0 : index
      %12 = vector.load %arg6[%c0_9, %c0_10] : memref<32x256xf32, #tpu.memory_space<vmem>>, vector<32x256xf32>
      %c0_11 = arith.constant 0 : index
      %c0_12 = arith.constant 0 : index
      %13 = vector.load %arg5[%c0_11, %c0_12] : memref<32x256xf32, #tpu.memory_space<vmem>>, vector<32x256xf32>
      tpu.vector_store %arg5[%c0_11, %c0_12], %12 {strides = array<i32>} : memref<32x256xf32, #tpu.memory_space<vmem>>, vector<32x256xf32>,
    } else {
    }
    return
  }
  func.func @transform_0(%arg0: i32, %arg1: i32, %arg2: i32) -> (i32, i32) {
    %c0_i32 = arith.constant 0 : i32
    return %arg0, %arg2 : i32, i32
  }
  func.func @transform_1(%arg0: i32, %arg1: i32, %arg2: i32) -> (i32, i32) {
    %c0_i32 = arith.constant 0 : i32
    return %arg2, %arg1 : i32, i32
  }
  func.func @transform_2(%arg0: i32, %arg1: i32, %arg2: i32) -> (i32, i32) {
    %c0_i32 = arith.constant 0 : i32
    return %arg0, %arg1 : i32, i32
  }
}

module attributes {stable_mosaic.version = 11 : i64} {
  func.func @_inorm_lrelu_kernel(%arg0: i32, %arg1: i32, %arg2: memref<1x9x256xf32, #tpu.memory_space<vmem>>, %arg3: memref<1x9x256xbf16, #tpu.memory_space<vmem>>) attributes {dimension_semantics = [#tpu.dimension_semantics<parallel>, #tpu.dimension_semantics<parallel>], iteration_bounds = array<i64: 2, 2>, scalar_prefetch = 0 : i64, scratch_operands = 0 : i64, tpu.core_type = #tpu.core_type<tc>, window_params = [{transform_indices = @transform_0, window_bounds = array<i64: 1, 9, 256>}, {transform_indices = @transform_1, window_bounds = array<i64: 1, 9, 256>}]} {
    %c0 = arith.constant 0 : index
    %c0_0 = arith.constant 0 : index
    %c0_1 = arith.constant 0 : index
    %0 = vector.load %arg2[%c0, %c0_0, %c0_1] : memref<1x9x256xf32, #tpu.memory_space<vmem>>, vector<1x9x256xf32>
    %cst = arith.constant dense<0.000000e+00> : vector<1x256xf32>
    %1 = vector.multi_reduction <add>, %0, %cst [1] : vector<1x9x256xf32> to vector<1x256xf32>
    %2 = vector.shape_cast %1 : vector<1x256xf32> to vector<1x1x256xf32>
    %cst_2 = arith.constant 9.000000e+00 : f32
    %3 = vector.broadcast %cst_2 : f32 to vector<1x1x256xf32>
    %4 = arith.divf %2, %3 : vector<1x1x256xf32>
    %5 = vector.broadcast %4 : vector<1x1x256xf32> to vector<1x9x256xf32>
    %6 = arith.subf %0, %5 : vector<1x9x256xf32>
    %7 = arith.mulf %6, %6 : vector<1x9x256xf32>
    %cst_3 = arith.constant dense<0.000000e+00> : vector<1x256xf32>
    %8 = vector.multi_reduction <add>, %7, %cst_3 [1] : vector<1x9x256xf32> to vector<1x256xf32>
    %9 = vector.shape_cast %8 : vector<1x256xf32> to vector<1x1x256xf32>
    %cst_4 = arith.constant 9.000000e+00 : f32
    %10 = vector.broadcast %cst_4 : f32 to vector<1x1x256xf32>
    %11 = arith.divf %9, %10 : vector<1x1x256xf32>
    %12 = vector.broadcast %4 : vector<1x1x256xf32> to vector<1x9x256xf32>
    %13 = arith.subf %0, %12 : vector<1x9x256xf32>
    %cst_5 = arith.constant 9.99999974E-6 : f32
    %14 = vector.broadcast %cst_5 : f32 to vector<1x1x256xf32>
    %15 = arith.addf %11, %14 : vector<1x1x256xf32>
    %16 = math.rsqrt %15 : vector<1x1x256xf32>
    %17 = vector.broadcast %16 : vector<1x1x256xf32> to vector<1x9x256xf32>
    %18 = arith.mulf %13, %17 : vector<1x9x256xf32>
    %cst_6 = arith.constant 0.000000e+00 : f32
    %19 = vector.broadcast %cst_6 : f32 to vector<1x9x256xf32>
    %20 = arith.cmpf oge, %18, %19 : vector<1x9x256xf32>
    %cst_7 = arith.constant 2.000000e-01 : f32
    %21 = vector.broadcast %cst_7 : f32 to vector<1x9x256xf32>
    %22 = arith.mulf %21, %18 : vector<1x9x256xf32>
    %23 = arith.select %20, %18, %22 : vector<1x9x256xi1>, vector<1x9x256xf32>
    %24 = arith.truncf %23 : vector<1x9x256xf32> to vector<1x9x256xbf16>
    %c0_8 = arith.constant 0 : index
    %c0_9 = arith.constant 0 : index
    %c0_10 = arith.constant 0 : index
    %25 = vector.load %arg3[%c0_8, %c0_9, %c0_10] : memref<1x9x256xbf16, #tpu.memory_space<vmem>>, vector<1x9x256xbf16>
    tpu.vector_store %arg3[%c0_8, %c0_9, %c0_10], %24 {strides = array<i32>} : memref<1x9x256xbf16, #tpu.memory_space<vmem>>, vector<1x9x256xbf16>,
    return
  }
  func.func @transform_0(%arg0: i32, %arg1: i32) -> (i32, i32, i32) {
    %c0_i32 = arith.constant 0 : i32
    %c0_i32_0 = arith.constant 0 : i32
    return %arg0, %c0_i32, %arg1 : i32, i32, i32
  }
  func.func @transform_1(%arg0: i32, %arg1: i32) -> (i32, i32, i32) {
    %c0_i32 = arith.constant 0 : i32
    %c0_i32_0 = arith.constant 0 : i32
    return %arg0, %c0_i32, %arg1 : i32, i32, i32
  }
}

module attributes {stable_mosaic.version = 11 : i64} {
  func.func @_dot_reduce_kernel(%arg0: i32, %arg1: i32, %arg2: memref<16x512xbf16, #tpu.memory_space<vmem>>, %arg3: memref<1x512xbf16, #tpu.memory_space<vmem>>, %arg4: memref<1x1xf32, #tpu.memory_space<vmem>>, %arg5: memref<16x1xf32, #tpu.memory_space<vmem>>, %arg6: memref<16x1xf32, #tpu.memory_space<vmem>>) attributes {dimension_semantics = [#tpu.dimension_semantics<parallel>, #tpu.dimension_semantics<arbitrary>], iteration_bounds = array<i64: 1, 16>, scalar_prefetch = 0 : i64, scratch_operands = 1 : i64, tpu.core_type = #tpu.core_type<tc>, window_params = [{transform_indices = @transform_0, window_bounds = array<i64: 16, 512>}, {transform_indices = @transform_1, window_bounds = array<i64: 1, 512>}, {pipeline_mode = #tpu.pipeline_mode<synchronous>, transform_indices = @transform_2, window_bounds = array<i64: 1, 1>}, {transform_indices = @transform_3, window_bounds = array<i64: 16, 1>}]} {
    %c0_i32 = arith.constant 0 : i32
    %0 = arith.cmpi eq, %arg1, %c0_i32 : i32
    %1 = arith.extui %0 : i1 to i32
    %c0_i32_0 = arith.constant 0 : i32
    %2 = arith.cmpi ne, %1, %c0_i32_0 : i32
    scf.if %2 {
      %cst_9 = arith.constant 0.000000e+00 : f32
      %17 = vector.broadcast %cst_9 : f32 to vector<16x1xf32>
      %c0_10 = arith.constant 0 : index
      %c0_11 = arith.constant 0 : index
      %18 = vector.load %arg6[%c0_10, %c0_11] : memref<16x1xf32, #tpu.memory_space<vmem>>, vector<16x1xf32>
      tpu.vector_store %arg6[%c0_10, %c0_11], %17 {strides = array<i32>} : memref<16x1xf32, #tpu.memory_space<vmem>>, vector<16x1xf32>,
    } else {
    }
    %c0 = arith.constant 0 : index
    %c0_1 = arith.constant 0 : index
    %3 = vector.load %arg2[%c0, %c0_1] : memref<16x512xbf16, #tpu.memory_space<vmem>>, vector<16x512xbf16>
    %4 = arith.extf %3 : vector<16x512xbf16> to vector<16x512xf32>
    %c0_2 = arith.constant 0 : index
    %c0_3 = arith.constant 0 : index
    %5 = vector.load %arg3[%c0_2, %c0_3] : memref<1x512xbf16, #tpu.memory_space<vmem>>, vector<1x512xbf16>
    %6 = arith.extf %5 : vector<1x512xbf16> to vector<1x512xf32>
    %7 = vector.broadcast %6 : vector<1x512xf32> to vector<16x512xf32>
    %8 = arith.mulf %4, %7 : vector<16x512xf32>
    %c0_4 = arith.constant 0 : index
    %c0_5 = arith.constant 0 : index
    %9 = vector.load %arg6[%c0_4, %c0_5] : memref<16x1xf32, #tpu.memory_space<vmem>>, vector<16x1xf32>
    %cst = arith.constant dense<0.000000e+00> : vector<16xf32>
    %10 = vector.multi_reduction <add>, %8, %cst [1] : vector<16x512xf32> to vector<16xf32>
    %11 = vector.shape_cast %10 : vector<16xf32> to vector<16x1xf32>
    %12 = arith.addf %9, %11 : vector<16x1xf32>
    %c0_6 = arith.constant 0 : index
    %c0_7 = arith.constant 0 : index
    %13 = vector.load %arg6[%c0_6, %c0_7] : memref<16x1xf32, #tpu.memory_space<vmem>>, vector<16x1xf32>
    tpu.vector_store %arg6[%c0_6, %c0_7], %12 {strides = array<i32>} : memref<16x1xf32, #tpu.memory_space<vmem>>, vector<16x1xf32>,
    %c15_i32 = arith.constant 15 : i32
    %14 = arith.cmpi eq, %arg1, %c15_i32 : i32
    %15 = arith.extui %14 : i1 to i32
    %c0_i32_8 = arith.constant 0 : i32
    %16 = arith.cmpi ne, %15, %c0_i32_8 : i32
    scf.if %16 {
      %c0_9 = arith.constant 0 : index
      %c0_10 = arith.constant 0 : index
      %17 = vector.load %arg6[%c0_9, %c0_10] : memref<16x1xf32, #tpu.memory_space<vmem>>, vector<16x1xf32>
      %c0_11 = arith.constant 0 : index
      %c0_12 = arith.constant 0 : index
      %18 = vector.load %arg4[%c0_11, %c0_12] : memref<1x1xf32, #tpu.memory_space<vmem>>, vector<1x1xf32>
      %19 = vector.broadcast %18 : vector<1x1xf32> to vector<16x1xf32>
      %20 = arith.addf %17, %19 : vector<16x1xf32>
      %c0_13 = arith.constant 0 : index
      %c0_14 = arith.constant 0 : index
      %21 = vector.load %arg5[%c0_13, %c0_14] : memref<16x1xf32, #tpu.memory_space<vmem>>, vector<16x1xf32>
      tpu.vector_store %arg5[%c0_13, %c0_14], %20 {strides = array<i32>} : memref<16x1xf32, #tpu.memory_space<vmem>>, vector<16x1xf32>,
    } else {
    }
    return
  }
  func.func @transform_0(%arg0: i32, %arg1: i32) -> (i32, i32) {
    %c0_i32 = arith.constant 0 : i32
    return %arg0, %arg1 : i32, i32
  }
  func.func @transform_1(%arg0: i32, %arg1: i32) -> (i32, i32) {
    %c0_i32 = arith.constant 0 : i32
    %c0_i32_0 = arith.constant 0 : i32
    return %c0_i32, %arg1 : i32, i32
  }
  func.func @transform_2(%arg0: i32, %arg1: i32) -> (i32, i32) {
    %c0_i32 = arith.constant 0 : i32
    %c0_i32_0 = arith.constant 0 : i32
    %c0_i32_1 = arith.constant 0 : i32
    return %c0_i32, %c0_i32_0 : i32, i32
  }
  func.func @transform_3(%arg0: i32, %arg1: i32) -> (i32, i32) {
    %c0_i32 = arith.constant 0 : i32
    %c0_i32_0 = arith.constant 0 : i32
    return %arg0, %c0_i32 : i32, i32
  }
}

</mosaic_0001>

<bundles_post_ra>
// kernel: patch_discriminator.8
= control target key start
LH: loop header
LB: loop body
LE: loop exit
PB: predicated region body
PF: predicated region fallthrough
CT: control target
= control target key end

     0   :  { %vm395_vm0 = vcmask 392192   ;;  %s2427_s1 = inlined_call_operand.vmem [shape: bf16[48,128], index: 1, kind: input, shape index: {}]   ;;  %s2428_s0 = inlined_call_operand.vmem [shape: bf16[512,48], index: 0, kind: input, shape index: {}]   ;;  %s2429_s2 = inlined_call_operand.vmem [shape: f32[1,128], index: 2, kind: input, shape index: {}]   ;;  %s2430_s3 = inlined_call_operand.vmem [shape: bf16[512,128], index: 3, kind: output, shape index: {}]  }
   0x1   :  { %v2061_v0 = vld [vmem:[%s2427_s1] sm:$0xff]   ;;  %v2062_v1 = vld [vmem:[%s2427_s1 + $0x8] sm:$0xff]   ;;  %v2063_v2 = vld [vmem:[%s2427_s1 + $0x10] sm:$0xff]  }
   0x2   :  { %1985 = vmatprep.subr.bf16.mxu0 %v2061_v0  ;;  %2055 = vmatprep.subr.bf16.mxu1 %v2061_v0  ;;  %v2064_v3 = vld [vmem:[%s2428_s0] sm:$0xff]   ;;  %v2066_v5 = vld [vmem:[%s2428_s0 + $0x8] sm:$0xff]   ;;  %v2068_v7 = vld [vmem:[%s2428_s0 + $0x10] sm:$0xff]  }
   0x3   :  { %1986 = vmatpush3.bf16.msra.mxu0 %v2061_v0  ;;  %2058 = vmatpush3.bf16.msra.mxu1 %v2061_v0  ;;  %v2065_v4 = vld [vmem:[%s2428_s0 + $0x80] sm:$0xff]   ;;  %v2067_v6 = vld [vmem:[%s2428_s0 + $0x88] sm:$0xff]   ;;  %v2069_v8 = vld [vmem:[%s2428_s0 + $0x90] sm:$0xff]  }
   0x4   :  { %1987 = vmatprep.subr.bf16.mxu0 %v2062_v1  ;;  %2056 = vmatprep.subr.bf16.mxu1 %v2062_v1  ;;  %v2070_v9 = vld [vmem:[%s2428_s0 + $0x18] sm:$0xff]   ;;  %v2072_v11 = vld [vmem:[%s2428_s0 + $0x20] sm:$0xff]   ;;  %v2074_v13 = vld [vmem:[%s2428_s0 + $0x28] sm:$0xff]  }
   0x5   :  { %1991 = vmatprep.mubr.msk.bf16.mxu0 %vm395_vm0, %v2064_v3  ;;  %2023 = vmatprep.mubr.msk.bf16.mxu1 %vm395_vm0, %v2065_v4  ;;  %v2071_v10 = vld [vmem:[%s2428_s0 + $0x98] sm:$0xff]   ;;  %v2073_v12 = vld [vmem:[%s2428_s0 + $0xa0] sm:$0xff]   ;;  %v2075_v14 = vld [vmem:[%s2428_s0 + $0xa8] sm:$0xff]  }
   0x6   :  { %v2076_v15 = vld [vmem:[%s2428_s0 + $0x30] sm:$0xff]   ;;  %v2078_v17 = vld [vmem:[%s2428_s0 + $0x38] sm:$0xff]   ;;  %v2080_v19 = vld [vmem:[%s2428_s0 + $0x40] sm:$0xff]  }
   0x7   :  { %1988 = vmatpush3.bf16.msra.mxu0 %v2062_v1  ;;  %2059 = vmatpush3.bf16.msra.mxu1 %v2062_v1  ;;  %v2077_v16 = vld [vmem:[%s2428_s0 + $0xb0] sm:$0xff]   ;;  %v2079_v18 = vld [vmem:[%s2428_s0 + $0xb8] sm:$0xff]   ;;  %v2081_v20 = vld [vmem:[%s2428_s0 + $0xc0] sm:$0xff]  }
   0x8   :  { %1989 = vmatprep.subr.bf16.mxu0 %v2063_v2  ;;  %2057 = vmatprep.subr.bf16.mxu1 %v2063_v2  ;;  %v2082_v21 = vld [vmem:[%s2428_s0 + $0x48] sm:$0xff]   ;;  %v2084_v23 = vld [vmem:[%s2428_s0 + $0x50] sm:$0xff]   ;;  %v2086_v25 = vld [vmem:[%s2428_s0 + $0x58] sm:$0xff]  }
   0x9   :  { %v2083_v22 = vld [vmem:[%s2428_s0 + $0xc8] sm:$0xff]   ;;  %v2085_v24 = vld [vmem:[%s2428_s0 + $0xd0] sm:$0xff]   ;;  %v2087_v26 = vld [vmem:[%s2428_s0 + $0xd8] sm:$0xff]  }
   0xa   :  { %v2088_v27 = vld [vmem:[%s2428_s0 + $0x60] sm:$0xff]   ;;  %v2090_v29 = vld [vmem:[%s2428_s0 + $0x68] sm:$0xff]   ;;  %v2092_v31 = vld [vmem:[%s2428_s0 + $0x70] sm:$0xff]  }
   0xb   :  { %1990 = vmatpush3.bf16.msra.mxu0 %v2063_v2  ;;  %2060 = vmatpush3.bf16.msra.mxu1 %v2063_v2  ;;  %v2089_v28 = vld [vmem:[%s2428_s0 + $0xe0] sm:$0xff]   ;;  %v2091_v30 = vld [vmem:[%s2428_s0 + $0xe8] sm:$0xff]   ;;  %v2093_v32 = vld [vmem:[%s2428_s0 + $0xf0] sm:$0xff]  }
   0xc   :  { %v2094_v33 = vld [vmem:[%s2428_s0 + $0x78] sm:$0xff]   ;;  %v2256_v35 = vld [vmem:[%s2429_s2] ss:$0 sm:$0xff] }
   0xd   :  { %v2095_v34 = vld [vmem:[%s2428_s0 + $0xf8] sm:$0xff]  }
   0xe   :  { %1992 = vmatmul.mubr.msk.bf16.vlgmr.msra.gmra.mrb[0].mxu0 %vm395_vm0, %v2066_v5  ;;  %2024 = vmatmul.mubr.msk.bf16.vlgmr.msra.gmra.mrb[0].mxu1 %vm395_vm0, %v2067_v6 }
   0xf   :  { %1995 = vmatprep.mubr.msk.bf16.mxu0 %vm395_vm0, %v2068_v7  ;;  %2027 = vmatprep.mubr.msk.bf16.mxu1 %vm395_vm0, %v2069_v8 }
  0x16   :  { %1996 = vmatmul.mubr.msk.bf16.gmra.mrb[4].mxu0 %vm395_vm0, %v2070_v9  ;;  %2028 = vmatmul.mubr.msk.bf16.gmra.mrb[4].mxu1 %vm395_vm0, %v2071_v10 }
  0x17   :  { %1999 = vmatprep.mubr.msk.bf16.mxu0 %vm395_vm0, %v2072_v11  ;;  %2031 = vmatprep.mubr.msk.bf16.mxu1 %vm395_vm0, %v2073_v12 }
  0x1e   :  { %2000 = vmatmul.mubr.msk.bf16.gmra.mrb[8].mxu0 %vm395_vm0, %v2074_v13  ;;  %2032 = vmatmul.mubr.msk.bf16.gmra.mrb[8].mxu1 %vm395_vm0, %v2075_v14 }
  0x1f   :  { %2003 = vmatprep.mubr.msk.bf16.mxu0 %vm395_vm0, %v2076_v15  ;;  %2035 = vmatprep.mubr.msk.bf16.mxu1 %vm395_vm0, %v2077_v16 }
  0x26   :  { %2004 = vmatmul.mubr.msk.bf16.gmra.mrb[12].mxu0 %vm395_vm0, %v2078_v17  ;;  %2036 = vmatmul.mubr.msk.bf16.gmra.mrb[12].mxu1 %vm395_vm0, %v2079_v18 }
  0x27   :  { %2007 = vmatprep.mubr.msk.bf16.mxu0 %vm395_vm0, %v2080_v19  ;;  %2039 = vmatprep.mubr.msk.bf16.mxu1 %vm395_vm0, %v2081_v20 }
  0x2e   :  { %2008 = vmatmul.mubr.msk.bf16.gmra.mrb[16].mxu0 %vm395_vm0, %v2082_v21  ;;  %2040 = vmatmul.mubr.msk.bf16.gmra.mrb[16].mxu1 %vm395_vm0, %v2083_v22 }
  0x2f   :  { %2011 = vmatprep.mubr.msk.bf16.mxu0 %vm395_vm0, %v2084_v23  ;;  %2043 = vmatprep.mubr.msk.bf16.mxu1 %vm395_vm0, %v2085_v24 }
  0x36   :  { %2012 = vmatmul.mubr.msk.bf16.gmra.mrb[20].mxu0 %vm395_vm0, %v2086_v25  ;;  %2044 = vmatmul.mubr.msk.bf16.gmra.mrb[20].mxu1 %vm395_vm0, %v2087_v26 }
  0x37   :  { %2015 = vmatprep.mubr.msk.bf16.mxu0 %vm395_vm0, %v2088_v27  ;;  %2047 = vmatprep.mubr.msk.bf16.mxu1 %vm395_vm0, %v2089_v28 }
  0x3e   :  { %2016 = vmatmul.mubr.msk.bf16.gmra.mrb[24].mxu0 %vm395_vm0, %v2090_v29  ;;  %2048 = vmatmul.mubr.msk.bf16.gmra.mrb[24].mxu1 %vm395_vm0, %v2091_v30 }
  0x3f   :  { %2019 = vmatprep.mubr.msk.bf16.mxu0 %vm395_vm0, %v2092_v31  ;;  %2051 = vmatprep.mubr.msk.bf16.mxu1 %vm395_vm0, %v2093_v32 }
  0x46   :  { %2020 = vmatmul.mubr.msk.bf16.gmra.mrb[28].mxu0 %vm395_vm0, %v2094_v33  ;;  %2052 = vmatmul.mubr.msk.bf16.gmra.mrb[28].mxu1 %vm395_vm0, %v2095_v34 }
  0xe1   :  { %v1993_v36 = vpop.f32.mrb[0].mxu0  ;;  %v2025_v37 = vpop.f32.mrb[0].mxu1 }
  0xe2   :  { %v985_v38 = vadd.f32 %v1993_v36, %v2256_v35  ;;  %v1017_v39 = vadd.f32 %v2025_v37, %v2256_v35  ;;  %v526_v40 = vpop.f32.mrb[1].mxu0  ;;  %v654_v41 = vpop.f32.mrb[1].mxu1 }
  0xe3   :  { %v983_v42 = vadd.f32 %v2256_v35, %v526_v40  ;;  %v1015_v43 = vadd.f32 %v2256_v35, %v654_v41  ;;  %v1994_v44 = vpop.f32.mrb[2].mxu0  ;;  %v2026_v45 = vpop.f32.mrb[2].mxu1 }
  0xe4   :  { %vm1049_vm1 = vcmp.ge.f32.partialorder %v985_v38, 0.0  ;;  %v1113_v46 = vmul.f32 0.2, %v985_v38  ;;  %vm1081_vm2 = vcmp.ge.f32.partialorder %v1017_v39, 0.0  ;;  %v1145_v47 = vmul.f32 0.2, %v1017_v39 }
  0xe5   :  { %vm1047_vm3 = vcmp.ge.f32.partialorder %v983_v42, 0.0  ;;  %v1111_v48 = vmul.f32 0.2, %v983_v42  ;;  %vm1079_vm4 = vcmp.ge.f32.partialorder %v1015_v43, 0.0  ;;  %v1143_v49 = vmul.f32 0.2, %v1015_v43 }
  0xe6   :  { %v986_v50 = vadd.f32 %v1994_v44, %v2256_v35  ;;  %v1018_v51 = vadd.f32 %v2026_v45, %v2256_v35  ;;  %v529_v52 = vpop.f32.mrb[3].mxu0  ;;  %v657_v53 = vpop.f32.mrb[3].mxu1  ;;  %v1177_v54 = vsel %vm1049_vm1, %v985_v38, %v1113_v46  ;;  %v1209_v55 = vsel %vm1081_vm2, %v1017_v39, %v1145_v47 }
  0xe7   :  { %v984_v56 = vadd.f32 %v2256_v35, %v529_v52  ;;  %v1016_v57 = vadd.f32 %v2256_v35, %v657_v53  ;;  %v1175_v62 = vsel %vm1047_vm3, %v983_v42, %v1111_v48  ;;  %v1207_v63 = vsel %vm1079_vm4, %v1015_v43, %v1143_v49 }
  0xe8   :  { %vm1050_vm5 = vcmp.ge.f32.partialorder %v986_v50, 0.0  ;;  %v1114_v58 = vmul.f32 0.2, %v986_v50  ;;  %vm1082_vm6 = vcmp.ge.f32.partialorder %v1018_v51, 0.0  ;;  %v1146_v59 = vmul.f32 0.2, %v1018_v51 }
  0xe9   :  { %vm1048_vm7 = vcmp.ge.f32.partialorder %v984_v56, 0.0  ;;  %v1112_v60 = vmul.f32 0.2, %v984_v56  ;;  %vm1080_vm8 = vcmp.ge.f32.partialorder %v1016_v57, 0.0  ;;  %v1144_v61 = vmul.f32 0.2, %v1016_v57 }
  0xea   :  { %v1178_v0 = vsel %vm1050_vm5, %v986_v50, %v1114_v58  ;;  %v1210_v1 = vsel %vm1082_vm6, %v1018_v51, %v1146_v59  ;;  %v1997_v2 = vpop.f32.mrb[4].mxu0  ;;  %v2029_v3 = vpop.f32.mrb[4].mxu1 }
  0xeb   :  { %v1767_v4 = vpack.c.bf16 %v1178_v0, %v1177_v54  ;;  %v1847_v5 = vpack.c.bf16 %v1210_v1, %v1209_v55  ;;  %v1176_v6 = vsel %vm1048_vm7, %v984_v56, %v1112_v60  ;;  %v1208_v7 = vsel %vm1080_vm8, %v1016_v57, %v1144_v61  ;;  %v542_v8 = vpop.f32.mrb[5].mxu0  ;;  %v670_v9 = vpop.f32.mrb[5].mxu1 }
  0xec   :  { %v1762_v10 = vpack.c.bf16 %v1176_v6, %v1175_v62  ;;  %v1842_v11 = vpack.c.bf16 %v1208_v7, %v1207_v63  ;;  %v989_v12 = vadd.f32 %v1997_v2, %v2256_v35  ;;  %v1021_v13 = vadd.f32 %v2029_v3, %v2256_v35  ;;  %v1998_v14 = vpop.f32.mrb[6].mxu0  ;;  %v2030_v15 = vpop.f32.mrb[6].mxu1 }
  0xed   :  { %1919 = vst [vmem:[%s2430_s3 + $0x8] sm:$0xff] %v1767_v4   ;;  %1935 = vst [vmem:[%s2430_s3 + $0x88] sm:$0xff] %v1847_v5   ;;  %v987_v16 = vadd.f32 %v2256_v35, %v542_v8  ;;  %v1019_v17 = vadd.f32 %v2256_v35, %v670_v9  ;;  %v990_v18 = vadd.f32 %v1998_v14, %v2256_v35  ;;  %v545_v20 = vpop.f32.mrb[7].mxu0  ;;  %v673_v21 = vpop.f32.mrb[7].mxu1 }
  0xee   :  { %v1022_v19 = vadd.f32 %v2030_v15, %v2256_v35  ;;  %1763 = vst [vmem:[%s2430_s3] sm:$0xff] %v1762_v10   ;;  %1934 = vst [vmem:[%s2430_s3 + $0x80] sm:$0xff] %v1842_v11   ;;  %vm1053_vm9 = vcmp.ge.f32.partialorder %v989_v12, 0.0  ;;  %v1117_v22 = vmul.f32 0.2, %v989_v12  ;;  %vm1085_vm10 = vcmp.ge.f32.partialorder %v1021_v13, 0.0 }
  0xef   :  { %v1149_v23 = vmul.f32 0.2, %v1021_v13  ;;  %vm1051_vm11 = vcmp.ge.f32.partialorder %v987_v16, 0.0  ;;  %v1115_v24 = vmul.f32 0.2, %v987_v16  ;;  %vm1083_vm12 = vcmp.ge.f32.partialorder %v1019_v17, 0.0 }
  0xf0   :  { %v1147_v25 = vmul.f32 0.2, %v1019_v17  ;;  %v1181_v26 = vsel %vm1053_vm9, %v989_v12, %v1117_v22  ;;  %vm1054_vm13 = vcmp.ge.f32.partialorder %v990_v18, 0.0  ;;  %v1118_v28 = vmul.f32 0.2, %v990_v18 }
  0xf1   :  { %v1213_v27 = vsel %vm1085_vm10, %v1021_v13, %v1149_v23  ;;  %v1179_v29 = vsel %vm1051_vm11, %v987_v16, %v1115_v24  ;;  %vm1086_vm14 = vcmp.ge.f32.partialorder %v1022_v19, 0.0  ;;  %v1150_v31 = vmul.f32 0.2, %v1022_v19  ;;  %v2001_v32 = vpop.f32.mrb[8].mxu0  ;;  %v2033_v33 = vpop.f32.mrb[8].mxu1 }
  0xf2   :  { %v1211_v30 = vsel %vm1083_vm12, %v1019_v17, %v1147_v25  ;;  %v1182_v34 = vsel %vm1054_vm13, %v990_v18, %v1118_v28  ;;  %v988_v36 = vadd.f32 %v2256_v35, %v545_v20  ;;  %v1020_v37 = vadd.f32 %v2256_v35, %v673_v21  ;;  %v558_v39 = vpop.f32.mrb[9].mxu0  ;;  %v686_v40 = vpop.f32.mrb[9].mxu1 }
  0xf3   :  { %v993_v38 = vadd.f32 %v2001_v32, %v2256_v35  ;;  %v1777_v41 = vpack.c.bf16 %v1182_v34, %v1181_v26  ;;  %v1214_v42 = vsel %vm1086_vm14, %v1022_v19, %v1150_v31  ;;  %v1025_v43 = vadd.f32 %v2033_v33, %v2256_v35  ;;  %v2002_v45 = vpop.f32.mrb[10].mxu0  ;;  %v2034_v46 = vpop.f32.mrb[10].mxu1 }
  0xf4   :  { %v991_v44 = vadd.f32 %v2256_v35, %v558_v39  ;;  %v1857_v47 = vpack.c.bf16 %v1214_v42, %v1213_v27  ;;  %vm1052_vm15 = vcmp.ge.f32.partialorder %v988_v36, 0.0  ;;  %v1116_v48 = vmul.f32 0.2, %v988_v36  ;;  %v561_v49 = vpop.f32.mrb[11].mxu0  ;;  %v689_v50 = vpop.f32.mrb[11].mxu1 }
  0xf5   :  { %vm1084_vm0 = vcmp.ge.f32.partialorder %v1020_v37, 0.0  ;;  %1921 = vst [vmem:[%s2430_s3 + $0x18] sm:$0xff] %v1777_v41   ;;  %v1148_v51 = vmul.f32 0.2, %v1020_v37  ;;  %vm1057_vm1 = vcmp.ge.f32.partialorder %v993_v38, 0.0  ;;  %vm1089_vm2 = vcmp.ge.f32.partialorder %v1025_v43, 0.0 }
  0xf6   :  { %v1121_v52 = vmul.f32 0.2, %v993_v38  ;;  %1937 = vst [vmem:[%s2430_s3 + $0x98] sm:$0xff] %v1857_v47   ;;  %v1180_v53 = vsel %vm1052_vm15, %v988_v36, %v1116_v48  ;;  %v1153_v54 = vmul.f32 0.2, %v1025_v43  ;;  %vm1055_vm3 = vcmp.ge.f32.partialorder %v991_v44, 0.0 }
  0xf7   :  { %v1119_v55 = vmul.f32 0.2, %v991_v44  ;;  %v1772_v56 = vpack.c.bf16 %v1180_v53, %v1179_v29  ;;  %v1212_v57 = vsel %vm1084_vm0, %v1020_v37, %v1148_v51  ;;  %v1023_v59 = vadd.f32 %v2256_v35, %v686_v40 }
  0xf8   :  { %v1185_v58 = vsel %vm1057_vm1, %v993_v38, %v1121_v52  ;;  %v1852_v60 = vpack.c.bf16 %v1212_v57, %v1211_v30  ;;  %v1217_v61 = vsel %vm1089_vm2, %v1025_v43, %v1153_v54  ;;  %v994_v63 = vadd.f32 %v2002_v45, %v2256_v35 }
  0xf9   :  { %v1183_v62 = vsel %vm1055_vm3, %v991_v44, %v1119_v55  ;;  %1920 = vst [vmem:[%s2430_s3 + $0x10] sm:$0xff] %v1772_v56   ;;  %vm1087_vm4 = vcmp.ge.f32.partialorder %v1023_v59, 0.0  ;;  %v1151_v0 = vmul.f32 0.2, %v1023_v59  ;;  %v1026_v1 = vadd.f32 %v2034_v46, %v2256_v35  ;;  %v2005_v3 = vpop.f32.mrb[12].mxu0  ;;  %v2037_v4 = vpop.f32.mrb[12].mxu1 }
  0xfa   :  { %v992_v2 = vadd.f32 %v2256_v35, %v561_v49  ;;  %1936 = vst [vmem:[%s2430_s3 + $0x90] sm:$0xff] %v1852_v60   ;;  %vm1058_vm5 = vcmp.ge.f32.partialorder %v994_v63, 0.0  ;;  %v1122_v5 = vmul.f32 0.2, %v994_v63  ;;  %v1024_v6 = vadd.f32 %v2256_v35, %v689_v50  ;;  %v574_v8 = vpop.f32.mrb[13].mxu0  ;;  %v702_v9 = vpop.f32.mrb[13].mxu1 }
  0xfb   :  { %v997_v7 = vadd.f32 %v2005_v3, %v2256_v35  ;;  %v1215_v10 = vsel %vm1087_vm4, %v1023_v59, %v1151_v0  ;;  %vm1090_vm6 = vcmp.ge.f32.partialorder %v1026_v1, 0.0  ;;  %v1154_v11 = vmul.f32 0.2, %v1026_v1  ;;  %v2006_v12 = vpop.f32.mrb[14].mxu0  ;;  %v2038_v13 = vpop.f32.mrb[14].mxu1 }
  0xfc   :  { %vm1056_vm7 = vcmp.ge.f32.partialorder %v992_v2, 0.0  ;;  %v1186_v14 = vsel %vm1058_vm5, %v994_v63, %v1122_v5  ;;  %v1120_v15 = vmul.f32 0.2, %v992_v2  ;;  %vm1088_vm8 = vcmp.ge.f32.partialorder %v1024_v6, 0.0  ;;  %v577_v17 = vpop.f32.mrb[15].mxu0  ;;  %v705_v21 = vpop.f32.mrb[15].mxu1 }
  0xfd   :  { %v1152_v16 = vmul.f32 0.2, %v1024_v6  ;;  %v1787_v18 = vpack.c.bf16 %v1186_v14, %v1185_v58  ;;  %v1218_v19 = vsel %vm1090_vm6, %v1026_v1, %v1154_v11  ;;  %vm1061_vm9 = vcmp.ge.f32.partialorder %v997_v7, 0.0 }
  0xfe   :  { %v1125_v20 = vmul.f32 0.2, %v997_v7  ;;  %v1867_v22 = vpack.c.bf16 %v1218_v19, %v1217_v61  ;;  %v1184_v23 = vsel %vm1056_vm7, %v992_v2, %v1120_v15  ;;  %v1029_v25 = vadd.f32 %v2037_v4, %v2256_v35 }
  0xff   :  { %v1216_v24 = vsel %vm1088_vm8, %v1024_v6, %v1152_v16  ;;  %1923 = vst [vmem:[%s2430_s3 + $0x28] sm:$0xff] %v1787_v18   ;;  %v1782_v26 = vpack.c.bf16 %v1184_v23, %v1183_v62  ;;  %v995_v29 = vadd.f32 %v2256_v35, %v574_v8  ;;  %v1027_v31 = vadd.f32 %v2256_v35, %v702_v9 }
 0x100   :  { %v1862_v27 = vpack.c.bf16 %v1216_v24, %v1215_v10  ;;  %v1189_v28 = vsel %vm1061_vm9, %v997_v7, %v1125_v20  ;;  %1939 = vst [vmem:[%s2430_s3 + $0xa8] sm:$0xff] %v1867_v22   ;;  %vm1093_vm10 = vcmp.ge.f32.partialorder %v1029_v25, 0.0  ;;  %v1157_v30 = vmul.f32 0.2, %v1029_v25 }
 0x101   :  { %v998_v32 = vadd.f32 %v2006_v12, %v2256_v35  ;;  %1922 = vst [vmem:[%s2430_s3 + $0x20] sm:$0xff] %v1782_v26   ;;  %vm1059_vm11 = vcmp.ge.f32.partialorder %v995_v29, 0.0  ;;  %v1123_v33 = vmul.f32 0.2, %v995_v29  ;;  %v1030_v34 = vadd.f32 %v2038_v13, %v2256_v35  ;;  %v2009_v37 = vpop.f32.mrb[16].mxu0  ;;  %v2041_v38 = vpop.f32.mrb[16].mxu1 }
 0x102   :  { %1938 = vst [vmem:[%s2430_s3 + $0xa0] sm:$0xff] %v1862_v27   ;;  %v996_v36 = vadd.f32 %v2256_v35, %v577_v17  ;;  %v1221_v39 = vsel %vm1093_vm10, %v1029_v25, %v1157_v30  ;;  %vm1091_vm12 = vcmp.ge.f32.partialorder %v1027_v31, 0.0  ;;  %v1155_v40 = vmul.f32 0.2, %v1027_v31  ;;  %v590_v41 = vpop.f32.mrb[17].mxu0  ;;  %v718_v42 = vpop.f32.mrb[17].mxu1 }
 0x103   :  { %vm1062_vm13 = vcmp.ge.f32.partialorder %v998_v32, 0.0  ;;  %v1187_v43 = vsel %vm1059_vm11, %v995_v29, %v1123_v33  ;;  %v1126_v44 = vmul.f32 0.2, %v998_v32  ;;  %vm1094_vm14 = vcmp.ge.f32.partialorder %v1030_v34, 0.0  ;;  %v2010_v46 = vpop.f32.mrb[18].mxu0  ;;  %v2042_v50 = vpop.f32.mrb[18].mxu1 }
 0x104   :  { %v1158_v45 = vmul.f32 0.2, %v1030_v34  ;;  %v1219_v47 = vsel %vm1091_vm12, %v1027_v31, %v1155_v40  ;;  %vm1060_vm15 = vcmp.ge.f32.partialorder %v996_v36, 0.0  ;;  %v1124_v48 = vmul.f32 0.2, %v996_v36  ;;  %v593_v51 = vpop.f32.mrb[19].mxu0 }
 0x105   :  { %v1028_v49 = vadd.f32 %v2256_v35, %v705_v21  ;;  %v1190_v52 = vsel %vm1062_vm13, %v998_v32, %v1126_v44  ;;  %v1001_v54 = vadd.f32 %v2009_v37, %v2256_v35  ;;  %v1033_v55 = vadd.f32 %v2041_v38, %v2256_v35  ;;  %v721_v56 = vpop.f32.mrb[19].mxu1 }
 0x106   :  { %v1222_v53 = vsel %vm1094_vm14, %v1030_v34, %v1158_v45  ;;  %v1797_v57 = vpack.c.bf16 %v1190_v52, %v1189_v28  ;;  %v1188_v59 = vsel %vm1060_vm15, %v996_v36, %v1124_v48  ;;  %v999_v0 = vadd.f32 %v2256_v35, %v590_v41 }
 0x107   :  { %v1877_v58 = vpack.c.bf16 %v1222_v53, %v1221_v39  ;;  %vm1092_vm0 = vcmp.ge.f32.partialorder %v1028_v49, 0.0  ;;  %v1792_v60 = vpack.c.bf16 %v1188_v59, %v1187_v43  ;;  %v1156_v61 = vmul.f32 0.2, %v1028_v49 }
 0x108   :  { %vm1065_vm1 = vcmp.ge.f32.partialorder %v1001_v54, 0.0  ;;  %v1129_v62 = vmul.f32 0.2, %v1001_v54  ;;  %1925 = vst [vmem:[%s2430_s3 + $0x38] sm:$0xff] %v1797_v57   ;;  %vm1097_vm2 = vcmp.ge.f32.partialorder %v1033_v55, 0.0  ;;  %v1031_v1 = vadd.f32 %v2256_v35, %v718_v42 }
 0x109   :  { %1941 = vst [vmem:[%s2430_s3 + $0xb8] sm:$0xff] %v1877_v58   ;;  %v1161_v63 = vmul.f32 0.2, %v1033_v55  ;;  %1924 = vst [vmem:[%s2430_s3 + $0x30] sm:$0xff] %v1792_v60   ;;  %v1220_v2 = vsel %vm1092_vm0, %v1028_v49, %v1156_v61  ;;  %v1002_v4 = vadd.f32 %v2010_v46, %v2256_v35  ;;  %v1034_v5 = vadd.f32 %v2042_v50, %v2256_v35  ;;  %v2013_v6 = vpop.f32.mrb[20].mxu0  ;;  %v2045_v7 = vpop.f32.mrb[20].mxu1 }
 0x10a   :  { %v1193_v3 = vsel %vm1065_vm1, %v1001_v54, %v1129_v62  ;;  %v1872_v8 = vpack.c.bf16 %v1220_v2, %v1219_v47  ;;  %vm1063_vm3 = vcmp.ge.f32.partialorder %v999_v0, 0.0  ;;  %v1127_v10 = vmul.f32 0.2, %v999_v0  ;;  %v606_v11 = vpop.f32.mrb[21].mxu0  ;;  %v734_v12 = vpop.f32.mrb[21].mxu1 }
 0x10b   :  { %v1225_v9 = vsel %vm1097_vm2, %v1033_v55, %v1161_v63  ;;  %vm1095_vm4 = vcmp.ge.f32.partialorder %v1031_v1, 0.0  ;;  %v1159_v13 = vmul.f32 0.2, %v1031_v1  ;;  %vm1066_vm5 = vcmp.ge.f32.partialorder %v1002_v4, 0.0  ;;  %v2014_v18 = vpop.f32.mrb[22].mxu0  ;;  %v2046_v19 = vpop.f32.mrb[22].mxu1 }
 0x10c   :  { %v1130_v14 = vmul.f32 0.2, %v1002_v4  ;;  %1940 = vst [vmem:[%s2430_s3 + $0xb0] sm:$0xff] %v1872_v8   ;;  %v1191_v15 = vsel %vm1063_vm3, %v999_v0, %v1127_v10  ;;  %vm1098_vm6 = vcmp.ge.f32.partialorder %v1034_v5, 0.0  ;;  %v1162_v16 = vmul.f32 0.2, %v1034_v5 }
 0x10d   :  { %v1000_v17 = vadd.f32 %v2256_v35, %v593_v51  ;;  %v1223_v20 = vsel %vm1095_vm4, %v1031_v1, %v1159_v13  ;;  %v1032_v22 = vadd.f32 %v2256_v35, %v721_v56  ;;  %v1005_v23 = vadd.f32 %v2013_v6, %v2256_v35  ;;  %v609_v24 = vpop.f32.mrb[23].mxu0  ;;  %v737_v25 = vpop.f32.mrb[23].mxu1 }
 0x10e   :  { %v1194_v21 = vsel %vm1066_vm5, %v1002_v4, %v1130_v14  ;;  %v1226_v27 = vsel %vm1098_vm6, %v1034_v5, %v1162_v16  ;;  %v1037_v33 = vadd.f32 %v2045_v7, %v2256_v35  ;;  %v1003_v34 = vadd.f32 %v2256_v35, %v606_v11 }
 0x10f   :  { %v1807_v26 = vpack.c.bf16 %v1194_v21, %v1193_v3  ;;  %vm1064_vm7 = vcmp.ge.f32.partialorder %v1000_v17, 0.0  ;;  %v1128_v28 = vmul.f32 0.2, %v1000_v17  ;;  %v1887_v29 = vpack.c.bf16 %v1226_v27, %v1225_v9 }
 0x110   :  { %vm1096_vm8 = vcmp.ge.f32.partialorder %v1032_v22, 0.0  ;;  %v1160_v30 = vmul.f32 0.2, %v1032_v22  ;;  %vm1069_vm9 = vcmp.ge.f32.partialorder %v1005_v23, 0.0  ;;  %v1133_v32 = vmul.f32 0.2, %v1005_v23 }
 0x111   :  { %1927 = vst [vmem:[%s2430_s3 + $0x48] sm:$0xff] %v1807_v26   ;;  %v1192_v31 = vsel %vm1064_vm7, %v1000_v17, %v1128_v28  ;;  %1943 = vst [vmem:[%s2430_s3 + $0xc8] sm:$0xff] %v1887_v29   ;;  %v1035_v38 = vadd.f32 %v2256_v35, %v734_v12  ;;  %v1006_v39 = vadd.f32 %v2014_v18, %v2256_v35  ;;  %v2017_v40 = vpop.f32.mrb[24].mxu0  ;;  %v2049_v41 = vpop.f32.mrb[24].mxu1  ;;  %vm1101_vm10 = vcmp.ge.f32.partialorder %v1037_v33, 0.0 }
 0x112   :  { %v1802_v36 = vpack.c.bf16 %v1192_v31, %v1191_v15  ;;  %v1224_v37 = vsel %vm1096_vm8, %v1032_v22, %v1160_v30  ;;  %v1165_v43 = vmul.f32 0.2, %v1037_v33  ;;  %v622_v44 = vpop.f32.mrb[25].mxu0  ;;  %v750_v45 = vpop.f32.mrb[25].mxu1  ;;  %v1197_v46 = vsel %vm1069_vm9, %v1005_v23, %v1133_v32 }
 0x113   :  { %v1882_v42 = vpack.c.bf16 %v1224_v37, %v1223_v20  ;;  %vm1067_vm11 = vcmp.ge.f32.partialorder %v1003_v34, 0.0  ;;  %v1131_v47 = vmul.f32 0.2, %v1003_v34  ;;  %v1163_v48 = vmul.f32 0.2, %v1035_v38  ;;  %v2018_v51 = vpop.f32.mrb[26].mxu0 }
 0x114   :  { %1926 = vst [vmem:[%s2430_s3 + $0x40] sm:$0xff] %v1802_v36   ;;  %vm1099_vm12 = vcmp.ge.f32.partialorder %v1035_v38, 0.0  ;;  %vm1070_vm13 = vcmp.ge.f32.partialorder %v1006_v39, 0.0  ;;  %v1134_v49 = vmul.f32 0.2, %v1006_v39  ;;  %v1038_v50 = vadd.f32 %v2046_v19, %v2256_v35  ;;  %v2050_v52 = vpop.f32.mrb[26].mxu1 }
 0x115   :  { %1942 = vst [vmem:[%s2430_s3 + $0xc0] sm:$0xff] %v1882_v42   ;;  %v1229_v53 = vsel %vm1101_vm10, %v1037_v33, %v1165_v43  ;;  %v1195_v54 = vsel %vm1067_vm11, %v1003_v34, %v1131_v47  ;;  %v1004_v55 = vadd.f32 %v2256_v35, %v609_v24  ;;  %v1036_v56 = vadd.f32 %v2256_v35, %v737_v25  ;;  %v625_v57 = vpop.f32.mrb[27].mxu0  ;;  %v753_v58 = vpop.f32.mrb[27].mxu1 }
 0x116   :  { %v1198_v59 = vsel %vm1070_vm13, %v1006_v39, %v1134_v49  ;;  %vm1102_vm14 = vcmp.ge.f32.partialorder %v1038_v50, 0.0  ;;  %v1166_v60 = vmul.f32 0.2, %v1038_v50  ;;  %v1009_v61 = vadd.f32 %v2017_v40, %v2256_v35 }
 0x117   :  { %v1817_v62 = vpack.c.bf16 %v1198_v59, %v1197_v46  ;;  %vm1068_vm15 = vcmp.ge.f32.partialorder %v1004_v55, 0.0  ;;  %v1132_v63 = vmul.f32 0.2, %v1004_v55  ;;  %vm1100_vm0 = vcmp.ge.f32.partialorder %v1036_v56, 0.0 }
 0x118   :  { %v1230_v0 = vsel %vm1102_vm14, %v1038_v50, %v1166_v60  ;;  %v1164_v1 = vmul.f32 0.2, %v1036_v56  ;;  %vm1073_vm1 = vcmp.ge.f32.partialorder %v1009_v61, 0.0  ;;  %v1137_v2 = vmul.f32 0.2, %v1009_v61 }
 0x119   :  { %1929 = vst [vmem:[%s2430_s3 + $0x58] sm:$0xff] %v1817_v62   ;;  %v1897_v3 = vpack.c.bf16 %v1230_v0, %v1229_v53  ;;  %v1196_v4 = vsel %vm1068_vm15, %v1004_v55, %v1132_v63  ;;  %v1041_v5 = vadd.f32 %v2049_v41, %v2256_v35  ;;  %v1007_v6 = vadd.f32 %v2256_v35, %v622_v44  ;;  %v2021_v7 = vpop.f32.mrb[28].mxu0  ;;  %v2053_v8 = vpop.f32.mrb[28].mxu1 }
 0x11a   :  { %v1227_v9 = vsel %vm1099_vm12, %v1035_v38, %v1163_v48  ;;  %v1812_v10 = vpack.c.bf16 %v1196_v4, %v1195_v54  ;;  %v1228_v11 = vsel %vm1100_vm0, %v1036_v56, %v1164_v1  ;;  %v1039_v12 = vadd.f32 %v2256_v35, %v750_v45  ;;  %v638_v13 = vpop.f32.mrb[29].mxu0  ;;  %v766_v14 = vpop.f32.mrb[29].mxu1 }
 0x11b   :  { %1945 = vst [vmem:[%s2430_s3 + $0xd8] sm:$0xff] %v1897_v3   ;;  %v1892_v15 = vpack.c.bf16 %v1228_v11, %v1227_v9  ;;  %vm1105_vm2 = vcmp.ge.f32.partialorder %v1041_v5, 0.0  ;;  %v1169_v16 = vmul.f32 0.2, %v1041_v5  ;;  %vm1071_vm3 = vcmp.ge.f32.partialorder %v1007_v6, 0.0  ;;  %v2022_v17 = vpop.f32.mrb[30].mxu0 }
 0x11c   :  { %v2054_v18 = vpop.f32.mrb[30].mxu1  ;;  %1928 = vst [vmem:[%s2430_s3 + $0x50] sm:$0xff] %v1812_v10   ;;  %v1201_v19 = vsel %vm1073_vm1, %v1009_v61, %v1137_v2  ;;  %v1135_v20 = vmul.f32 0.2, %v1007_v6  ;;  %vm1103_vm4 = vcmp.ge.f32.partialorder %v1039_v12, 0.0  ;;  %v1010_v21 = vadd.f32 %v2018_v51, %v2256_v35  ;;  %v641_v22 = vpop.f32.mrb[31].mxu0 }
 0x11d   :  { %1944 = vst [vmem:[%s2430_s3 + $0xd0] sm:$0xff] %v1892_v15   ;;  %v1167_v23 = vmul.f32 0.2, %v1039_v12  ;;  %v1042_v24 = vadd.f32 %v2050_v52, %v2256_v35  ;;  %v1008_v25 = vadd.f32 %v2256_v35, %v625_v57  ;;  %v1040_v26 = vadd.f32 %v2256_v35, %v753_v58  ;;  %v769_v27 = vpop.f32.mrb[31].mxu1 }
 0x11e   :  { %v1233_v28 = vsel %vm1105_vm2, %v1041_v5, %v1169_v16  ;;  %v1199_v29 = vsel %vm1071_vm3, %v1007_v6, %v1135_v20  ;;  %vm1074_vm5 = vcmp.ge.f32.partialorder %v1010_v21, 0.0  ;;  %v1138_v30 = vmul.f32 0.2, %v1010_v21 }
 0x11f   :  { %vm1106_vm6 = vcmp.ge.f32.partialorder %v1042_v24, 0.0  ;;  %v1170_v31 = vmul.f32 0.2, %v1042_v24  ;;  %vm1072_vm7 = vcmp.ge.f32.partialorder %v1008_v25, 0.0  ;;  %v1136_v32 = vmul.f32 0.2, %v1008_v25 }
 0x120   :  { %v1202_v33 = vsel %vm1074_vm5, %v1010_v21, %v1138_v30  ;;  %vm1104_vm8 = vcmp.ge.f32.partialorder %v1040_v26, 0.0  ;;  %v1168_v34 = vmul.f32 0.2, %v1040_v26  ;;  %v1013_v36 = vadd.f32 %v2021_v7, %v2256_v35 }
 0x121   :  { %v1827_v37 = vpack.c.bf16 %v1202_v33, %v1201_v19  ;;  %v1234_v38 = vsel %vm1106_vm6, %v1042_v24, %v1170_v31  ;;  %v1200_v39 = vsel %vm1072_vm7, %v1008_v25, %v1136_v32  ;;  %v1045_v40 = vadd.f32 %v2053_v8, %v2256_v35 }
 0x122   :  { %v1231_v41 = vsel %vm1103_vm4, %v1039_v12, %v1167_v23  ;;  %v1907_v42 = vpack.c.bf16 %v1234_v38, %v1233_v28  ;;  %v1822_v43 = vpack.c.bf16 %v1200_v39, %v1199_v29  ;;  %v1232_v44 = vsel %vm1104_vm8, %v1040_v26, %v1168_v34 }
 0x123   :  { %1931 = vst [vmem:[%s2430_s3 + $0x68] sm:$0xff] %v1827_v37   ;;  %v1902_v45 = vpack.c.bf16 %v1232_v44, %v1231_v41  ;;  %vm1077_vm9 = vcmp.ge.f32.partialorder %v1013_v36, 0.0  ;;  %v1141_v46 = vmul.f32 0.2, %v1013_v36  ;;  %v1173_v47 = vmul.f32 0.2, %v1045_v40 }
 0x124   :  { %1947 = vst [vmem:[%s2430_s3 + $0xe8] sm:$0xff] %v1907_v42   ;;  %1930 = vst [vmem:[%s2430_s3 + $0x60] sm:$0xff] %v1822_v43   ;;  %v1011_v48 = vadd.f32 %v2256_v35, %v638_v13  ;;  %v1043_v49 = vadd.f32 %v2256_v35, %v766_v14  ;;  %v1014_v50 = vadd.f32 %v2022_v17, %v2256_v35  ;;  %vm1109_vm10 = vcmp.ge.f32.partialorder %v1045_v40, 0.0 }
 0x125   :  { %v1046_v51 = vadd.f32 %v2054_v18, %v2256_v35  ;;  %1946 = vst [vmem:[%s2430_s3 + $0xe0] sm:$0xff] %v1902_v45   ;;  %v1012_v52 = vadd.f32 %v2256_v35, %v641_v22  ;;  %v1044_v53 = vadd.f32 %v2256_v35, %v769_v27  ;;  %v1205_v54 = vsel %vm1077_vm9, %v1013_v36, %v1141_v46 }
 0x126   :  { %vm1075_vm11 = vcmp.ge.f32.partialorder %v1011_v48, 0.0  ;;  %v1139_v55 = vmul.f32 0.2, %v1011_v48  ;;  %v1171_v56 = vmul.f32 0.2, %v1043_v49  ;;  %vm1078_vm12 = vcmp.ge.f32.partialorder %v1014_v50, 0.0 }
 0x127   :  { %v1142_v57 = vmul.f32 0.2, %v1014_v50  ;;  %vm1110_vm13 = vcmp.ge.f32.partialorder %v1046_v51, 0.0  ;;  %v1174_v58 = vmul.f32 0.2, %v1046_v51  ;;  %v1237_v59 = vsel %vm1109_vm10, %v1045_v40, %v1173_v47 }
 0x128   :  { %vm1107_vm14 = vcmp.ge.f32.partialorder %v1043_v49, 0.0  ;;  %vm1076_vm15 = vcmp.ge.f32.partialorder %v1012_v52, 0.0  ;;  %v1140_v60 = vmul.f32 0.2, %v1012_v52  ;;  %vm1108_vm0 = vcmp.ge.f32.partialorder %v1044_v53, 0.0 }
 0x129   :  { %v1206_v61 = vsel %vm1078_vm12, %v1014_v50, %v1142_v57  ;;  %v1238_v62 = vsel %vm1110_vm13, %v1046_v51, %v1174_v58  ;;  %v1172_v63 = vmul.f32 0.2, %v1044_v53  ;;  %v1203_v0 = vsel %vm1075_vm11, %v1011_v48, %v1139_v55 }
 0x12a   :  { %v1837_v1 = vpack.c.bf16 %v1206_v61, %v1205_v54  ;;  %v1917_v2 = vpack.c.bf16 %v1238_v62, %v1237_v59  ;;  %v1204_v35 = vsel %vm1076_vm15, %v1012_v52, %v1140_v60  ;;  %v1235_v3 = vsel %vm1107_vm14, %v1043_v49, %v1171_v56 }
 0x12b   :  { %v1832_v4 = vpack.c.bf16 %v1204_v35, %v1203_v0  ;;  %v1236_v5 = vsel %vm1108_vm0, %v1044_v53, %v1172_v63 }
 0x12c   :  { %1933 = vst [vmem:[%s2430_s3 + $0x78] sm:$0xff] %v1837_v1   ;;  %1949 = vst [vmem:[%s2430_s3 + $0xf8] sm:$0xff] %v1917_v2   ;;  %v1912_v6 = vpack.c.bf16 %v1236_v5, %v1235_v3 }
 0x12d   :  { %1932 = vst [vmem:[%s2430_s3 + $0x70] sm:$0xff] %v1832_v4  }
 0x12e   :  { %1948 = vst [vmem:[%s2430_s3 + $0xf0] sm:$0xff] %v1912_v6  }

// kernel: patch_discriminator.9
= control target key start
LH: loop header
LB: loop body
LE: loop exit
PB: predicated region body
PF: predicated region fallthrough
CT: control target
= control target key end

     0   :  { %s1526_s9 = smov 0   ;;  %s1528_s10 = smov 0   ;;  %s1777_s0 = inlined_call_operand.vmem [shape: bf16[128,1024], index: 0, kind: input, shape index: {}]   ;;  %s1778_s1 = inlined_call_operand.vmem [shape: bf16[1024,128], index: 1, kind: input, shape index: {}]   ;;  %s1779_s2 = inlined_call_operand.vmem [shape: f32[128,128], index: 2, kind: output, shape index: {}]  }
   0x1   :  { %s1530_s11 = smov 0   ;;  %s1532_s12 = smov 0  }
   0x2   :  { %s1534_s13 = smov 0  }
   0x3 LB: > { %s24_s14 = sadd.s32 1, %s1504_s12  ;;  %p47_p1 = scmp.ne.s32.totalorder %s1496_s10, %s1492_s9  ;;  %s1508_s13 = sphi %s1534_s13, %s12_s13   ;;  %s1504_s12 = sphi %s1532_s12, %s1783_s12   ;;  %s1500_s11 = sphi %s1530_s11, %s1782_s11   ;;  %s1496_s10 = sphi %s1528_s10, %s1781_s10   ;;  %s1492_s9 = sphi %s1526_s9, %s1780_s9  }
   0x4   : > { %p25_p0 = scmp.ge.s32.totalorder %s24_s14, 2  ;;  %p48_p2 = scmp.eq.s32.totalorder %s1508_s13, 0 }
   0x5   : > { %s40_s16 = sadd.s32 1, %s1496_s10  ;;  %p1142_p5 = scmp.ge.s32.totalorder %s1508_s13, 2 }
   0x6   : > { %s1785_s14 = smov (%p25_p0, %s24_s14), 0  ;;  %p49_p3 = por %p48_p2, %p47_p1 }
   0x7   : > { %s36_s15 = ssub.s32 %s1504_s12, %s1785_s14  ;;  %129 = sbr.rel (%p1142_p5) target bundleno = 34 (0x22), region = 16 }
   0x8   : > { %p38_p4 = scmp.eq.s32.totalorder %s36_s15, 0 }
   0xa   : > { %s1561_s17 = scalar_select %p38_p4, %s1496_s10, %s40_s16  }
   0xe   : > { %132 = sbr.rel (!%p49_p3) target bundleno = 34 (0x22), region = 20  ;;  %s134_s18 = sand.u32 (%p49_p3), 1, %s1496_s10  }
   0xf   : > { %s1220_s19 = sshll.u32 (%p49_p3), %s1504_s12, 4  ;;  %s1143_s20 = sshll.u32 (%p49_p3), %s134_s18, 8 }
  0x10   : > { %s1569_s23 = scalar_lea.vmem (%p49_p3), %s1777_s0, %s1220_s19  ;;  %s1574_s24 = scalar_lea.vmem (%p49_p3), [#allocation3], %s1143_s20 }
  0x11   : > { %v155_v0 = vld [vmem:[%s1569_s23] sm:$0xff] (%p49_p3)  ;;  %v157_v1 = vld [vmem:[%s1569_s23 + $0x8] sm:$0xff] (%p49_p3) }
  0x12   : > { %v159_v2 = vld [vmem:[%s1569_s23 + $0x20] sm:$0xff] (%p49_p3)  ;;  %156 = vst [vmem:[%s1574_s24] sm:$0xff] (%p49_p3), %v155_v0  ;;  %158 = vst [vmem:[%s1574_s24 + $0x8] sm:$0xff] (%p49_p3), %v157_v1  ;;  %v161_v3 = vld [vmem:[%s1569_s23 + $0x28] sm:$0xff] (%p49_p3) }
  0x13   : > { %160 = vst [vmem:[%s1574_s24 + $0x10] sm:$0xff] (%p49_p3), %v159_v2  ;;  %v163_v4 = vld [vmem:[%s1569_s23 + $0x40] sm:$0xff] (%p49_p3)  ;;  %v165_v5 = vld [vmem:[%s1569_s23 + $0x48] sm:$0xff] (%p49_p3)  ;;  %162 = vst [vmem:[%s1574_s24 + $0x18] sm:$0xff] (%p49_p3), %v161_v3 }
  0x14   : > { %164 = vst [vmem:[%s1574_s24 + $0x20] sm:$0xff] (%p49_p3), %v163_v4  ;;  %166 = vst [vmem:[%s1574_s24 + $0x28] sm:$0xff] (%p49_p3), %v165_v5  ;;  %v167_v6 = vld [vmem:[%s1569_s23 + $0x60] sm:$0xff] (%p49_p3)  ;;  %v169_v7 = vld [vmem:[%s1569_s23 + $0x68] sm:$0xff] (%p49_p3) }
  0x15   : > { %v171_v8 = vld [vmem:[%s1569_s23 + $0x80] sm:$0xff]  ;;  %168 = vst [vmem:[%s1574_s24 + $0x30] sm:$0xff] %v167_v6  ;;  %170 = vst [vmem:[%s1574_s24 + $0x38] sm:$0xff] %v169_v7  ;;  %v173_v9 = vld [vmem:[%s1569_s23 + $0x88] sm:$0xff] }
  0x16   : > { %172 = vst [vmem:[%s1574_s24 + $0x40] sm:$0xff] %v171_v8  ;;  %v175_v10 = vld [vmem:[%s1569_s23 + $0xa0] sm:$0xff]  ;;  %v177_v11 = vld [vmem:[%s1569_s23 + $0xa8] sm:$0xff]  ;;  %174 = vst [vmem:[%s1574_s24 + $0x48] sm:$0xff] %v173_v9 }
  0x17   : > { %176 = vst [vmem:[%s1574_s24 + $0x50] sm:$0xff] %v175_v10  ;;  %178 = vst [vmem:[%s1574_s24 + $0x58] sm:$0xff] %v177_v11  ;;  %v179_v12 = vld [vmem:[%s1569_s23 + $0xc0] sm:$0xff]  ;;  %v181_v13 = vld [vmem:[%s1569_s23 + $0xc8] sm:$0xff] }
  0x18   : > { %v183_v14 = vld [vmem:[%s1569_s23 + $0xe0] sm:$0xff]  ;;  %180 = vst [vmem:[%s1574_s24 + $0x60] sm:$0xff] %v179_v12  ;;  %182 = vst [vmem:[%s1574_s24 + $0x68] sm:$0xff] %v181_v13  ;;  %v185_v15 = vld [vmem:[%s1569_s23 + $0xe8] sm:$0xff] }
  0x19   : > { %184 = vst [vmem:[%s1574_s24 + $0x70] sm:$0xff] %v183_v14  ;;  %v187_v16 = vld [vmem:[%s1569_s23 + $0x100] sm:$0xff]  ;;  %v189_v17 = vld [vmem:[%s1569_s23 + $0x108] sm:$0xff]  ;;  %186 = vst [vmem:[%s1574_s24 + $0x78] sm:$0xff] %v185_v15 }
  0x1a   : > { %188 = vst [vmem:[%s1574_s24 + $0x80] sm:$0xff] %v187_v16  ;;  %190 = vst [vmem:[%s1574_s24 + $0x88] sm:$0xff] %v189_v17  ;;  %v191_v18 = vld [vmem:[%s1569_s23 + $0x120] sm:$0xff]  ;;  %v193_v19 = vld [vmem:[%s1569_s23 + $0x128] sm:$0xff] }
  0x1b   : > { %v195_v20 = vld [vmem:[%s1569_s23 + $0x140] sm:$0xff]  ;;  %192 = vst [vmem:[%s1574_s24 + $0x90] sm:$0xff] %v191_v18  ;;  %194 = vst [vmem:[%s1574_s24 + $0x98] sm:$0xff] %v193_v19  ;;  %v197_v21 = vld [vmem:[%s1569_s23 + $0x148] sm:$0xff] }
  0x1c   : > { %196 = vst [vmem:[%s1574_s24 + $0xa0] sm:$0xff] %v195_v20  ;;  %v199_v22 = vld [vmem:[%s1569_s23 + $0x160] sm:$0xff]  ;;  %v201_v23 = vld [vmem:[%s1569_s23 + $0x168] sm:$0xff]  ;;  %198 = vst [vmem:[%s1574_s24 + $0xa8] sm:$0xff] %v197_v21 }
  0x1d   : > { %200 = vst [vmem:[%s1574_s24 + $0xb0] sm:$0xff] %v199_v22  ;;  %202 = vst [vmem:[%s1574_s24 + $0xb8] sm:$0xff] %v201_v23  ;;  %v203_v24 = vld [vmem:[%s1569_s23 + $0x180] sm:$0xff]  ;;  %v205_v25 = vld [vmem:[%s1569_s23 + $0x188] sm:$0xff] }
  0x1e   : > { %v207_v26 = vld [vmem:[%s1569_s23 + $0x1a0] sm:$0xff]  ;;  %204 = vst [vmem:[%s1574_s24 + $0xc0] sm:$0xff] %v203_v24  ;;  %206 = vst [vmem:[%s1574_s24 + $0xc8] sm:$0xff] %v205_v25  ;;  %v209_v27 = vld [vmem:[%s1569_s23 + $0x1a8] sm:$0xff] }
  0x1f   : > { %208 = vst [vmem:[%s1574_s24 + $0xd0] sm:$0xff] %v207_v26  ;;  %v211_v28 = vld [vmem:[%s1569_s23 + $0x1c0] sm:$0xff]  ;;  %v213_v29 = vld [vmem:[%s1569_s23 + $0x1c8] sm:$0xff]  ;;  %210 = vst [vmem:[%s1574_s24 + $0xd8] sm:$0xff] %v209_v27 }
  0x20   : > { %212 = vst [vmem:[%s1574_s24 + $0xe0] sm:$0xff] %v211_v28  ;;  %214 = vst [vmem:[%s1574_s24 + $0xe8] sm:$0xff] %v213_v29  ;;  %v215_v30 = vld [vmem:[%s1569_s23 + $0x1e0] sm:$0xff]  ;;  %v217_v31 = vld [vmem:[%s1569_s23 + $0x1e8] sm:$0xff] }
  0x21   : > { %216 = vst [vmem:[%s1574_s24 + $0xf0] sm:$0xff] %v215_v30  ;;  %218 = vst [vmem:[%s1574_s24 + $0xf8] sm:$0xff] %v217_v31 }
  0x22 PF: > { %p1146_p6 = scmp.ge.s32.totalorder %s1508_s13, 1  ;;  %p235_p7 = scmp.lt.s32.totalorder %s1508_s13, 3 }
  0x24   : > { %p236_p8 = pnand %p1146_p6, %p235_p7 }
  0x25   : > { %s242_s25 = sand.u32 (!%p236_p8), 1, %s1492_s9   ;;  %s1148_s26 = sshll.u32 (!%p236_p8), %s1500_s11, 6 }
  0x26   : > { %239 = sbr.rel (%p236_p8) target bundleno = 376 (0x178), region = 47  ;;  %s1147_s27 = sshll.u32 (!%p236_p8), %s242_s25, 8 }
  0x27   : > { %p277_p9 = scmp.lt.s32.totalorder (!%p236_p8), %s1148_s26, 127  ;;  %s1646_s4 = scalar_lea.vmem (!%p236_p8), [#allocation3], %s1147_s27 }
  0x28   : > { %p1150_p10 = scmp.ne.s32.totalorder (!%p236_p8), %s1500_s11, 0 }
  0x2d   : > { %s1787_s26 = smov (!%p277_p9, %s1148_s26), 127  ;;  %298 = sbr.rel (%p1150_p10) target bundleno = 55 (0x37), region = 55 }
  0x2e   : > { %s1149_s28 = sshll.u32 %s1787_s26, 2  ;;  %v1510_v32 = vmov (!%p1150_p10), 0.0  }
  0x2f   : > { %s1644_s3 = scalar_lea.vmem %s1778_s1, %s1149_s28  ;;  %299 = vst [vmem:[#allocation2] sm:$0xff] (!%p1150_p10), %v1510_v32  ;;  %300 = vst [vmem:[#allocation2 + $0x8] sm:$0xff] (!%p1150_p10), %v1510_v32 }
  0x30   : > { %301 = vst [vmem:[#allocation2 + $0x10] sm:$0xff] (!%p1150_p10), %v1510_v32  ;;  %302 = vst [vmem:[#allocation2 + $0x18] sm:$0xff] (!%p1150_p10), %v1510_v32 }
  0x31   : > { %303 = vst [vmem:[#allocation2 + $0x20] sm:$0xff] (!%p1150_p10), %v1510_v32  ;;  %304 = vst [vmem:[#allocation2 + $0x28] sm:$0xff] (!%p1150_p10), %v1510_v32 }
  0x32   : > { %305 = vst [vmem:[#allocation2 + $0x30] sm:$0xff] (!%p1150_p10), %v1510_v32  ;;  %306 = vst [vmem:[#allocation2 + $0x38] sm:$0xff] (!%p1150_p10), %v1510_v32 }
  0x33   : > { %307 = vst [vmem:[#allocation2 + $0x40] sm:$0xff] (!%p1150_p10), %v1510_v32  ;;  %308 = vst [vmem:[#allocation2 + $0x48] sm:$0xff] (!%p1150_p10), %v1510_v32 }
  0x34   : > { %309 = vst [vmem:[#allocation2 + $0x50] sm:$0xff] %v1510_v32  ;;  %310 = vst [vmem:[#allocation2 + $0x58] sm:$0xff] %v1510_v32 }
  0x35   : > { %311 = vst [vmem:[#allocation2 + $0x60] sm:$0xff] %v1510_v32  ;;  %312 = vst [vmem:[#allocation2 + $0x68] sm:$0xff] %v1510_v32 }
  0x36   : > { %313 = vst [vmem:[#allocation2 + $0x70] sm:$0xff] %v1510_v32  ;;  %314 = vst [vmem:[#allocation2 + $0x78] sm:$0xff] %v1510_v32 }
  0x37 PF: > { %v1390_v33 = vld [vmem:[%s1644_s3 + $0x40] sm:$0xff]   ;;  %v1394_v37 = vld [vmem:[%s1644_s3 + $0x48] sm:$0xff]   ;;  %v1398_v41 = vld [vmem:[%s1644_s3 + $0x50] sm:$0xff]   ;;  %p1215_p11 = scmp.ne.s32.totalorder %s1500_s11, 1 }
  0x38   : > { %v1391_v34 = vld [vmem:[%s1644_s3 + $0xc0] sm:$0xff]   ;;  %1221 = vmatprep.subr.bf16.mxu0 %v1390_v33  ;;  %v1395_v38 = vld [vmem:[%s1644_s3 + $0xc8] sm:$0xff]   ;;  %v1399_v42 = vld [vmem:[%s1644_s3 + $0xd0] sm:$0xff]  }
  0x39   : > { %v1392_v35 = vld [vmem:[%s1644_s3] sm:$0xff]   ;;  %1285 = vmatprep.subr.bf16.mxu1 %v1391_v34  ;;  %v1396_v39 = vld [vmem:[%s1644_s3 + $0x8] sm:$0xff]   ;;  %v1400_v43 = vld [vmem:[%s1644_s3 + $0x10] sm:$0xff]  }
  0x3a   : > { %v1393_v36 = vld [vmem:[%s1644_s3 + $0x80] sm:$0xff]   ;;  %1222 = vmatpush3.bf16.msra.mxu0 %v1392_v35  ;;  %v1397_v40 = vld [vmem:[%s1644_s3 + $0x88] sm:$0xff]   ;;  %v1401_v44 = vld [vmem:[%s1644_s3 + $0x90] sm:$0xff]  }
  0x3b   : > { %1286 = vmatpush3.bf16.msra.mxu1 %v1393_v36  ;;  %1223 = vmatprep.subr.bf16.mxu0 %v1394_v37  ;;  %v1402_v45 = vld [vmem:[%s1644_s3 + $0x58] sm:$0xff]   ;;  %v1406_v49 = vld [vmem:[%s1644_s3 + $0x60] sm:$0xff]   ;;  %v1410_v53 = vld [vmem:[%s1644_s3 + $0x68] sm:$0xff]  }
  0x3c   : > { %1287 = vmatprep.subr.bf16.mxu1 %v1395_v38  ;;  %v1403_v46 = vld [vmem:[%s1644_s3 + $0xd8] sm:$0xff]   ;;  %v1407_v50 = vld [vmem:[%s1644_s3 + $0xe0] sm:$0xff]   ;;  %v1411_v54 = vld [vmem:[%s1644_s3 + $0xe8] sm:$0xff]  }
  0x3d   : > { %v1404_v47 = vld [vmem:[%s1644_s3 + $0x18] sm:$0xff]   ;;  %v1408_v51 = vld [vmem:[%s1644_s3 + $0x20] sm:$0xff]   ;;  %v1412_v55 = vld [vmem:[%s1644_s3 + $0x28] sm:$0xff]  }
  0x3e   : > { %1224 = vmatpush3.bf16.msra.mxu0 %v1396_v39  ;;  %v1405_v48 = vld [vmem:[%s1644_s3 + $0x98] sm:$0xff]   ;;  %v1409_v52 = vld [vmem:[%s1644_s3 + $0xa0] sm:$0xff]   ;;  %v1413_v56 = vld [vmem:[%s1644_s3 + $0xa8] sm:$0xff]  }
  0x3f   : > { %1288 = vmatpush3.bf16.msra.mxu1 %v1397_v40  ;;  %1225 = vmatprep.subr.bf16.mxu0 %v1398_v41  ;;  %v1414_v57 = vld [vmem:[%s1644_s3 + $0x70] sm:$0xff]   ;;  %v1418_v61 = vld [vmem:[%s1644_s3 + $0x78] sm:$0xff]  }
  0x40   : > { %1289 = vmatprep.subr.bf16.mxu1 %v1399_v42  ;;  %v1415_v58 = vld [vmem:[%s1644_s3 + $0xf0] sm:$0xff]   ;;  %v1419_v62 = vld [vmem:[%s1644_s3 + $0xf8] sm:$0xff]   ;;  %v315_v42 = vld [vmem:[#allocation2] sm:$0xff] }
  0x41   : > { %v1416_v59 = vld [vmem:[%s1644_s3 + $0x30] sm:$0xff]   ;;  %v1420_v63 = vld [vmem:[%s1644_s3 + $0x38] sm:$0xff]  }
  0x42   : > { %1226 = vmatpush3.bf16.msra.mxu0 %v1400_v43  ;;  %v1417_v60 = vld [vmem:[%s1644_s3 + $0xb0] sm:$0xff]   ;;  %v1421_v0 = vld [vmem:[%s1644_s3 + $0xb8] sm:$0xff]  }
  0x43   : > { %1290 = vmatpush3.bf16.msra.mxu1 %v1401_v44  ;;  %1227 = vmatprep.subr.bf16.mxu0 %v1402_v45  ;;  %v1422_v1 = vld [vmem:[%s1646_s4] ss:$16 sps:$4 sm:$0xff]   ;;  %v1424_v2 = vld [vmem:[%s1646_s4 + $0x4] ss:$16 sps:$4 sm:$0xff]   ;;  %v1425_v3 = vld [vmem:[%s1646_s4 + $0x8] ss:$16 sps:$4 sm:$0xff]  }
  0x44   : > { %1291 = vmatprep.subr.bf16.mxu1 %v1403_v46  ;;  %v1427_v4 = vld [vmem:[%s1646_s4 + $0xc] ss:$16 sps:$4 sm:$0xff]   ;;  %811 = vmatprep.mubr.bf16.mxu0 %v1424_v2  ;;  %v1428_v5 = vld [vmem:[%s1646_s4 + $0x24] ss:$16 sps:$4 sm:$0xff]   ;;  %v1432_v7 = vld [vmem:[%s1646_s4 + $0x20] ss:$16 sps:$4 sm:$0xff]  }
  0x45   : > { %908 = vmatprep.mubr.bf16.mxu1 %v1427_v4  ;;  %v1430_v6 = vld [vmem:[%s1646_s4 + $0x2c] ss:$16 sps:$4 sm:$0xff]   ;;  %v1433_v8 = vld [vmem:[%s1646_s4 + $0x28] ss:$16 sps:$4 sm:$0xff]   ;;  %v1434_v9 = vld [vmem:[%s1646_s4 + $0x44] ss:$16 sps:$4 sm:$0xff]  }
  0x46   : > { %1228 = vmatpush3.bf16.msra.mxu0 %v1404_v47  ;;  %v1436_v10 = vld [vmem:[%s1646_s4 + $0x4c] ss:$16 sps:$4 sm:$0xff]   ;;  %v1438_v11 = vld [vmem:[%s1646_s4 + $0x40] ss:$16 sps:$4 sm:$0xff]   ;;  %v1439_v12 = vld [vmem:[%s1646_s4 + $0x48] ss:$16 sps:$4 sm:$0xff]  }
  0x47   : > { %1292 = vmatpush3.bf16.msra.mxu1 %v1405_v48  ;;  %1229 = vmatprep.subr.bf16.mxu0 %v1406_v49  ;;  %v1440_v13 = vld [vmem:[%s1646_s4 + $0x64] ss:$16 sps:$4 sm:$0xff]   ;;  %v1442_v14 = vld [vmem:[%s1646_s4 + $0x6c] ss:$16 sps:$4 sm:$0xff]   ;;  %v1444_v15 = vld [vmem:[%s1646_s4 + $0x60] ss:$16 sps:$4 sm:$0xff]  }
  0x48   : > { %1293 = vmatprep.subr.bf16.mxu1 %v1407_v50  ;;  %v1445_v16 = vld [vmem:[%s1646_s4 + $0x68] ss:$16 sps:$4 sm:$0xff]   ;;  %v1446_v17 = vld [vmem:[%s1646_s4 + $0x84] ss:$16 sps:$4 sm:$0xff]   ;;  %v1448_v18 = vld [vmem:[%s1646_s4 + $0x8c] ss:$16 sps:$4 sm:$0xff]  }
  0x49   : > { %v1450_v19 = vld [vmem:[%s1646_s4 + $0x80] ss:$16 sps:$4 sm:$0xff]   ;;  %v1451_v20 = vld [vmem:[%s1646_s4 + $0x88] ss:$16 sps:$4 sm:$0xff]   ;;  %v1452_v21 = vld [vmem:[%s1646_s4 + $0xa4] ss:$16 sps:$4 sm:$0xff]  }
  0x4a   : > { %1230 = vmatpush3.bf16.msra.mxu0 %v1408_v51  ;;  %v1454_v22 = vld [vmem:[%s1646_s4 + $0xac] ss:$16 sps:$4 sm:$0xff]   ;;  %v1456_v23 = vld [vmem:[%s1646_s4 + $0xa0] ss:$16 sps:$4 sm:$0xff]   ;;  %v1457_v24 = vld [vmem:[%s1646_s4 + $0xa8] ss:$16 sps:$4 sm:$0xff]  }
  0x4b   : > { %1294 = vmatpush3.bf16.msra.mxu1 %v1409_v52  ;;  %1231 = vmatprep.subr.bf16.mxu0 %v1410_v53  ;;  %v1458_v25 = vld [vmem:[%s1646_s4 + $0xc4] ss:$16 sps:$4 sm:$0xff]   ;;  %v1460_v26 = vld [vmem:[%s1646_s4 + $0xcc] ss:$16 sps:$4 sm:$0xff]   ;;  %v1462_v27 = vld [vmem:[%s1646_s4 + $0xc0] ss:$16 sps:$4 sm:$0xff]  }
  0x4c   : > { %1295 = vmatprep.subr.bf16.mxu1 %v1411_v54  ;;  %v1463_v28 = vld [vmem:[%s1646_s4 + $0xc8] ss:$16 sps:$4 sm:$0xff]   ;;  %v1464_v29 = vld [vmem:[%s1646_s4 + $0xe4] ss:$16 sps:$4 sm:$0xff]   ;;  %v1466_v30 = vld [vmem:[%s1646_s4 + $0xec] ss:$16 sps:$4 sm:$0xff]  }
  0x4d   : > { %v1468_v31 = vld [vmem:[%s1646_s4 + $0xe0] ss:$16 sps:$4 sm:$0xff]   ;;  %v1469_v32 = vld [vmem:[%s1646_s4 + $0xe8] ss:$16 sps:$4 sm:$0xff]  }
  0x4e   : > { %1232 = vmatpush3.bf16.msra.mxu0 %v1412_v55  ;;  %v316_v47 = vld [vmem:[#allocation2 + $0x8] sm:$0xff] }
  0x4f   : > { %1296 = vmatpush3.bf16.msra.mxu1 %v1413_v56  ;;  %1233 = vmatprep.subr.bf16.mxu0 %v1414_v57 }
  0x50   : > { %1297 = vmatprep.subr.bf16.mxu1 %v1415_v58 }
  0x52   : > { %1234 = vmatpush3.bf16.msra.mxu0 %v1416_v59 }
  0x53   : > { %1298 = vmatpush3.bf16.msra.mxu1 %v1417_v60  ;;  %1235 = vmatprep.subr.bf16.mxu0 %v1418_v61  ;;  %v317_v60 = vld [vmem:[#allocation2 + $0x10] sm:$0xff] }
  0x54   : > { %1299 = vmatprep.subr.bf16.mxu1 %v1419_v62 }
  0x56   : > { %1236 = vmatpush3.bf16.msra.mxu0 %v1420_v63 }
  0x57   : > { %1300 = vmatpush3.bf16.msra.mxu1 %v1421_v0 }
  0x59   : > { %812 = vmatmul.mubr.bf16.vlgmr.msra.gmra.mrb[0].mxu0 %v1422_v1  ;;  %v318_v1 = vld [vmem:[#allocation2 + $0x18] sm:$0xff] }
  0x5a   : > { %909 = vmatmul.mubr.bf16.vlgmr.msra.gmra.mrb[0].mxu1 %v1425_v3  ;;  %819 = vmatprep.mubr.bf16.mxu0 %v1428_v5 }
  0x5b   : > { %916 = vmatprep.mubr.bf16.mxu1 %v1430_v6 }
  0x61   : > { %820 = vmatmul.mubr.bf16.gmra.mrb[4].mxu0 %v1432_v7 }
  0x62   : > { %917 = vmatmul.mubr.bf16.gmra.mrb[4].mxu1 %v1433_v8  ;;  %827 = vmatprep.mubr.bf16.mxu0 %v1434_v9 }
  0x63   : > { %924 = vmatprep.mubr.bf16.mxu1 %v1436_v10 }
  0x69   : > { %828 = vmatmul.mubr.bf16.gmra.mrb[8].mxu0 %v1438_v11 }
  0x6a   : > { %925 = vmatmul.mubr.bf16.gmra.mrb[8].mxu1 %v1439_v12  ;;  %835 = vmatprep.mubr.bf16.mxu0 %v1440_v13 }
  0x6b   : > { %932 = vmatprep.mubr.bf16.mxu1 %v1442_v14  ;;  %v319_v14 = vld [vmem:[#allocation2 + $0x20] sm:$0xff] }
  0x71   : > { %836 = vmatmul.mubr.bf16.gmra.mrb[12].mxu0 %v1444_v15 }
  0x72   : > { %933 = vmatmul.mubr.bf16.gmra.mrb[12].mxu1 %v1445_v16  ;;  %843 = vmatprep.mubr.bf16.mxu0 %v1446_v17 }
  0x73   : > { %940 = vmatprep.mubr.bf16.mxu1 %v1448_v18 }
  0x79   : > { %844 = vmatmul.mubr.bf16.gmra.mrb[16].mxu0 %v1450_v19  ;;  %v320_v19 = vld [vmem:[#allocation2 + $0x28] sm:$0xff] }
  0x7a   : > { %941 = vmatmul.mubr.bf16.gmra.mrb[16].mxu1 %v1451_v20  ;;  %851 = vmatprep.mubr.bf16.mxu0 %v1452_v21 }
  0x7b   : > { %948 = vmatprep.mubr.bf16.mxu1 %v1454_v22 }
  0x81   : > { %852 = vmatmul.mubr.bf16.gmra.mrb[20].mxu0 %v1456_v23 }
  0x82   : > { %949 = vmatmul.mubr.bf16.gmra.mrb[20].mxu1 %v1457_v24  ;;  %859 = vmatprep.mubr.bf16.mxu0 %v1458_v25 }
  0x83   : > { %956 = vmatprep.mubr.bf16.mxu1 %v1460_v26 }
  0x89   : > { %860 = vmatmul.mubr.bf16.gmra.mrb[24].mxu0 %v1462_v27 }
  0x8a   : > { %957 = vmatmul.mubr.bf16.gmra.mrb[24].mxu1 %v1463_v28  ;;  %867 = vmatprep.mubr.bf16.mxu0 %v1464_v29 }
  0x8b   : > { %964 = vmatprep.mubr.bf16.mxu1 %v1466_v30 }
  0x91   : > { %868 = vmatmul.mubr.bf16.gmra.mrb[28].mxu0 %v1468_v31 }
  0x92   : > { %965 = vmatmul.mubr.bf16.gmra.mrb[28].mxu1 %v1469_v32  ;;  %v321_v32 = vld [vmem:[#allocation2 + $0x30] sm:$0xff] }
 0x12c   : > { %v1237_v33 = vpop.f32.mrb[0].mxu0 }
 0x12d   : > { %v1301_v34 = vpop.f32.mrb[0].mxu1  ;;  %v1238_v35 = vpop.f32.mrb[1].mxu0 }
 0x12e   : > { %v1239_v36 = vadd.f32 %v1238_v35, %v1237_v33  ;;  %v1302_v37 = vpop.f32.mrb[1].mxu1  ;;  %v1240_v38 = vpop.f32.mrb[2].mxu0 }
 0x12f   : > { %v1303_v39 = vadd.f32 %v1302_v37, %v1301_v34  ;;  %v1304_v40 = vpop.f32.mrb[2].mxu1  ;;  %v1241_v41 = vpop.f32.mrb[3].mxu0  ;;  %v322_v37 = vld [vmem:[#allocation2 + $0x38] sm:$0xff] }
 0x130   : > { %v1242_v43 = vadd.f32 %v1241_v41, %v1240_v38  ;;  %v1305_v44 = vpop.f32.mrb[3].mxu1 }
 0x131   : > { %v911_v45 = vadd.f32 %v1303_v39, %v1239_v36  ;;  %v1306_v46 = vadd.f32 %v1305_v44, %v1304_v40 }
 0x133   : > { %v973_v48 = vadd.f32 %v911_v45, %v315_v42  ;;  %v914_v49 = vadd.f32 %v1306_v46, %v1242_v43 }
 0x134   : > { %v1243_v50 = vpop.f32.mrb[4].mxu0 }
 0x135   : > { %989 = vst [vmem:[#allocation2] sm:$0xff] %v973_v48  ;;  %v974_v51 = vadd.f32 %v914_v49, %v316_v47  ;;  %v1307_v52 = vpop.f32.mrb[4].mxu1  ;;  %v1244_v53 = vpop.f32.mrb[5].mxu0 }
 0x136   : > { %v1245_v54 = vadd.f32 %v1244_v53, %v1243_v50  ;;  %v1308_v55 = vpop.f32.mrb[5].mxu1  ;;  %v1246_v56 = vpop.f32.mrb[6].mxu0  ;;  %v323_v50 = vld [vmem:[#allocation2 + $0x40] sm:$0xff] }
 0x137   : > { %990 = vst [vmem:[#allocation2 + $0x8] sm:$0xff] %v974_v51  ;;  %v1309_v57 = vadd.f32 %v1308_v55, %v1307_v52  ;;  %v1310_v58 = vpop.f32.mrb[6].mxu1  ;;  %v1247_v59 = vpop.f32.mrb[7].mxu0  ;;  %v324_v55 = vld [vmem:[#allocation2 + $0x48] sm:$0xff] }
 0x138   : > { %v1248_v61 = vadd.f32 %v1247_v59, %v1246_v56  ;;  %v1311_v62 = vpop.f32.mrb[7].mxu1 }
 0x139   : > { %v919_v63 = vadd.f32 %v1309_v57, %v1245_v54  ;;  %v1312_v0 = vadd.f32 %v1311_v62, %v1310_v58 }
 0x13b   : > { %v975_v2 = vadd.f32 %v919_v63, %v317_v60  ;;  %v922_v3 = vadd.f32 %v1312_v0, %v1248_v61 }
 0x13c   : > { %v1249_v4 = vpop.f32.mrb[8].mxu0 }
 0x13d   : > { %991 = vst [vmem:[#allocation2 + $0x10] sm:$0xff] %v975_v2  ;;  %v976_v5 = vadd.f32 %v922_v3, %v318_v1  ;;  %v1313_v6 = vpop.f32.mrb[8].mxu1  ;;  %v1250_v7 = vpop.f32.mrb[9].mxu0 }
 0x13e   : > { %v1251_v8 = vadd.f32 %v1250_v7, %v1249_v4  ;;  %v1314_v9 = vpop.f32.mrb[9].mxu1  ;;  %v1252_v10 = vpop.f32.mrb[10].mxu0  ;;  %v325_v4 = vld [vmem:[#allocation2 + $0x50] sm:$0xff] }
 0x13f   : > { %992 = vst [vmem:[#allocation2 + $0x18] sm:$0xff] %v976_v5  ;;  %v1315_v11 = vadd.f32 %v1314_v9, %v1313_v6  ;;  %v1316_v12 = vpop.f32.mrb[10].mxu1  ;;  %v1253_v13 = vpop.f32.mrb[11].mxu0  ;;  %v326_v9 = vld [vmem:[#allocation2 + $0x58] sm:$0xff] }
 0x140   : > { %v1254_v15 = vadd.f32 %v1253_v13, %v1252_v10  ;;  %v1317_v16 = vpop.f32.mrb[11].mxu1 }
 0x141   : > { %v927_v17 = vadd.f32 %v1315_v11, %v1251_v8  ;;  %v1318_v18 = vadd.f32 %v1317_v16, %v1316_v12 }
 0x143   : > { %v977_v20 = vadd.f32 %v927_v17, %v319_v14  ;;  %v930_v21 = vadd.f32 %v1318_v18, %v1254_v15 }
 0x144   : > { %v1255_v22 = vpop.f32.mrb[12].mxu0 }
 0x145   : > { %993 = vst [vmem:[#allocation2 + $0x20] sm:$0xff] %v977_v20  ;;  %v978_v23 = vadd.f32 %v930_v21, %v320_v19  ;;  %v1319_v24 = vpop.f32.mrb[12].mxu1  ;;  %v1256_v25 = vpop.f32.mrb[13].mxu0 }
 0x146   : > { %v1257_v26 = vadd.f32 %v1256_v25, %v1255_v22  ;;  %v1320_v27 = vpop.f32.mrb[13].mxu1  ;;  %v1258_v28 = vpop.f32.mrb[14].mxu0  ;;  %v327_v22 = vld [vmem:[#allocation2 + $0x60] sm:$0xff] }
 0x147   : > { %994 = vst [vmem:[#allocation2 + $0x28] sm:$0xff] %v978_v23  ;;  %v1321_v29 = vadd.f32 %v1320_v27, %v1319_v24  ;;  %v1322_v30 = vpop.f32.mrb[14].mxu1  ;;  %v1259_v31 = vpop.f32.mrb[15].mxu0  ;;  %v328_v27 = vld [vmem:[#allocation2 + $0x68] sm:$0xff] }
 0x148   : > { %v1260_v33 = vadd.f32 %v1259_v31, %v1258_v28  ;;  %v1323_v34 = vpop.f32.mrb[15].mxu1 }
 0x149   : > { %v935_v35 = vadd.f32 %v1321_v29, %v1257_v26  ;;  %v1324_v36 = vadd.f32 %v1323_v34, %v1322_v30 }
 0x14b   : > { %v979_v38 = vadd.f32 %v935_v35, %v321_v32  ;;  %v938_v39 = vadd.f32 %v1324_v36, %v1260_v33 }
 0x14c   : > { %v1261_v40 = vpop.f32.mrb[16].mxu0 }
 0x14d   : > { %995 = vst [vmem:[#allocation2 + $0x30] sm:$0xff] %v979_v38  ;;  %v980_v41 = vadd.f32 %v938_v39, %v322_v37  ;;  %v1325_v42 = vpop.f32.mrb[16].mxu1  ;;  %v1262_v43 = vpop.f32.mrb[17].mxu0 }
 0x14e   : > { %v1263_v44 = vadd.f32 %v1262_v43, %v1261_v40  ;;  %v1326_v45 = vpop.f32.mrb[17].mxu1  ;;  %v1264_v46 = vpop.f32.mrb[18].mxu0  ;;  %v329_v40 = vld [vmem:[#allocation2 + $0x70] sm:$0xff] }
 0x14f   : > { %996 = vst [vmem:[#allocation2 + $0x38] sm:$0xff] %v980_v41  ;;  %v1327_v47 = vadd.f32 %v1326_v45, %v1325_v42  ;;  %v1328_v48 = vpop.f32.mrb[18].mxu1  ;;  %v1265_v49 = vpop.f32.mrb[19].mxu0  ;;  %v330_v45 = vld [vmem:[#allocation2 + $0x78] sm:$0xff] }
 0x150   : > { %v1266_v51 = vadd.f32 %v1265_v49, %v1264_v46  ;;  %v1329_v52 = vpop.f32.mrb[19].mxu1  ;;  %v1009_v49 = vld [vmem:[#allocation2] sm:$0xff] (!%p1215_p11) }
 0x151   : > { %v943_v53 = vadd.f32 %v1327_v47, %v1263_v44  ;;  %v1330_v54 = vadd.f32 %v1329_v52, %v1328_v48  ;;  %1025 = vst [vmem:[%s1779_s2] sm:$0xff] (!%p1215_p11), %v1009_v49  ;;  %v1012_v52 = vld [vmem:[#allocation2 + $0x18] sm:$0xff] (!%p1215_p11) }
 0x152   : > { %1028 = vst [vmem:[%s1779_s2 + $0x18] sm:$0xff] (!%p1215_p11), %v1012_v52 }
 0x153   : > { %v981_v56 = vadd.f32 %v943_v53, %v323_v50  ;;  %v946_v57 = vadd.f32 %v1330_v54, %v1266_v51  ;;  %v1010_v50 = vld [vmem:[#allocation2 + $0x8] sm:$0xff] (!%p1215_p11)  ;;  %v1011_v51 = vld [vmem:[#allocation2 + $0x10] sm:$0xff] (!%p1215_p11)  ;;  %v1013_v53 = vld [vmem:[#allocation2 + $0x20] sm:$0xff] (!%p1215_p11) }
 0x154   : > { %v1267_v58 = vpop.f32.mrb[20].mxu0  ;;  %1026 = vst [vmem:[%s1779_s2 + $0x8] sm:$0xff] (!%p1215_p11), %v1010_v50  ;;  %1027 = vst [vmem:[%s1779_s2 + $0x10] sm:$0xff] (!%p1215_p11), %v1011_v51  ;;  %v1014_v54 = vld [vmem:[#allocation2 + $0x28] sm:$0xff] (!%p1215_p11) }
 0x155   : > { %997 = vst [vmem:[#allocation2 + $0x40] sm:$0xff] %v981_v56  ;;  %v982_v59 = vadd.f32 %v946_v57, %v324_v55  ;;  %v1331_v60 = vpop.f32.mrb[20].mxu1  ;;  %v1268_v61 = vpop.f32.mrb[21].mxu0  ;;  %1029 = vst [vmem:[%s1779_s2 + $0x20] sm:$0xff] (!%p1215_p11), %v1013_v53  ;;  %v1015_v55 = vld [vmem:[#allocation2 + $0x30] sm:$0xff] (!%p1215_p11) }
 0x156   : > { %v1269_v62 = vadd.f32 %v1268_v61, %v1267_v58  ;;  %v1332_v63 = vpop.f32.mrb[21].mxu1  ;;  %v1270_v0 = vpop.f32.mrb[22].mxu0  ;;  %1030 = vst [vmem:[%s1779_s2 + $0x28] sm:$0xff] (!%p1215_p11), %v1014_v54  ;;  %v1016_v56 = vld [vmem:[#allocation2 + $0x38] sm:$0xff] (!%p1215_p11)  ;;  %1031 = vst [vmem:[%s1779_s2 + $0x30] sm:$0xff] (!%p1215_p11), %v1015_v55 }
 0x157   : > { %998 = vst [vmem:[#allocation2 + $0x48] sm:$0xff] %v982_v59  ;;  %v1333_v1 = vadd.f32 %v1332_v63, %v1331_v60  ;;  %v1334_v2 = vpop.f32.mrb[22].mxu1  ;;  %v1271_v3 = vpop.f32.mrb[23].mxu0  ;;  %1032 = vst [vmem:[%s1779_s2 + $0x38] sm:$0xff] (!%p1215_p11), %v1016_v56 }
 0x158   : > { %v1272_v5 = vadd.f32 %v1271_v3, %v1270_v0  ;;  %v1335_v6 = vpop.f32.mrb[23].mxu1 }
 0x159   : > { %v951_v7 = vadd.f32 %v1333_v1, %v1269_v62  ;;  %v1336_v8 = vadd.f32 %v1335_v6, %v1334_v2 }
 0x15b   : > { %v983_v10 = vadd.f32 %v951_v7, %v325_v4  ;;  %v954_v11 = vadd.f32 %v1336_v8, %v1272_v5 }
 0x15c   : > { %v1273_v12 = vpop.f32.mrb[24].mxu0  ;;  %v1017_v57 = vld [vmem:[#allocation2 + $0x40] sm:$0xff] (!%p1215_p11) }
 0x15d   : > { %999 = vst [vmem:[#allocation2 + $0x50] sm:$0xff] %v983_v10  ;;  %v984_v13 = vadd.f32 %v954_v11, %v326_v9  ;;  %v1337_v14 = vpop.f32.mrb[24].mxu1  ;;  %v1274_v15 = vpop.f32.mrb[25].mxu0  ;;  %1033 = vst [vmem:[%s1779_s2 + $0x40] sm:$0xff] (!%p1215_p11), %v1017_v57 }
 0x15e   : > { %v1275_v16 = vadd.f32 %v1274_v15, %v1273_v12  ;;  %v1338_v17 = vpop.f32.mrb[25].mxu1  ;;  %v1276_v18 = vpop.f32.mrb[26].mxu0  ;;  %v1018_v58 = vld [vmem:[#allocation2 + $0x48] sm:$0xff] (!%p1215_p11) }
 0x15f   : > { %1000 = vst [vmem:[#allocation2 + $0x58] sm:$0xff] %v984_v13  ;;  %v1339_v19 = vadd.f32 %v1338_v17, %v1337_v14  ;;  %v1340_v20 = vpop.f32.mrb[26].mxu1  ;;  %v1277_v21 = vpop.f32.mrb[27].mxu0  ;;  %1034 = vst [vmem:[%s1779_s2 + $0x48] sm:$0xff] (!%p1215_p11), %v1018_v58 }
 0x160   : > { %v1278_v23 = vadd.f32 %v1277_v21, %v1276_v18  ;;  %v1341_v24 = vpop.f32.mrb[27].mxu1 }
 0x161   : > { %v959_v25 = vadd.f32 %v1339_v19, %v1275_v16  ;;  %v1342_v26 = vadd.f32 %v1341_v24, %v1340_v20 }
 0x163   : > { %v985_v28 = vadd.f32 %v959_v25, %v327_v22  ;;  %v962_v29 = vadd.f32 %v1342_v26, %v1278_v23 }
 0x164   : > { %v1279_v30 = vpop.f32.mrb[28].mxu0  ;;  %v1019_v59 = vld [vmem:[#allocation2 + $0x50] sm:$0xff] (!%p1215_p11) }
 0x165   : > { %1001 = vst [vmem:[#allocation2 + $0x60] sm:$0xff] %v985_v28  ;;  %v986_v31 = vadd.f32 %v962_v29, %v328_v27  ;;  %v1343_v32 = vpop.f32.mrb[28].mxu1  ;;  %v1280_v33 = vpop.f32.mrb[29].mxu0  ;;  %1035 = vst [vmem:[%s1779_s2 + $0x50] sm:$0xff] (!%p1215_p11), %v1019_v59 }
 0x166   : > { %v1281_v34 = vadd.f32 %v1280_v33, %v1279_v30  ;;  %v1344_v35 = vpop.f32.mrb[29].mxu1  ;;  %v1282_v36 = vpop.f32.mrb[30].mxu0  ;;  %v1020_v60 = vld [vmem:[#allocation2 + $0x58] sm:$0xff] (!%p1215_p11) }
 0x167   : > { %1002 = vst [vmem:[#allocation2 + $0x68] sm:$0xff] %v986_v31  ;;  %v1345_v37 = vadd.f32 %v1344_v35, %v1343_v32  ;;  %v1346_v38 = vpop.f32.mrb[30].mxu1  ;;  %v1283_v39 = vpop.f32.mrb[31].mxu0  ;;  %1036 = vst [vmem:[%s1779_s2 + $0x58] sm:$0xff] (!%p1215_p11), %v1020_v60 }
 0x168   : > { %v1284_v41 = vadd.f32 %v1283_v39, %v1282_v36  ;;  %v1347_v42 = vpop.f32.mrb[31].mxu1 }
 0x169   : > { %v967_v43 = vadd.f32 %v1345_v37, %v1281_v34  ;;  %v1348_v44 = vadd.f32 %v1347_v42, %v1346_v38  ;;  %1008 = sbr.rel (%p1215_p11) target bundleno = 376 (0x178), region = 59 }
 0x16b   : > { %v987_v46 = vadd.f32 %v967_v43, %v329_v40  ;;  %v970_v47 = vadd.f32 %v1348_v44, %v1284_v41 }
 0x16c   : > { %v1021_v61 = vld [vmem:[#allocation2 + $0x60] sm:$0xff] (!%p1215_p11) }
 0x16d   : > { %1003 = vst [vmem:[#allocation2 + $0x70] sm:$0xff] %v987_v46  ;;  %v988_v48 = vadd.f32 %v970_v47, %v330_v45  ;;  %1037 = vst [vmem:[%s1779_s2 + $0x60] sm:$0xff] (!%p1215_p11), %v1021_v61 }
 0x16e   : > { %v1022_v62 = vld [vmem:[#allocation2 + $0x68] sm:$0xff] (!%p1215_p11) }
 0x16f   : > { %1004 = vst [vmem:[#allocation2 + $0x78] sm:$0xff] %v988_v48  ;;  %1038 = vst [vmem:[%s1779_s2 + $0x68] sm:$0xff] (!%p1215_p11), %v1022_v62 }
 0x174   : > { %v1023_v63 = vld [vmem:[#allocation2 + $0x70] sm:$0xff] }
 0x175   : > { %1039 = vst [vmem:[%s1779_s2 + $0x70] sm:$0xff] %v1023_v63 }
 0x176   : > { %v1024_v0 = vld [vmem:[#allocation2 + $0x78] sm:$0xff] }
 0x177   : > { %1040 = vst [vmem:[%s1779_s2 + $0x78] sm:$0xff] %v1024_v0 }
 0x178 PF: > { %s12_s13 = sadd.s32 1, %s1508_s13   ;;  %s1780_s9 = smov %s1496_s10 }
 0x179   : > { %p9_p12 = scmp.ge.s32.totalorder %s12_s13, 4   ;;  %s1781_s10 = smov %s1561_s17 }
 0x17a   : > { %s1782_s11 = smov %s1504_s12  ;;  %s1783_s12 = smov %s1785_s14 }
 0x17b   :  { %11 = sbr.rel (!%p9_p12) target bundleno = 3 (0x3), region = 97 }

// kernel: patch_discriminator.10
= control target key start
LH: loop header
LB: loop body
LE: loop exit
PB: predicated region body
PF: predicated region fallthrough
CT: control target
= control target key end

     0   :  { %s470_s6 = smov 0   ;;  %s472_s7 = smov 0   ;;  %s507_s0 = inlined_call_operand.vmem [shape: f32[2,64,128], index: 0, kind: input, shape index: {}]   ;;  %s508_s1 = inlined_call_operand.vmem [shape: bf16[2,64,128], index: 1, kind: output, shape index: {}]  }
   0x1   :  { %s474_s8 = smov 0  }
   0x2 LB: > { %s23_s9 = sadd.s32 1, %s454_s7  ;;  %p362_p0 = scmp.ge.s32.totalorder %s458_s8, 1  ;;  %s458_s8 = sphi %s474_s8, %s11_s8   ;;  %s454_s7 = sphi %s472_s7, %s510_s7   ;;  %s450_s6 = sphi %s470_s6, %s509_s6  }
   0x3   : > { %p25_p1 = scmp.ge.s32.totalorder %s23_s9, 2  ;;  %p106_p2 = scmp.lt.s32.totalorder %s458_s8, 3 }
   0x5   : > { %s512_s9 = smov (%p25_p1, %s23_s9), 0  ;;  %p107_p3 = pnand %p362_p0, %p106_p2 }
   0x6   : > { %p132_p4 = scmp.lt.s32.totalorder (!%p107_p3), %s450_s6, 1 }
   0x7   : > { %110 = sbr.rel (%p107_p3) target bundleno = 104 (0x68), region = 24 }
   0xe   : > { %s514_s6 = smov (!%p132_p4, %s450_s6), 1 }
   0xf   : > { %s377_s10 = sshll.u32 %s514_s6, 6  ;;  %s378_s14 = sshll.u32 %s514_s6, 5 }
  0x10   : > { %s139_s13 = scalar_lea.vmem %s507_s0, %s377_s10  ;;  %s147_s17 = scalar_lea.vmem %s508_s1, %s378_s14 }
  0x11   : > { %v148_v0 = vld [vmem:[%s139_s13] sm:$0xff]  ;;  %v149_v1 = vld [vmem:[%s139_s13 + $0x8] sm:$0xff]  ;;  %v150_v2 = vld [vmem:[%s139_s13 + $0x10] sm:$0xff] }
  0x12   : > { %v156_v3 = vadd.f32 %v149_v1, %v148_v0  ;;  %v151_v4 = vld [vmem:[%s139_s13 + $0x18] sm:$0xff]  ;;  %v152_v6 = vld [vmem:[%s139_s13 + $0x20] sm:$0xff]  ;;  %v153_v8 = vld [vmem:[%s139_s13 + $0x28] sm:$0xff] }
  0x13   : > { %v154_v10 = vld [vmem:[%s139_s13 + $0x30] sm:$0xff]  ;;  %v155_v12 = vld [vmem:[%s139_s13 + $0x38] sm:$0xff] }
  0x14   : > { %v157_v5 = vadd.f32 %v156_v3, %v150_v2 }
  0x16   : > { %v158_v7 = vadd.f32 %v157_v5, %v151_v4 }
  0x18   : > { %v159_v9 = vadd.f32 %v158_v7, %v152_v6 }
  0x1a   : > { %v160_v11 = vadd.f32 %v159_v9, %v153_v8 }
  0x1c   : > { %v161_v13 = vadd.f32 %v160_v11, %v154_v10 }
  0x1e   : > { %v162_v14 = vadd.f32 %v161_v13, %v155_v12 }
  0x20   : > { %v163_v15 = vrot.slane %v162_v14, 4 }
  0x22   : > { %v164_v16 = vadd.f32 %v163_v15, %v162_v14 }
  0x24   : > { %v165_v17 = vrot.slane %v164_v16, 2 }
  0x26   : > { %v166_v18 = vadd.f32 %v165_v17, %v164_v16 }
  0x28   : > { %v167_v19 = vrot.slane %v166_v18, 1 }
  0x2a   : > { %v168_v20 = vadd.f32 %v167_v19, %v166_v18 }
  0x2c   : > { %v170_v21 = vmul.f32 0.015625, %v168_v20 }
  0x2e   : > { %v171_v22 = vsub.f32 %v148_v0, %v170_v21  ;;  %v172_v23 = vsub.f32 %v149_v1, %v170_v21  ;;  %v173_v24 = vsub.f32 %v150_v2, %v170_v21  ;;  %v174_v25 = vsub.f32 %v151_v4, %v170_v21 }
  0x2f   : > { %v175_v26 = vsub.f32 %v152_v6, %v170_v21  ;;  %v176_v30 = vsub.f32 %v153_v8, %v170_v21  ;;  %v177_v33 = vsub.f32 %v154_v10, %v170_v21  ;;  %v178_v36 = vsub.f32 %v155_v12, %v170_v21 }
  0x30   : > { %v179_v27 = vmul.f32 %v171_v22, %v171_v22  ;;  %v180_v28 = vmul.f32 %v172_v23, %v172_v23  ;;  %v181_v29 = vmul.f32 %v173_v24, %v173_v24  ;;  %v182_v31 = vmul.f32 %v174_v25, %v174_v25 }
  0x31   : > { %v183_v34 = vmul.f32 %v175_v26, %v175_v26  ;;  %v184_v37 = vmul.f32 %v176_v30, %v176_v30  ;;  %v185_v39 = vmul.f32 %v177_v33, %v177_v33  ;;  %v186_v41 = vmul.f32 %v178_v36, %v178_v36 }
  0x32   : > { %v187_v32 = vadd.f32 %v180_v28, %v179_v27 }
  0x34   : > { %v188_v35 = vadd.f32 %v187_v32, %v181_v29 }
  0x36   : > { %v189_v38 = vadd.f32 %v188_v35, %v182_v31 }
  0x38   : > { %v190_v40 = vadd.f32 %v189_v38, %v183_v34 }
  0x3a   : > { %v191_v42 = vadd.f32 %v190_v40, %v184_v37 }
  0x3c   : > { %v192_v43 = vadd.f32 %v191_v42, %v185_v39 }
  0x3e   : > { %v193_v44 = vadd.f32 %v192_v43, %v186_v41 }
  0x40   : > { %v194_v45 = vrot.slane %v193_v44, 4 }
  0x42   : > { %v195_v46 = vadd.f32 %v194_v45, %v193_v44 }
  0x44   : > { %v196_v47 = vrot.slane %v195_v46, 2 }
  0x46   : > { %v197_v48 = vadd.f32 %v196_v47, %v195_v46 }
  0x48   : > { %v198_v49 = vrot.slane %v197_v48, 1 }
  0x4a   : > { %v199_v50 = vadd.f32 %v198_v49, %v197_v48 }
  0x4c   : > { %v200_v51 = vmul.f32 0.015625, %v199_v50 }
  0x4e   : > { %v201_v52 = vadd.f32 1e-05, %v200_v51 }
  0x50   : > { %434 = vrsqrt.f32 %v201_v52 }
  0x5a   : > { %v435_v53 = vpop.eup %434 }
  0x5b   : > { %v203_v54 = vmul.f32 %v435_v53, %v171_v22  ;;  %v204_v55 = vmul.f32 %v435_v53, %v172_v23  ;;  %v205_v56 = vmul.f32 %v435_v53, %v173_v24  ;;  %v206_v57 = vmul.f32 %v435_v53, %v174_v25 }
  0x5c   : > { %v207_v58 = vmul.f32 %v435_v53, %v175_v26  ;;  %v208_v59 = vmul.f32 %v435_v53, %v176_v30  ;;  %v209_v60 = vmul.f32 %v435_v53, %v177_v33  ;;  %v210_v61 = vmul.f32 %v435_v53, %v178_v36 }
  0x5d   : > { %vm211_vm0 = vcmp.ge.f32.partialorder %v203_v54, 0.0  ;;  %vm212_vm1 = vcmp.ge.f32.partialorder %v204_v55, 0.0  ;;  %v219_v62 = vmul.f32 0.2, %v203_v54  ;;  %v220_v63 = vmul.f32 0.2, %v204_v55 }
  0x5e   : > { %vm213_vm2 = vcmp.ge.f32.partialorder %v205_v56, 0.0  ;;  %vm214_vm3 = vcmp.ge.f32.partialorder %v206_v57, 0.0  ;;  %v221_v0 = vmul.f32 0.2, %v205_v56  ;;  %v222_v1 = vmul.f32 0.2, %v206_v57 }
  0x5f   : > { %v227_v2 = vsel %vm211_vm0, %v203_v54, %v219_v62  ;;  %v228_v3 = vsel %vm212_vm1, %v204_v55, %v220_v63  ;;  %vm215_vm4 = vcmp.ge.f32.partialorder %v207_v58, 0.0  ;;  %vm216_vm5 = vcmp.ge.f32.partialorder %v208_v59, 0.0 }
  0x60   : > { %v390_v4 = vpack.c.bf16 %v228_v3, %v227_v2  ;;  %v229_v5 = vsel %vm213_vm2, %v205_v56, %v221_v0  ;;  %v230_v6 = vsel %vm214_vm3, %v206_v57, %v222_v1  ;;  %v223_v7 = vmul.f32 0.2, %v207_v58 }
  0x61   : > { %v395_v8 = vpack.c.bf16 %v230_v6, %v229_v5  ;;  %v224_v9 = vmul.f32 0.2, %v208_v59  ;;  %vm217_vm6 = vcmp.ge.f32.partialorder %v209_v60, 0.0  ;;  %vm218_vm7 = vcmp.ge.f32.partialorder %v210_v61, 0.0 }
  0x62   : > { %391 = vst [vmem:[%s147_s17] sm:$0xff] %v390_v4   ;;  %v231_v10 = vsel %vm215_vm4, %v207_v58, %v223_v7  ;;  %v225_v11 = vmul.f32 0.2, %v209_v60  ;;  %v226_v12 = vmul.f32 0.2, %v210_v61 }
  0x63   : > { %407 = vst [vmem:[%s147_s17 + $0x8] sm:$0xff] %v395_v8   ;;  %v232_v13 = vsel %vm216_vm5, %v208_v59, %v224_v9 }
  0x64   : > { %v400_v14 = vpack.c.bf16 %v232_v13, %v231_v10  ;;  %v233_v15 = vsel %vm217_vm6, %v209_v60, %v225_v11  ;;  %v234_v16 = vsel %vm218_vm7, %v210_v61, %v226_v12 }
  0x65   : > { %v405_v17 = vpack.c.bf16 %v234_v16, %v233_v15 }
  0x66   : > { %408 = vst [vmem:[%s147_s17 + $0x10] sm:$0xff] %v400_v14  }
  0x67   : > { %409 = vst [vmem:[%s147_s17 + $0x18] sm:$0xff] %v405_v17  }
  0x68 PF: > { %s11_s8 = sadd.s32 1, %s458_s8   ;;  %s509_s6 = smov %s454_s7 }
  0x69   : > { %p8_p5 = scmp.ge.s32.totalorder %s11_s8, 4   ;;  %s510_s7 = smov %s512_s9 }
  0x6b   :  { %10 = sbr.rel (!%p8_p5) target bundleno = 2 (0x2), region = 54 }

// kernel: patch_discriminator.11
= control target key start
LH: loop header
LB: loop body
LE: loop exit
PB: predicated region body
PF: predicated region fallthrough
CT: control target
= control target key end

     0   :  { %s1268_s9 = smov 0   ;;  %s1270_s10 = smov 0   ;;  %s1435_s0 = inlined_call_operand.vmem [shape: bf16[32,2048], index: 0, kind: input, shape index: {}]   ;;  %s1436_s1 = inlined_call_operand.vmem [shape: bf16[2048,256], index: 1, kind: input, shape index: {}]   ;;  %s1437_s2 = inlined_call_operand.vmem [shape: f32[32,256], index: 2, kind: output, shape index: {}]  }
   0x1   :  { %s1272_s11 = smov 0   ;;  %s1274_s12 = smov 0  }
   0x2   :  { %s1276_s13 = smov 0  }
   0x3 LB: > { %s24_s14 = sadd.s32 1, %s1246_s12  ;;  %p47_p1 = scmp.ne.s32.totalorder %s1238_s10, %s1234_s9  ;;  %s1250_s13 = sphi %s1276_s13, %s12_s13   ;;  %s1246_s12 = sphi %s1274_s12, %s1441_s12   ;;  %s1242_s11 = sphi %s1272_s11, %s1440_s11   ;;  %s1238_s10 = sphi %s1270_s10, %s1439_s10   ;;  %s1234_s9 = sphi %s1268_s9, %s1438_s9  }
   0x4   : > { %p25_p0 = scmp.ge.s32.totalorder %s24_s14, 4  ;;  %p48_p2 = scmp.eq.s32.totalorder %s1250_s13, 0 }
   0x5   : > { %s40_s16 = sadd.s32 1, %s1238_s10  ;;  %p966_p5 = scmp.ge.s32.totalorder %s1250_s13, 4 }
   0x6   : > { %s1443_s14 = smov (%p25_p0, %s24_s14), 0  ;;  %p49_p3 = por %p48_p2, %p47_p1 }
   0x7   : > { %s36_s15 = ssub.s32 %s1246_s12, %s1443_s14  ;;  %129 = sbr.rel (%p966_p5) target bundleno = 22 (0x16), region = 16 }
   0x8   : > { %p38_p4 = scmp.eq.s32.totalorder %s36_s15, 0 }
   0xa   : > { %s1303_s17 = scalar_select %p38_p4, %s1238_s10, %s40_s16  }
   0xe   : > { %132 = sbr.rel (!%p49_p3) target bundleno = 22 (0x16), region = 20  ;;  %s134_s18 = sand.u32 (%p49_p3), 1, %s1238_s10  }
   0xf   : > { %s1053_s19 = sshll.u32 (%p49_p3), %s1246_s12, 4  ;;  %s967_s20 = sshll.u32 (%p49_p3), %s134_s18, 6 }
  0x10   : > { %s142_s23 = scalar_lea.vmem (%p49_p3), %s1435_s0, %s1053_s19  ;;  %s136_s24 = scalar_lea.vmem (%p49_p3), [#allocation3], %s967_s20 }
  0x11   : > { %v155_v0 = vld [vmem:[%s142_s23] sm:$0xff] (%p49_p3)  ;;  %v157_v1 = vld [vmem:[%s142_s23 + $0x8] sm:$0xff] (%p49_p3) }
  0x12   : > { %v159_v2 = vld [vmem:[%s142_s23 + $0x40] sm:$0xff] (%p49_p3)  ;;  %156 = vst [vmem:[%s136_s24] sm:$0xff] (%p49_p3), %v155_v0  ;;  %158 = vst [vmem:[%s136_s24 + $0x8] sm:$0xff] (%p49_p3), %v157_v1  ;;  %v161_v3 = vld [vmem:[%s142_s23 + $0x48] sm:$0xff] (%p49_p3) }
  0x13   : > { %160 = vst [vmem:[%s136_s24 + $0x10] sm:$0xff] (%p49_p3), %v159_v2  ;;  %v163_v4 = vld [vmem:[%s142_s23 + $0x80] sm:$0xff] (%p49_p3)  ;;  %v165_v5 = vld [vmem:[%s142_s23 + $0x88] sm:$0xff] (%p49_p3)  ;;  %162 = vst [vmem:[%s136_s24 + $0x18] sm:$0xff] (%p49_p3), %v161_v3 }
  0x14   : > { %164 = vst [vmem:[%s136_s24 + $0x20] sm:$0xff] (%p49_p3), %v163_v4  ;;  %166 = vst [vmem:[%s136_s24 + $0x28] sm:$0xff] (%p49_p3), %v165_v5  ;;  %v167_v6 = vld [vmem:[%s142_s23 + $0xc0] sm:$0xff] (%p49_p3)  ;;  %v169_v7 = vld [vmem:[%s142_s23 + $0xc8] sm:$0xff] (%p49_p3) }
  0x15   : > { %168 = vst [vmem:[%s136_s24 + $0x30] sm:$0xff] %v167_v6  ;;  %170 = vst [vmem:[%s136_s24 + $0x38] sm:$0xff] %v169_v7 }
  0x16 PF: > { %p970_p6 = scmp.ge.s32.totalorder %s1250_s13, 1  ;;  %p190_p7 = scmp.lt.s32.totalorder %s1250_s13, 5 }
  0x18   : > { %p191_p8 = pnand %p970_p6, %p190_p7 }
  0x19   : > { %s197_s25 = sand.u32 (!%p191_p8), 1, %s1234_s9   ;;  %s972_s26 = sshll.u32 (!%p191_p8), %s1242_s11, 6 }
  0x1a   : > { %194 = sbr.rel (%p191_p8) target bundleno = 342 (0x156), region = 47  ;;  %s971_s27 = sshll.u32 (!%p191_p8), %s197_s25, 6 }
  0x1b   : > { %p237_p9 = scmp.lt.s32.totalorder (!%p191_p8), %s972_s26, 255  ;;  %s1320_s4 = scalar_lea.vmem (!%p191_p8), [#allocation3], %s971_s27 }
  0x1c   : > { %p975_p10 = scmp.ne.s32.totalorder (!%p191_p8), %s1242_s11, 0 }
  0x21   : > { %s1445_s26 = smov (!%p237_p9, %s972_s26), 255  ;;  %262 = sbr.rel (%p975_p10) target bundleno = 40 (0x28), region = 55 }
  0x22   : > { %s1054_s28 = sshll.u32 %s1445_s26, 3  ;;  %v1252_v8 = vmov (!%p975_p10), 0.0  }
  0x23   : > { %s1318_s3 = scalar_lea.vmem %s1436_s1, %s1054_s28  ;;  %263 = vst [vmem:[#allocation2] sm:$0xff] (!%p975_p10), %v1252_v8  ;;  %264 = vst [vmem:[#allocation2 + $0x8] sm:$0xff] (!%p975_p10), %v1252_v8 }
  0x24   : > { %265 = vst [vmem:[#allocation2 + $0x10] sm:$0xff] (!%p975_p10), %v1252_v8  ;;  %266 = vst [vmem:[#allocation2 + $0x18] sm:$0xff] (!%p975_p10), %v1252_v8 }
  0x25   : > { %267 = vst [vmem:[#allocation2 + $0x20] sm:$0xff] (!%p975_p10), %v1252_v8  ;;  %268 = vst [vmem:[#allocation2 + $0x28] sm:$0xff] (!%p975_p10), %v1252_v8 }
  0x26   : > { %269 = vst [vmem:[#allocation2 + $0x30] sm:$0xff] (!%p975_p10), %v1252_v8  ;;  %270 = vst [vmem:[#allocation2 + $0x38] sm:$0xff] (!%p975_p10), %v1252_v8 }
  0x28 PF: > { %v1104_v9 = vld [vmem:[%s1318_s3 + $0x4] ss:$8 sps:$4 sm:$0xff]   ;;  %v1108_v11 = vld [vmem:[%s1318_s3] ss:$8 sps:$4 sm:$0xff]   ;;  %v1110_v13 = vld [vmem:[%s1318_s3 + $0x14] ss:$8 sps:$4 sm:$0xff]  }
  0x29   : > { %v1106_v10 = vld [vmem:[%s1318_s3 + $0x104] ss:$8 sps:$4 sm:$0xff]   ;;  %711 = vmatprep.subr.bf16.mxu1 %v1104_v9  ;;  %v1109_v12 = vld [vmem:[%s1318_s3 + $0x100] ss:$8 sps:$4 sm:$0xff]   ;;  %v1112_v14 = vld [vmem:[%s1318_s3 + $0x114] ss:$8 sps:$4 sm:$0xff]  }
  0x2a   : > { %764 = vmatprep.subr.bf16.mxu0 %v1106_v10  ;;  %712 = vmatpush1.bf16.msra.mxu1 %v1108_v11  ;;  %v1114_v15 = vld [vmem:[%s1318_s3 + $0x10] ss:$8 sps:$4 sm:$0xff]   ;;  %v1116_v17 = vld [vmem:[%s1318_s3 + $0x24] ss:$8 sps:$4 sm:$0xff]   ;;  %v1120_v19 = vld [vmem:[%s1318_s3 + $0x20] ss:$8 sps:$4 sm:$0xff]  }
  0x2b   : > { %765 = vmatpush1.bf16.msra.mxu0 %v1109_v12  ;;  %713 = vmatprep.subr.bf16.mxu1 %v1110_v13  ;;  %v1115_v16 = vld [vmem:[%s1318_s3 + $0x110] ss:$8 sps:$4 sm:$0xff]   ;;  %v1118_v18 = vld [vmem:[%s1318_s3 + $0x124] ss:$8 sps:$4 sm:$0xff]   ;;  %v1121_v20 = vld [vmem:[%s1318_s3 + $0x120] ss:$8 sps:$4 sm:$0xff]  }
  0x2c   : > { %766 = vmatprep.subr.bf16.mxu0 %v1112_v14  ;;  %v1122_v21 = vld [vmem:[%s1318_s3 + $0x34] ss:$8 sps:$4 sm:$0xff]   ;;  %v1126_v23 = vld [vmem:[%s1318_s3 + $0x30] ss:$8 sps:$4 sm:$0xff]   ;;  %v1128_v25 = vld [vmem:[%s1318_s3 + $0x44] ss:$8 sps:$4 sm:$0xff]  }
  0x2d   : > { %v1124_v22 = vld [vmem:[%s1318_s3 + $0x134] ss:$8 sps:$4 sm:$0xff]   ;;  %v1127_v24 = vld [vmem:[%s1318_s3 + $0x130] ss:$8 sps:$4 sm:$0xff]   ;;  %v1130_v26 = vld [vmem:[%s1318_s3 + $0x144] ss:$8 sps:$4 sm:$0xff]  }
  0x2e   : > { %714 = vmatpush1.bf16.msra.mxu1 %v1114_v15  ;;  %v1132_v27 = vld [vmem:[%s1318_s3 + $0x40] ss:$8 sps:$4 sm:$0xff]   ;;  %v1134_v29 = vld [vmem:[%s1318_s3 + $0x54] ss:$8 sps:$4 sm:$0xff]   ;;  %v1138_v31 = vld [vmem:[%s1318_s3 + $0x50] ss:$8 sps:$4 sm:$0xff]  }
  0x2f   : > { %767 = vmatpush1.bf16.msra.mxu0 %v1115_v16  ;;  %715 = vmatprep.subr.bf16.mxu1 %v1116_v17  ;;  %v1133_v28 = vld [vmem:[%s1318_s3 + $0x140] ss:$8 sps:$4 sm:$0xff]   ;;  %v1136_v30 = vld [vmem:[%s1318_s3 + $0x154] ss:$8 sps:$4 sm:$0xff]   ;;  %v1139_v32 = vld [vmem:[%s1318_s3 + $0x150] ss:$8 sps:$4 sm:$0xff]  }
  0x30   : > { %768 = vmatprep.subr.bf16.mxu0 %v1118_v18  ;;  %v1140_v33 = vld [vmem:[%s1318_s3 + $0x64] ss:$8 sps:$4 sm:$0xff]   ;;  %v1144_v35 = vld [vmem:[%s1318_s3 + $0x60] ss:$8 sps:$4 sm:$0xff]   ;;  %v1146_v37 = vld [vmem:[%s1318_s3 + $0x74] ss:$8 sps:$4 sm:$0xff]  }
  0x31   : > { %v1142_v34 = vld [vmem:[%s1318_s3 + $0x164] ss:$8 sps:$4 sm:$0xff]   ;;  %v1145_v36 = vld [vmem:[%s1318_s3 + $0x160] ss:$8 sps:$4 sm:$0xff]   ;;  %v1148_v38 = vld [vmem:[%s1318_s3 + $0x174] ss:$8 sps:$4 sm:$0xff]  }
  0x32   : > { %716 = vmatpush1.bf16.msra.mxu1 %v1120_v19  ;;  %v1150_v39 = vld [vmem:[%s1318_s3 + $0x70] ss:$8 sps:$4 sm:$0xff]   ;;  %v1152_v41 = vld [vmem:[%s1318_s3 + $0x84] ss:$8 sps:$4 sm:$0xff]   ;;  %v1156_v43 = vld [vmem:[%s1318_s3 + $0x80] ss:$8 sps:$4 sm:$0xff]  }
  0x33   : > { %769 = vmatpush1.bf16.msra.mxu0 %v1121_v20  ;;  %717 = vmatprep.subr.bf16.mxu1 %v1122_v21  ;;  %v1151_v40 = vld [vmem:[%s1318_s3 + $0x170] ss:$8 sps:$4 sm:$0xff]   ;;  %v1154_v42 = vld [vmem:[%s1318_s3 + $0x184] ss:$8 sps:$4 sm:$0xff]   ;;  %v1157_v44 = vld [vmem:[%s1318_s3 + $0x180] ss:$8 sps:$4 sm:$0xff]  }
  0x34   : > { %770 = vmatprep.subr.bf16.mxu0 %v1124_v22  ;;  %v1158_v45 = vld [vmem:[%s1318_s3 + $0x94] ss:$8 sps:$4 sm:$0xff]   ;;  %v1162_v47 = vld [vmem:[%s1318_s3 + $0x90] ss:$8 sps:$4 sm:$0xff]   ;;  %v1164_v49 = vld [vmem:[%s1318_s3 + $0xa4] ss:$8 sps:$4 sm:$0xff]  }
  0x35   : > { %v1160_v46 = vld [vmem:[%s1318_s3 + $0x194] ss:$8 sps:$4 sm:$0xff]   ;;  %v1163_v48 = vld [vmem:[%s1318_s3 + $0x190] ss:$8 sps:$4 sm:$0xff]   ;;  %v1166_v50 = vld [vmem:[%s1318_s3 + $0x1a4] ss:$8 sps:$4 sm:$0xff]  }
  0x36   : > { %718 = vmatpush1.bf16.msra.mxu1 %v1126_v23  ;;  %v1168_v51 = vld [vmem:[%s1318_s3 + $0xa0] ss:$8 sps:$4 sm:$0xff]   ;;  %v1170_v53 = vld [vmem:[%s1318_s3 + $0xb4] ss:$8 sps:$4 sm:$0xff]   ;;  %v1174_v55 = vld [vmem:[%s1318_s3 + $0xb0] ss:$8 sps:$4 sm:$0xff]  }
  0x37   : > { %771 = vmatpush1.bf16.msra.mxu0 %v1127_v24  ;;  %719 = vmatprep.subr.bf16.mxu1 %v1128_v25  ;;  %v1169_v52 = vld [vmem:[%s1318_s3 + $0x1a0] ss:$8 sps:$4 sm:$0xff]   ;;  %v1172_v54 = vld [vmem:[%s1318_s3 + $0x1b4] ss:$8 sps:$4 sm:$0xff]   ;;  %v1175_v56 = vld [vmem:[%s1318_s3 + $0x1b0] ss:$8 sps:$4 sm:$0xff]  }
  0x38   : > { %772 = vmatprep.subr.bf16.mxu0 %v1130_v26  ;;  %v1176_v57 = vld [vmem:[%s1318_s3 + $0xc4] ss:$8 sps:$4 sm:$0xff]   ;;  %v1180_v61 = vld [vmem:[%s1318_s3 + $0xc0] ss:$8 sps:$4 sm:$0xff]   ;;  %v1182_v63 = vld [vmem:[%s1318_s3 + $0xd4] ss:$8 sps:$4 sm:$0xff]  }
  0x39   : > { %v1202_v58 = vld [vmem:[%s1320_s4 + $0x4] ss:$16 sps:$4 sm:$0xff]   ;;  %v1205_v60 = vld [vmem:[%s1320_s4 + $0xc] ss:$16 sps:$4 sm:$0xff]   ;;  %v1181_v62 = vld [vmem:[%s1318_s3 + $0x1c0] ss:$8 sps:$4 sm:$0xff]  }
  0x3a   : > { %720 = vmatpush1.bf16.msra.mxu1 %v1132_v27  ;;  %v1178_v59 = vld [vmem:[%s1318_s3 + $0x1c4] ss:$8 sps:$4 sm:$0xff]   ;;  %743 = vmatprep.mubr.bf16.mxu1 %v1202_v58  ;;  %v1184_v0 = vld [vmem:[%s1318_s3 + $0x1d4] ss:$8 sps:$4 sm:$0xff]   ;;  %v1186_v1 = vld [vmem:[%s1318_s3 + $0xd0] ss:$8 sps:$4 sm:$0xff]  }
  0x3b   : > { %773 = vmatpush1.bf16.msra.mxu0 %v1133_v28  ;;  %721 = vmatprep.subr.bf16.mxu1 %v1134_v29  ;;  %v1187_v2 = vld [vmem:[%s1318_s3 + $0x1d0] ss:$8 sps:$4 sm:$0xff]   ;;  %v1188_v3 = vld [vmem:[%s1318_s3 + $0xe4] ss:$8 sps:$4 sm:$0xff]   ;;  %v1192_v5 = vld [vmem:[%s1318_s3 + $0xe0] ss:$8 sps:$4 sm:$0xff]  }
  0x3c   : > { %774 = vmatprep.subr.bf16.mxu0 %v1136_v30  ;;  %796 = vmatprep.mubr.bf16.mxu0 %v1205_v60  ;;  %v1190_v4 = vld [vmem:[%s1318_s3 + $0x1e4] ss:$8 sps:$4 sm:$0xff]   ;;  %v1193_v6 = vld [vmem:[%s1318_s3 + $0x1e0] ss:$8 sps:$4 sm:$0xff]   ;;  %v1194_v7 = vld [vmem:[%s1318_s3 + $0xf4] ss:$8 sps:$4 sm:$0xff]  }
  0x3d   : > { %v1196_v8 = vld [vmem:[%s1318_s3 + $0x1f4] ss:$8 sps:$4 sm:$0xff]   ;;  %v1198_v9 = vld [vmem:[%s1318_s3 + $0xf0] ss:$8 sps:$4 sm:$0xff]   ;;  %v271_v18 = vld [vmem:[#allocation2] sm:$0xff]  ;;  %p1048_p11 = scmp.ne.s32.totalorder %s1242_s11, 3 }
  0x3e   : > { %722 = vmatpush1.bf16.msra.mxu1 %v1138_v31  ;;  %v1199_v10 = vld [vmem:[%s1318_s3 + $0x1f0] ss:$8 sps:$4 sm:$0xff]   ;;  %v1206_v13 = vld [vmem:[%s1320_s4 + $0x24] ss:$16 sps:$4 sm:$0xff]   ;;  %v1208_v14 = vld [vmem:[%s1320_s4 + $0x2c] ss:$16 sps:$4 sm:$0xff]  }
  0x3f   : > { %775 = vmatpush1.bf16.msra.mxu0 %v1139_v32  ;;  %723 = vmatprep.subr.bf16.mxu1 %v1140_v33  ;;  %v1200_v11 = vld [vmem:[%s1320_s4] ss:$16 sps:$4 sm:$0xff]   ;;  %v1203_v12 = vld [vmem:[%s1320_s4 + $0x8] ss:$16 sps:$4 sm:$0xff]  }
  0x40   : > { %776 = vmatprep.subr.bf16.mxu0 %v1142_v34  ;;  %v1210_v15 = vld [vmem:[%s1320_s4 + $0x20] ss:$16 sps:$4 sm:$0xff]   ;;  %v1211_v16 = vld [vmem:[%s1320_s4 + $0x28] ss:$16 sps:$4 sm:$0xff]  }
  0x41   : > { %v272_v22 = vld [vmem:[#allocation2 + $0x8] sm:$0xff]  ;;  %v273_v26 = vld [vmem:[#allocation2 + $0x10] sm:$0xff]  ;;  %v274_v31 = vld [vmem:[#allocation2 + $0x18] sm:$0xff] }
  0x42   : > { %724 = vmatpush1.bf16.msra.mxu1 %v1144_v35 }
  0x43   : > { %777 = vmatpush1.bf16.msra.mxu0 %v1145_v36  ;;  %725 = vmatprep.subr.bf16.mxu1 %v1146_v37 }
  0x44   : > { %778 = vmatprep.subr.bf16.mxu0 %v1148_v38  ;;  %v275_v38 = vld [vmem:[#allocation2 + $0x20] sm:$0xff] }
  0x46   : > { %726 = vmatpush1.bf16.msra.mxu1 %v1150_v39 }
  0x47   : > { %779 = vmatpush1.bf16.msra.mxu0 %v1151_v40  ;;  %727 = vmatprep.subr.bf16.mxu1 %v1152_v41 }
  0x48   : > { %780 = vmatprep.subr.bf16.mxu0 %v1154_v42  ;;  %v276_v42 = vld [vmem:[#allocation2 + $0x28] sm:$0xff] }
  0x4a   : > { %728 = vmatpush1.bf16.msra.mxu1 %v1156_v43 }
  0x4b   : > { %781 = vmatpush1.bf16.msra.mxu0 %v1157_v44  ;;  %729 = vmatprep.subr.bf16.mxu1 %v1158_v45 }
  0x4c   : > { %782 = vmatprep.subr.bf16.mxu0 %v1160_v46  ;;  %v277_v46 = vld [vmem:[#allocation2 + $0x30] sm:$0xff] }
  0x4e   : > { %730 = vmatpush1.bf16.msra.mxu1 %v1162_v47 }
  0x4f   : > { %783 = vmatpush1.bf16.msra.mxu0 %v1163_v48  ;;  %731 = vmatprep.subr.bf16.mxu1 %v1164_v49 }
  0x50   : > { %784 = vmatprep.subr.bf16.mxu0 %v1166_v50 }
  0x52   : > { %732 = vmatpush1.bf16.msra.mxu1 %v1168_v51  ;;  %v278_v51 = vld [vmem:[#allocation2 + $0x38] sm:$0xff] }
  0x53   : > { %785 = vmatpush1.bf16.msra.mxu0 %v1169_v52  ;;  %733 = vmatprep.subr.bf16.mxu1 %v1170_v53 }
  0x54   : > { %786 = vmatprep.subr.bf16.mxu0 %v1172_v54 }
  0x56   : > { %734 = vmatpush1.bf16.msra.mxu1 %v1174_v55 }
  0x57   : > { %787 = vmatpush1.bf16.msra.mxu0 %v1175_v56  ;;  %735 = vmatprep.subr.bf16.mxu1 %v1176_v57 }
  0x58   : > { %788 = vmatprep.subr.bf16.mxu0 %v1178_v59 }
  0x5a   : > { %736 = vmatpush1.bf16.msra.mxu1 %v1180_v61 }
  0x5b   : > { %789 = vmatpush1.bf16.msra.mxu0 %v1181_v62  ;;  %737 = vmatprep.subr.bf16.mxu1 %v1182_v63 }
  0x5c   : > { %790 = vmatprep.subr.bf16.mxu0 %v1184_v0 }
  0x5e   : > { %738 = vmatpush1.bf16.msra.mxu1 %v1186_v1 }
  0x5f   : > { %791 = vmatpush1.bf16.msra.mxu0 %v1187_v2  ;;  %739 = vmatprep.subr.bf16.mxu1 %v1188_v3 }
  0x60   : > { %792 = vmatprep.subr.bf16.mxu0 %v1190_v4 }
  0x62   : > { %740 = vmatpush1.bf16.msra.mxu1 %v1192_v5 }
  0x63   : > { %793 = vmatpush1.bf16.msra.mxu0 %v1193_v6  ;;  %741 = vmatprep.subr.bf16.mxu1 %v1194_v7 }
  0x64   : > { %794 = vmatprep.subr.bf16.mxu0 %v1196_v8 }
  0x66   : > { %742 = vmatpush1.bf16.msra.mxu1 %v1198_v9 }
  0x67   : > { %795 = vmatpush1.bf16.msra.mxu0 %v1199_v10 }
  0x69   : > { %744 = vmatmul.mubr.bf16.vlgmr.msra.gmra.mrb[0].mxu1 %v1200_v11 }
  0x6a   : > { %797 = vmatmul.mubr.bf16.vlgmr.msra.gmra.mrb[0].mxu0 %v1203_v12  ;;  %753 = vmatprep.mubr.bf16.mxu1 %v1206_v13 }
  0x6b   : > { %806 = vmatprep.mubr.bf16.mxu0 %v1208_v14 }
  0x71   : > { %754 = vmatmul.mubr.bf16.gmra.mrb[4].mxu1 %v1210_v15 }
  0x72   : > { %807 = vmatmul.mubr.bf16.gmra.mrb[4].mxu0 %v1211_v16 }
 0x13c   : > { %v745_v17 = vpop.f32.mrb[0].mxu1 }
 0x13d   : > { %v798_v19 = vpop.f32.mrb[0].mxu0  ;;  %v747_v21 = vpop.f32.mrb[1].mxu1 }
 0x13e   : > { %v799_v20 = vadd.f32 %v798_v19, %v745_v17  ;;  %v800_v23 = vpop.f32.mrb[1].mxu0  ;;  %v749_v25 = vpop.f32.mrb[2].mxu1 }
 0x13f   : > { %v801_v24 = vadd.f32 %v800_v23, %v747_v21  ;;  %v802_v27 = vpop.f32.mrb[2].mxu0  ;;  %v751_v30 = vpop.f32.mrb[3].mxu1 }
 0x140   : > { %v817_v28 = vadd.f32 %v799_v20, %v271_v18  ;;  %v803_v29 = vadd.f32 %v802_v27, %v749_v25  ;;  %v804_v32 = vpop.f32.mrb[3].mxu0 }
 0x141   : > { %v818_v33 = vadd.f32 %v801_v24, %v272_v22  ;;  %v805_v34 = vadd.f32 %v804_v32, %v751_v30 }
 0x142   : > { %825 = vst [vmem:[#allocation2] sm:$0xff] %v817_v28  ;;  %v819_v35 = vadd.f32 %v803_v29, %v273_v26 }
 0x143   : > { %826 = vst [vmem:[#allocation2 + $0x8] sm:$0xff] %v818_v33  ;;  %v820_v36 = vadd.f32 %v805_v34, %v274_v31 }
 0x144   : > { %827 = vst [vmem:[#allocation2 + $0x10] sm:$0xff] %v819_v35  ;;  %v755_v37 = vpop.f32.mrb[4].mxu1 }
 0x145   : > { %828 = vst [vmem:[#allocation2 + $0x18] sm:$0xff] %v820_v36  ;;  %v808_v39 = vpop.f32.mrb[4].mxu0  ;;  %v757_v41 = vpop.f32.mrb[5].mxu1 }
 0x146   : > { %v809_v40 = vadd.f32 %v808_v39, %v755_v37  ;;  %v810_v43 = vpop.f32.mrb[5].mxu0  ;;  %v759_v45 = vpop.f32.mrb[6].mxu1 }
 0x147   : > { %v811_v44 = vadd.f32 %v810_v43, %v757_v41  ;;  %v812_v47 = vpop.f32.mrb[6].mxu0  ;;  %v761_v50 = vpop.f32.mrb[7].mxu1  ;;  %836 = sbr.rel (%p1048_p11) target bundleno = 342 (0x156), region = 59 }
 0x148   : > { %v821_v48 = vadd.f32 %v809_v40, %v275_v38  ;;  %v813_v49 = vadd.f32 %v812_v47, %v759_v45  ;;  %v814_v52 = vpop.f32.mrb[7].mxu0 }
 0x149   : > { %v822_v53 = vadd.f32 %v811_v44, %v276_v42  ;;  %v815_v54 = vadd.f32 %v814_v52, %v761_v50  ;;  %v837_v57 = vld [vmem:[#allocation2] sm:$0xff] (!%p1048_p11) }
 0x14a   : > { %829 = vst [vmem:[#allocation2 + $0x20] sm:$0xff] %v821_v48  ;;  %v823_v55 = vadd.f32 %v813_v49, %v277_v46  ;;  %v838_v58 = vld [vmem:[#allocation2 + $0x8] sm:$0xff] (!%p1048_p11)  ;;  %845 = vst [vmem:[%s1437_s2] sm:$0xff] (!%p1048_p11), %v837_v57 }
 0x14b   : > { %830 = vst [vmem:[#allocation2 + $0x28] sm:$0xff] %v822_v53  ;;  %v824_v56 = vadd.f32 %v815_v54, %v278_v51  ;;  %v839_v59 = vld [vmem:[#allocation2 + $0x10] sm:$0xff] (!%p1048_p11)  ;;  %846 = vst [vmem:[%s1437_s2 + $0x8] sm:$0xff] (!%p1048_p11), %v838_v58 }
 0x14c   : > { %831 = vst [vmem:[#allocation2 + $0x30] sm:$0xff] %v823_v55  ;;  %847 = vst [vmem:[%s1437_s2 + $0x10] sm:$0xff] (!%p1048_p11), %v839_v59  ;;  %v840_v60 = vld [vmem:[#allocation2 + $0x18] sm:$0xff] (!%p1048_p11) }
 0x14d   : > { %832 = vst [vmem:[#allocation2 + $0x38] sm:$0xff] %v824_v56  ;;  %848 = vst [vmem:[%s1437_s2 + $0x18] sm:$0xff] (!%p1048_p11), %v840_v60 }
 0x151   : > { %v841_v61 = vld [vmem:[#allocation2 + $0x20] sm:$0xff] }
 0x152   : > { %v842_v62 = vld [vmem:[#allocation2 + $0x28] sm:$0xff]  ;;  %849 = vst [vmem:[%s1437_s2 + $0x20] sm:$0xff] %v841_v61 }
 0x153   : > { %850 = vst [vmem:[%s1437_s2 + $0x28] sm:$0xff] %v842_v62  ;;  %v843_v63 = vld [vmem:[#allocation2 + $0x30] sm:$0xff] }
 0x154   : > { %v844_v0 = vld [vmem:[#allocation2 + $0x38] sm:$0xff]  ;;  %851 = vst [vmem:[%s1437_s2 + $0x30] sm:$0xff] %v843_v63 }
 0x155   : > { %852 = vst [vmem:[%s1437_s2 + $0x38] sm:$0xff] %v844_v0 }
 0x156 PF: > { %s12_s13 = sadd.s32 1, %s1250_s13   ;;  %s1438_s9 = smov %s1238_s10 }
 0x157   : > { %p9_p12 = scmp.ge.s32.totalorder %s12_s13, 6   ;;  %s1439_s10 = smov %s1303_s17 }
 0x158   : > { %s1440_s11 = smov %s1246_s12  ;;  %s1441_s12 = smov %s1443_s14 }
 0x159   :  { %11 = sbr.rel (!%p9_p12) target bundleno = 3 (0x3), region = 97 }

// kernel: patch_discriminator.12
= control target key start
LH: loop header
LB: loop body
LE: loop exit
PB: predicated region body
PF: predicated region fallthrough
CT: control target
= control target key end

     0   :  { %s401_s6 = smov 0   ;;  %s403_s7 = smov 0   ;;  %s438_s0 = inlined_call_operand.vmem [shape: f32[2,16,256], index: 0, kind: input, shape index: {}]   ;;  %s439_s1 = inlined_call_operand.vmem [shape: bf16[2,16,256], index: 1, kind: output, shape index: {}]  }
   0x1   :  { %s405_s8 = smov 0  }
   0x2 LB: > { %s23_s9 = sadd.s32 1, %s385_s7  ;;  %p326_p0 = scmp.ge.s32.totalorder %s389_s8, 1  ;;  %s389_s8 = sphi %s405_s8, %s11_s8   ;;  %s385_s7 = sphi %s403_s7, %s441_s7   ;;  %s381_s6 = sphi %s401_s6, %s440_s6  }
   0x3   : > { %p25_p1 = scmp.ge.s32.totalorder %s23_s9, 2  ;;  %p108_p2 = scmp.lt.s32.totalorder %s389_s8, 3 }
   0x5   : > { %s443_s9 = smov (%p25_p1, %s23_s9), 0  ;;  %p109_p3 = pnand %p326_p0, %p108_p2 }
   0x6   : > { %p137_p4 = scmp.lt.s32.totalorder (!%p109_p3), %s381_s6, 1 }
   0x7   : > { %112 = sbr.rel (%p109_p3) target bundleno = 76 (0x4c), region = 24 }
   0xe   : > { %s445_s6 = smov (!%p137_p4, %s381_s6), 1 }
   0xf   : > { %s335_s10 = sshll.u32 %s445_s6, 5  ;;  %s336_s14 = sshll.u32 %s445_s6, 4 }
  0x10   : > { %s144_s13 = scalar_lea.vmem %s438_s0, %s335_s10  ;;  %s154_s17 = scalar_lea.vmem %s439_s1, %s336_s14 }
  0x11   : > { %v156_v0 = vld [vmem:[%s144_s13] sm:$0xff]  ;;  %v157_v1 = vld [vmem:[%s144_s13 + $0x8] sm:$0xff]  ;;  %v158_v2 = vld [vmem:[%s144_s13 + $0x10] sm:$0xff] }
  0x12   : > { %v159_v3 = vld [vmem:[%s144_s13 + $0x18] sm:$0xff]  ;;  %v160_v4 = vadd.f32 %v158_v2, %v156_v0 }
  0x13   : > { %v167_v5 = vadd.f32 %v159_v3, %v157_v1 }
  0x14   : > { %v161_v6 = vrot.slane %v160_v4, 4 }
  0x15   : > { %v168_v7 = vrot.slane %v167_v5, 4 }
  0x16   : > { %v162_v8 = vadd.f32 %v161_v6, %v160_v4 }
  0x17   : > { %v169_v9 = vadd.f32 %v168_v7, %v167_v5 }
  0x18   : > { %v163_v10 = vrot.slane %v162_v8, 2 }
  0x19   : > { %v170_v11 = vrot.slane %v169_v9, 2 }
  0x1a   : > { %v164_v12 = vadd.f32 %v163_v10, %v162_v8 }
  0x1b   : > { %v171_v13 = vadd.f32 %v170_v11, %v169_v9 }
  0x1c   : > { %v165_v14 = vrot.slane %v164_v12, 1 }
  0x1d   : > { %v172_v15 = vrot.slane %v171_v13, 1 }
  0x1e   : > { %v166_v16 = vadd.f32 %v165_v14, %v164_v12 }
  0x1f   : > { %v173_v17 = vadd.f32 %v172_v15, %v171_v13 }
  0x20   : > { %v175_v18 = vmul.f32 0.0625, %v166_v16 }
  0x21   : > { %v176_v19 = vmul.f32 0.0625, %v173_v17 }
  0x22   : > { %v177_v20 = vsub.f32 %v156_v0, %v175_v18  ;;  %v179_v21 = vsub.f32 %v158_v2, %v175_v18 }
  0x23   : > { %v178_v22 = vsub.f32 %v157_v1, %v176_v19  ;;  %v180_v23 = vsub.f32 %v159_v3, %v176_v19 }
  0x24   : > { %v181_v24 = vmul.f32 %v177_v20, %v177_v20  ;;  %v183_v25 = vmul.f32 %v179_v21, %v179_v21 }
  0x25   : > { %v182_v26 = vmul.f32 %v178_v22, %v178_v22  ;;  %v184_v27 = vmul.f32 %v180_v23, %v180_v23 }
  0x26   : > { %v185_v28 = vadd.f32 %v183_v25, %v181_v24 }
  0x27   : > { %v192_v29 = vadd.f32 %v184_v27, %v182_v26 }
  0x28   : > { %v186_v30 = vrot.slane %v185_v28, 4 }
  0x29   : > { %v193_v31 = vrot.slane %v192_v29, 4 }
  0x2a   : > { %v187_v32 = vadd.f32 %v186_v30, %v185_v28 }
  0x2b   : > { %v194_v33 = vadd.f32 %v193_v31, %v192_v29 }
  0x2c   : > { %v188_v34 = vrot.slane %v187_v32, 2 }
  0x2d   : > { %v195_v35 = vrot.slane %v194_v33, 2 }
  0x2e   : > { %v189_v36 = vadd.f32 %v188_v34, %v187_v32 }
  0x2f   : > { %v196_v37 = vadd.f32 %v195_v35, %v194_v33 }
  0x30   : > { %v190_v38 = vrot.slane %v189_v36, 1 }
  0x31   : > { %v197_v39 = vrot.slane %v196_v37, 1 }
  0x32   : > { %v191_v40 = vadd.f32 %v190_v38, %v189_v36 }
  0x33   : > { %v198_v41 = vadd.f32 %v197_v39, %v196_v37 }
  0x34   : > { %v199_v42 = vmul.f32 0.0625, %v191_v40 }
  0x35   : > { %v200_v43 = vmul.f32 0.0625, %v198_v41 }
  0x36   : > { %v201_v44 = vadd.f32 1e-05, %v199_v42 }
  0x37   : > { %v202_v45 = vadd.f32 1e-05, %v200_v43 }
  0x38   : > { %363 = vrsqrt.f32 %v201_v44 }
  0x39   : > { %365 = vrsqrt.f32 %v202_v45 }
  0x42   : > { %v364_v46 = vpop.eup %363 }
  0x43   : > { %v366_v47 = vpop.eup %365  ;;  %v205_v48 = vmul.f32 %v364_v46, %v177_v20  ;;  %v207_v49 = vmul.f32 %v364_v46, %v179_v21 }
  0x44   : > { %v206_v50 = vmul.f32 %v366_v47, %v178_v22  ;;  %v208_v51 = vmul.f32 %v366_v47, %v180_v23 }
  0x45   : > { %vm209_vm0 = vcmp.ge.f32.partialorder %v205_v48, 0.0  ;;  %v213_v52 = vmul.f32 0.2, %v205_v48  ;;  %vm211_vm1 = vcmp.ge.f32.partialorder %v207_v49, 0.0  ;;  %v215_v53 = vmul.f32 0.2, %v207_v49 }
  0x46   : > { %vm210_vm2 = vcmp.ge.f32.partialorder %v206_v50, 0.0  ;;  %v214_v54 = vmul.f32 0.2, %v206_v50  ;;  %vm212_vm3 = vcmp.ge.f32.partialorder %v208_v51, 0.0  ;;  %v216_v55 = vmul.f32 0.2, %v208_v51 }
  0x47   : > { %v217_v56 = vsel %vm209_vm0, %v205_v48, %v213_v52  ;;  %v219_v57 = vsel %vm211_vm1, %v207_v49, %v215_v53 }
  0x48   : > { %v218_v58 = vsel %vm210_vm2, %v206_v50, %v214_v54  ;;  %v220_v59 = vsel %vm212_vm3, %v208_v51, %v216_v55 }
  0x49   : > { %v337_v60 = vpack.c.bf16 %v218_v58, %v217_v56  ;;  %v338_v61 = vpack.c.bf16 %v220_v59, %v219_v57 }
  0x4b   : > { %233 = vst [vmem:[%s154_s17] sm:$0xff] %v337_v60  ;;  %234 = vst [vmem:[%s154_s17 + $0x8] sm:$0xff] %v338_v61 }
  0x4c PF: > { %s11_s8 = sadd.s32 1, %s389_s8   ;;  %s440_s6 = smov %s385_s7 }
  0x4d   : > { %p8_p5 = scmp.ge.s32.totalorder %s11_s8, 4   ;;  %s441_s7 = smov %s443_s9 }
  0x4f   :  { %10 = sbr.rel (!%p8_p5) target bundleno = 2 (0x2), region = 54 }

// kernel: patch_discriminator.13
= control target key start
LH: loop header
LB: loop body
LE: loop exit
PB: predicated region body
PF: predicated region fallthrough
CT: control target
= control target key end

     0   :  { %s2045_s0 = inlined_call_operand.vmem [shape: bf16[32,4096], index: 0, kind: input, shape index: {}]   ;;  %s2046_s1 = inlined_call_operand.vmem [shape: bf16[4096,512], index: 1, kind: input, shape index: {}]   ;;  %s2047_s2 = inlined_call_operand.vmem [shape: f32[32,512], index: 2, kind: output, shape index: {}]  }
   0x1   :  { %2048 = sst [smem:[#allocation6_spill]] %s2045_s0 }
   0x2   :  { %s1659_s9 = smov 0   ;;  %s1661_s10 = smov 0  }
   0x3   :  { %s1663_s11 = smov 0   ;;  %s1665_s12 = smov 0  }
   0x4   :  { %s1667_s13 = smov 0   ;;  %s1669_s14 = smov 0  }
   0x5   :  { %s1671_s15 = smov 0   ;;  %s1673_s16 = smov 0  }
   0x6   :  { %s1675_s17 = smov 0   ;;  %s1677_s18 = smov 0  }
   0x7   :  { %s1679_s19 = smov 0  }
   0x8 LB: > { %s1252_s20 = sadd.s32 4294967295, %s1641_s19   ;;  %s24_s21 = sadd.s32 1, %s1633_s17  ;;  %s1641_s19 = sphi %s1679_s19, %s12_s19   ;;  %s1637_s18 = sphi %s1677_s18, %s2062_s18   ;;  %s1633_s17 = sphi %s1675_s17, %s2061_s17   ;;  %s1629_s16 = sphi %s1673_s16, %s2060_s16   ;;  %s1625_s15 = sphi %s1671_s15, %s2059_s15   ;;  %s1621_s14 = sphi %s1669_s14, %s2058_s14   ;;  %s1617_s13 = sphi %s1667_s13, %s2057_s13   ;;  %s1613_s12 = sphi %s1665_s12, %s2056_s12   ;;  %s1609_s11 = sphi %s1663_s11, %s2055_s11   ;;  %s1605_s10 = sphi %s1661_s10, %s2054_s10   ;;  %s1601_s9 = sphi %s1659_s9, %s2053_s9  }
   0x9   : > { %p25_p0 = scmp.ge.s32.totalorder %s24_s21, 8  ;;  %s27_s22 = sadd.s32 1, %s1637_s18 }
   0xa   : > { %s40_s23 = sadd.s32 1, %s1621_s14  ;;  %p47_p1 = scmp.ne.s32.totalorder %s1621_s14, %s1617_s13 }
   0xb   : > { %s2064_s21 = smov (%p25_p0, %s24_s21), 0  ;;  %s2066_s22 = smov (!%p25_p0, %s27_s22), %s1637_s18 }
   0xc   : > { %s36_s24 = ssub.s32 %s1633_s17, %s2064_s21  ;;  %p48_p2 = scmp.eq.s32.totalorder %s1641_s19, 0 }
   0xd   : > { %p29_p3 = scmp.ge.s32.totalorder %s2066_s22, 2  ;;  %p38_p4 = scmp.eq.s32.totalorder %s36_s24, 0 }
   0xe   : > { %p1726_p5 = por %p48_p2, %p47_p1  ;;  %s68_s26 = sadd.s32 1, %s1613_s12 }
   0xf   : > { %s2068_s22 = smov (%p29_p3, %s2066_s22), 0  ;;  %p75_p6 = scmp.ne.s32.totalorder %s1613_s12, %s1609_s11 }
  0x10   : > { %s1734_s27 = scalar_select %p38_p4, %s1621_s14, %s40_s23  }
  0x11   : > { %s64_s28 = ssub.s32 %s1637_s18, %s2068_s22  ;;  %p1740_p9 = por %p75_p6, %p48_p2 }
  0x12   : > { %s65_s29 = sor.u32 %s64_s28, %s36_s24  ;;  %p94_p7 = scmp.eq.s32.totalorder %s64_s28, 0 }
  0x13   : > { %p66_p8 = scmp.eq.s32.totalorder %s65_s29, 0  ;;  %s96_s3 = sadd.s32 1, %s1605_s10 }
  0x14   : > { %p106_p10 = scmp.ne.s32.totalorder %s1605_s10, %s1601_s9  ;;  %p107_p11 = scmp.eq.s32.totalorder %s1252_s20, 15 }
  0x15   : > { %s1748_s4 = scalar_select %p66_p8, %s1613_s12, %s68_s26  }
  0x16   : > { %s1751_s5 = scalar_select %p94_p7, %s1605_s10, %s96_s3  }
  0x17   : > { %p1753_p12 = por %p107_p11, %p106_p10  ;;  %p1255_p13 = scmp.ge.s32.totalorder %s1641_s19, 16 }
  0x19   : > { %129 = sbr.rel (%p1255_p13) target bundleno = 85 (0x55), region = 16 }
  0x20   : > { %132 = sbr.rel (!%p1726_p5) target bundleno = 46 (0x2e), region = 20  ;;  %s134_s7 = sand.u32 (%p1726_p5), 1, %s1621_s14  }
  0x21   : > { %s1347_s8 = sshll.u32 (%p1726_p5), %s1633_s17, 4  ;;  %s1256_s23 = sshll.u32 (%p1726_p5), %s134_s7, 6 }
  0x22   : > { %s2052_s0 = sld [smem:[#allocation6_spill]] (%p1726_p5)  ;;  %s136_s20 = scalar_lea.vmem (%p1726_p5), [#allocation3], %s1256_s23 }
  0x28   : > { %s142_s28 = scalar_lea.vmem %s2052_s0, %s1347_s8 }
  0x29   : > { %v155_v0 = vld [vmem:[%s142_s28] sm:$0xff]  ;;  %v157_v1 = vld [vmem:[%s142_s28 + $0x8] sm:$0xff] }
  0x2a   : > { %v159_v2 = vld [vmem:[%s142_s28 + $0x80] sm:$0xff]  ;;  %156 = vst [vmem:[%s136_s20] sm:$0xff] %v155_v0  ;;  %158 = vst [vmem:[%s136_s20 + $0x8] sm:$0xff] %v157_v1  ;;  %v161_v3 = vld [vmem:[%s142_s28 + $0x88] sm:$0xff] }
  0x2b   : > { %160 = vst [vmem:[%s136_s20 + $0x10] sm:$0xff] %v159_v2  ;;  %v163_v4 = vld [vmem:[%s142_s28 + $0x100] sm:$0xff]  ;;  %v165_v5 = vld [vmem:[%s142_s28 + $0x108] sm:$0xff]  ;;  %162 = vst [vmem:[%s136_s20 + $0x18] sm:$0xff] %v161_v3 }
  0x2c   : > { %164 = vst [vmem:[%s136_s20 + $0x20] sm:$0xff] %v163_v4  ;;  %166 = vst [vmem:[%s136_s20 + $0x28] sm:$0xff] %v165_v5  ;;  %v167_v6 = vld [vmem:[%s142_s28 + $0x180] sm:$0xff]  ;;  %v169_v7 = vld [vmem:[%s142_s28 + $0x188] sm:$0xff] }
  0x2d   : > { %168 = vst [vmem:[%s136_s20 + $0x30] sm:$0xff] %v167_v6  ;;  %170 = vst [vmem:[%s136_s20 + $0x38] sm:$0xff] %v169_v7 }
  0x2e PF: > { %176 = sbr.rel (!%p1740_p9) target bundleno = 85 (0x55), region = 43  ;;  %s178_s25 = sand.u32 (%p1740_p9), 1, %s1613_s12  }
  0x2f   : > { %s1261_s29 = sshll.u32 (%p1740_p9), %s1637_s18, 1  ;;  %s1259_s3 = sshll.u32 (%p1740_p9), %s178_s25, 9 }
  0x30   : > { %s1348_s7 = sshll.u32 (%p1740_p9), %s1633_s17, 8  ;;  %s1778_s30 = scalar_lea.vmem (%p1740_p9), [#allocation4], %s1259_s3 }
  0x31   : > { %s184_s8 = sadd.s32 (%p1740_p9), %s1348_s7, %s1261_s29 }
  0x32   : > { %s1263_s23 = sshll.u32 (%p1740_p9), %s184_s8, 2 }
  0x33   : > { %s1773_s0 = scalar_lea.vmem (%p1740_p9), %s2046_s1, %s1263_s23 }
  0x34   : > { %v340_v8 = vld [vmem:[%s1773_s0] sm:$0xff] (%p1740_p9)  ;;  %v342_v9 = vld [vmem:[%s1773_s0 + $0x10] sm:$0xff] (%p1740_p9) }
  0x35   : > { %v344_v10 = vld [vmem:[%s1773_s0 + $0x20] sm:$0xff]  ;;  %341 = vst [vmem:[%s1778_s30] sm:$0xff] %v340_v8  ;;  %343 = vst [vmem:[%s1778_s30 + $0x8] sm:$0xff] %v342_v9  ;;  %v346_v11 = vld [vmem:[%s1773_s0 + $0x30] sm:$0xff] }
  0x36   : > { %345 = vst [vmem:[%s1778_s30 + $0x10] sm:$0xff] %v344_v10  ;;  %v348_v12 = vld [vmem:[%s1773_s0 + $0x40] sm:$0xff]  ;;  %v350_v13 = vld [vmem:[%s1773_s0 + $0x50] sm:$0xff]  ;;  %347 = vst [vmem:[%s1778_s30 + $0x18] sm:$0xff] %v346_v11 }
  0x37   : > { %349 = vst [vmem:[%s1778_s30 + $0x20] sm:$0xff] %v348_v12  ;;  %351 = vst [vmem:[%s1778_s30 + $0x28] sm:$0xff] %v350_v13  ;;  %v352_v14 = vld [vmem:[%s1773_s0 + $0x60] sm:$0xff]  ;;  %v354_v15 = vld [vmem:[%s1773_s0 + $0x70] sm:$0xff] }
  0x38   : > { %v356_v16 = vld [vmem:[%s1773_s0 + $0x80] sm:$0xff]  ;;  %353 = vst [vmem:[%s1778_s30 + $0x30] sm:$0xff] %v352_v14  ;;  %355 = vst [vmem:[%s1778_s30 + $0x38] sm:$0xff] %v354_v15  ;;  %v358_v17 = vld [vmem:[%s1773_s0 + $0x90] sm:$0xff] }
  0x39   : > { %357 = vst [vmem:[%s1778_s30 + $0x40] sm:$0xff] %v356_v16  ;;  %v360_v18 = vld [vmem:[%s1773_s0 + $0xa0] sm:$0xff]  ;;  %v362_v19 = vld [vmem:[%s1773_s0 + $0xb0] sm:$0xff]  ;;  %359 = vst [vmem:[%s1778_s30 + $0x48] sm:$0xff] %v358_v17 }
  0x3a   : > { %361 = vst [vmem:[%s1778_s30 + $0x50] sm:$0xff] %v360_v18  ;;  %363 = vst [vmem:[%s1778_s30 + $0x58] sm:$0xff] %v362_v19  ;;  %v364_v20 = vld [vmem:[%s1773_s0 + $0xc0] sm:$0xff]  ;;  %v366_v21 = vld [vmem:[%s1773_s0 + $0xd0] sm:$0xff] }
  0x3b   : > { %v368_v22 = vld [vmem:[%s1773_s0 + $0xe0] sm:$0xff]  ;;  %365 = vst [vmem:[%s1778_s30 + $0x60] sm:$0xff] %v364_v20  ;;  %367 = vst [vmem:[%s1778_s30 + $0x68] sm:$0xff] %v366_v21  ;;  %v370_v23 = vld [vmem:[%s1773_s0 + $0xf0] sm:$0xff] }
  0x3c   : > { %369 = vst [vmem:[%s1778_s30 + $0x70] sm:$0xff] %v368_v22  ;;  %v372_v24 = vld [vmem:[%s1773_s0 + $0x100] sm:$0xff]  ;;  %v374_v25 = vld [vmem:[%s1773_s0 + $0x110] sm:$0xff]  ;;  %371 = vst [vmem:[%s1778_s30 + $0x78] sm:$0xff] %v370_v23 }
  0x3d   : > { %373 = vst [vmem:[%s1778_s30 + $0x80] sm:$0xff] %v372_v24  ;;  %375 = vst [vmem:[%s1778_s30 + $0x88] sm:$0xff] %v374_v25  ;;  %v376_v26 = vld [vmem:[%s1773_s0 + $0x120] sm:$0xff]  ;;  %v378_v27 = vld [vmem:[%s1773_s0 + $0x130] sm:$0xff] }
  0x3e   : > { %v380_v28 = vld [vmem:[%s1773_s0 + $0x140] sm:$0xff]  ;;  %377 = vst [vmem:[%s1778_s30 + $0x90] sm:$0xff] %v376_v26  ;;  %379 = vst [vmem:[%s1778_s30 + $0x98] sm:$0xff] %v378_v27  ;;  %v382_v29 = vld [vmem:[%s1773_s0 + $0x150] sm:$0xff] }
  0x3f   : > { %381 = vst [vmem:[%s1778_s30 + $0xa0] sm:$0xff] %v380_v28  ;;  %v384_v30 = vld [vmem:[%s1773_s0 + $0x160] sm:$0xff]  ;;  %v386_v31 = vld [vmem:[%s1773_s0 + $0x170] sm:$0xff]  ;;  %383 = vst [vmem:[%s1778_s30 + $0xa8] sm:$0xff] %v382_v29 }
  0x40   : > { %385 = vst [vmem:[%s1778_s30 + $0xb0] sm:$0xff] %v384_v30  ;;  %387 = vst [vmem:[%s1778_s30 + $0xb8] sm:$0xff] %v386_v31  ;;  %v388_v32 = vld [vmem:[%s1773_s0 + $0x180] sm:$0xff]  ;;  %v390_v33 = vld [vmem:[%s1773_s0 + $0x190] sm:$0xff] }
  0x41   : > { %v392_v34 = vld [vmem:[%s1773_s0 + $0x1a0] sm:$0xff]  ;;  %389 = vst [vmem:[%s1778_s30 + $0xc0] sm:$0xff] %v388_v32  ;;  %391 = vst [vmem:[%s1778_s30 + $0xc8] sm:$0xff] %v390_v33  ;;  %v394_v35 = vld [vmem:[%s1773_s0 + $0x1b0] sm:$0xff] }
  0x42   : > { %393 = vst [vmem:[%s1778_s30 + $0xd0] sm:$0xff] %v392_v34  ;;  %v396_v36 = vld [vmem:[%s1773_s0 + $0x1c0] sm:$0xff]  ;;  %v398_v37 = vld [vmem:[%s1773_s0 + $0x1d0] sm:$0xff]  ;;  %395 = vst [vmem:[%s1778_s30 + $0xd8] sm:$0xff] %v394_v35 }
  0x43   : > { %397 = vst [vmem:[%s1778_s30 + $0xe0] sm:$0xff] %v396_v36  ;;  %399 = vst [vmem:[%s1778_s30 + $0xe8] sm:$0xff] %v398_v37  ;;  %v400_v38 = vld [vmem:[%s1773_s0 + $0x1e0] sm:$0xff]  ;;  %v402_v39 = vld [vmem:[%s1773_s0 + $0x1f0] sm:$0xff] }
  0x44   : > { %v404_v40 = vld [vmem:[%s1773_s0 + $0x200] sm:$0xff]  ;;  %401 = vst [vmem:[%s1778_s30 + $0xf0] sm:$0xff] %v400_v38  ;;  %403 = vst [vmem:[%s1778_s30 + $0xf8] sm:$0xff] %v402_v39  ;;  %v406_v41 = vld [vmem:[%s1773_s0 + $0x210] sm:$0xff] }
  0x45   : > { %405 = vst [vmem:[%s1778_s30 + $0x100] sm:$0xff] %v404_v40  ;;  %v408_v42 = vld [vmem:[%s1773_s0 + $0x220] sm:$0xff]  ;;  %v410_v43 = vld [vmem:[%s1773_s0 + $0x230] sm:$0xff]  ;;  %407 = vst [vmem:[%s1778_s30 + $0x108] sm:$0xff] %v406_v41 }
  0x46   : > { %409 = vst [vmem:[%s1778_s30 + $0x110] sm:$0xff] %v408_v42  ;;  %411 = vst [vmem:[%s1778_s30 + $0x118] sm:$0xff] %v410_v43  ;;  %v412_v44 = vld [vmem:[%s1773_s0 + $0x240] sm:$0xff]  ;;  %v414_v45 = vld [vmem:[%s1773_s0 + $0x250] sm:$0xff] }
  0x47   : > { %v416_v46 = vld [vmem:[%s1773_s0 + $0x260] sm:$0xff]  ;;  %413 = vst [vmem:[%s1778_s30 + $0x120] sm:$0xff] %v412_v44  ;;  %415 = vst [vmem:[%s1778_s30 + $0x128] sm:$0xff] %v414_v45  ;;  %v418_v47 = vld [vmem:[%s1773_s0 + $0x270] sm:$0xff] }
  0x48   : > { %417 = vst [vmem:[%s1778_s30 + $0x130] sm:$0xff] %v416_v46  ;;  %v420_v48 = vld [vmem:[%s1773_s0 + $0x280] sm:$0xff]  ;;  %v422_v49 = vld [vmem:[%s1773_s0 + $0x290] sm:$0xff]  ;;  %419 = vst [vmem:[%s1778_s30 + $0x138] sm:$0xff] %v418_v47 }
  0x49   : > { %421 = vst [vmem:[%s1778_s30 + $0x140] sm:$0xff] %v420_v48  ;;  %423 = vst [vmem:[%s1778_s30 + $0x148] sm:$0xff] %v422_v49  ;;  %v424_v50 = vld [vmem:[%s1773_s0 + $0x2a0] sm:$0xff]  ;;  %v426_v51 = vld [vmem:[%s1773_s0 + $0x2b0] sm:$0xff] }
  0x4a   : > { %v428_v52 = vld [vmem:[%s1773_s0 + $0x2c0] sm:$0xff]  ;;  %425 = vst [vmem:[%s1778_s30 + $0x150] sm:$0xff] %v424_v50  ;;  %427 = vst [vmem:[%s1778_s30 + $0x158] sm:$0xff] %v426_v51  ;;  %v430_v53 = vld [vmem:[%s1773_s0 + $0x2d0] sm:$0xff] }
  0x4b   : > { %429 = vst [vmem:[%s1778_s30 + $0x160] sm:$0xff] %v428_v52  ;;  %v432_v54 = vld [vmem:[%s1773_s0 + $0x2e0] sm:$0xff]  ;;  %v434_v55 = vld [vmem:[%s1773_s0 + $0x2f0] sm:$0xff]  ;;  %431 = vst [vmem:[%s1778_s30 + $0x168] sm:$0xff] %v430_v53 }
  0x4c   : > { %433 = vst [vmem:[%s1778_s30 + $0x170] sm:$0xff] %v432_v54  ;;  %435 = vst [vmem:[%s1778_s30 + $0x178] sm:$0xff] %v434_v55  ;;  %v436_v56 = vld [vmem:[%s1773_s0 + $0x300] sm:$0xff]  ;;  %v438_v57 = vld [vmem:[%s1773_s0 + $0x310] sm:$0xff] }
  0x4d   : > { %v440_v58 = vld [vmem:[%s1773_s0 + $0x320] sm:$0xff]  ;;  %437 = vst [vmem:[%s1778_s30 + $0x180] sm:$0xff] %v436_v56  ;;  %439 = vst [vmem:[%s1778_s30 + $0x188] sm:$0xff] %v438_v57  ;;  %v442_v59 = vld [vmem:[%s1773_s0 + $0x330] sm:$0xff] }
  0x4e   : > { %441 = vst [vmem:[%s1778_s30 + $0x190] sm:$0xff] %v440_v58  ;;  %v444_v60 = vld [vmem:[%s1773_s0 + $0x340] sm:$0xff]  ;;  %v446_v61 = vld [vmem:[%s1773_s0 + $0x350] sm:$0xff]  ;;  %443 = vst [vmem:[%s1778_s30 + $0x198] sm:$0xff] %v442_v59 }
  0x4f   : > { %445 = vst [vmem:[%s1778_s30 + $0x1a0] sm:$0xff] %v444_v60  ;;  %447 = vst [vmem:[%s1778_s30 + $0x1a8] sm:$0xff] %v446_v61  ;;  %v448_v62 = vld [vmem:[%s1773_s0 + $0x360] sm:$0xff]  ;;  %v450_v63 = vld [vmem:[%s1773_s0 + $0x370] sm:$0xff] }
  0x50   : > { %v452_v0 = vld [vmem:[%s1773_s0 + $0x380] sm:$0xff]  ;;  %449 = vst [vmem:[%s1778_s30 + $0x1b0] sm:$0xff] %v448_v62  ;;  %451 = vst [vmem:[%s1778_s30 + $0x1b8] sm:$0xff] %v450_v63  ;;  %v454_v1 = vld [vmem:[%s1773_s0 + $0x390] sm:$0xff] }
  0x51   : > { %453 = vst [vmem:[%s1778_s30 + $0x1c0] sm:$0xff] %v452_v0  ;;  %v456_v2 = vld [vmem:[%s1773_s0 + $0x3a0] sm:$0xff]  ;;  %v458_v3 = vld [vmem:[%s1773_s0 + $0x3b0] sm:$0xff]  ;;  %455 = vst [vmem:[%s1778_s30 + $0x1c8] sm:$0xff] %v454_v1 }
  0x52   : > { %457 = vst [vmem:[%s1778_s30 + $0x1d0] sm:$0xff] %v456_v2  ;;  %459 = vst [vmem:[%s1778_s30 + $0x1d8] sm:$0xff] %v458_v3  ;;  %v460_v4 = vld [vmem:[%s1773_s0 + $0x3c0] sm:$0xff]  ;;  %v462_v5 = vld [vmem:[%s1773_s0 + $0x3d0] sm:$0xff] }
  0x53   : > { %v464_v6 = vld [vmem:[%s1773_s0 + $0x3e0] sm:$0xff]  ;;  %461 = vst [vmem:[%s1778_s30 + $0x1e0] sm:$0xff] %v460_v4  ;;  %463 = vst [vmem:[%s1778_s30 + $0x1e8] sm:$0xff] %v462_v5  ;;  %v466_v7 = vld [vmem:[%s1773_s0 + $0x3f0] sm:$0xff] }
  0x54   : > { %465 = vst [vmem:[%s1778_s30 + $0x1f0] sm:$0xff] %v464_v6  ;;  %467 = vst [vmem:[%s1778_s30 + $0x1f8] sm:$0xff] %v466_v7 }
  0x55 PF: > { %p1264_p0 = scmp.ge.s32.totalorder %s1641_s19, 1  ;;  %p472_p1 = scmp.lt.s32.totalorder %s1641_s19, 17 }
  0x57   : > { %p473_p2 = pnand %p1264_p0, %p472_p1 }
  0x58   : > { %s479_s28 = sand.u32 (!%p473_p2), 1, %s1617_s13   ;;  %s486_s20 = sand.u32 (!%p473_p2), 1, %s1609_s11  }
  0x59   : > { %476 = sbr.rel (%p473_p2) target bundleno = 414 (0x19e), region = 81  ;;  %s1265_s25 = sshll.u32 (!%p473_p2), %s479_s28, 6 }
  0x5a   : > { %s1266_s29 = sshll.u32 (!%p473_p2), %s486_s20, 9  ;;  %s507_s3 = sand.u32 (!%p473_p2), 1, %s1601_s9  }
  0x5b   : > { %s1267_s7 = sshll.u32 (!%p473_p2), %s507_s3, 6  ;;  %s1910_s8 = scalar_lea.vmem (!%p473_p2), [#allocation3], %s1265_s25 }
  0x5c   : > { %s1912_s0 = scalar_lea.vmem (!%p473_p2), [#allocation4], %s1266_s29  ;;  %s1914_s23 = scalar_lea.vmem (!%p473_p2), [#allocation5], %s1267_s7 }
  0x5d   : > { %p1268_p3 = scmp.ne.s32.totalorder (!%p473_p2), %s1625_s15, 0 }
  0x60   : > { %519 = sbr.rel (%p1268_p3) target bundleno = 103 (0x67), region = 93  ;;  %v1643_v8 = vmov (!%p1268_p3), 0.0  }
  0x61   : > { %520 = vst [vmem:[#allocation2] sm:$0xff] (!%p1268_p3), %v1643_v8  ;;  %521 = vst [vmem:[#allocation2 + $0x8] sm:$0xff] (!%p1268_p3), %v1643_v8 }
  0x62   : > { %522 = vst [vmem:[#allocation2 + $0x10] sm:$0xff] (!%p1268_p3), %v1643_v8  ;;  %523 = vst [vmem:[#allocation2 + $0x18] sm:$0xff] (!%p1268_p3), %v1643_v8 }
  0x63   : > { %524 = vst [vmem:[#allocation2 + $0x20] sm:$0xff] (!%p1268_p3), %v1643_v8  ;;  %525 = vst [vmem:[#allocation2 + $0x28] sm:$0xff] (!%p1268_p3), %v1643_v8 }
  0x64   : > { %526 = vst [vmem:[#allocation2 + $0x30] sm:$0xff] (!%p1268_p3), %v1643_v8  ;;  %527 = vst [vmem:[#allocation2 + $0x38] sm:$0xff] (!%p1268_p3), %v1643_v8 }
  0x67 PF: > { %v1447_v9 = vld [vmem:[%s1912_s0 + $0x4] ss:$8 sps:$4 sm:$0xff]   ;;  %v1451_v11 = vld [vmem:[%s1912_s0] ss:$8 sps:$4 sm:$0xff]   ;;  %v1453_v13 = vld [vmem:[%s1912_s0 + $0x14] ss:$8 sps:$4 sm:$0xff]  }
  0x68   : > { %v1449_v10 = vld [vmem:[%s1912_s0 + $0x104] ss:$8 sps:$4 sm:$0xff]   ;;  %968 = vmatprep.subr.bf16.mxu1 %v1447_v9  ;;  %v1452_v12 = vld [vmem:[%s1912_s0 + $0x100] ss:$8 sps:$4 sm:$0xff]   ;;  %v1455_v14 = vld [vmem:[%s1912_s0 + $0x114] ss:$8 sps:$4 sm:$0xff]  }
  0x69   : > { %1021 = vmatprep.subr.bf16.mxu0 %v1449_v10  ;;  %969 = vmatpush1.bf16.msra.mxu1 %v1451_v11  ;;  %v1457_v15 = vld [vmem:[%s1912_s0 + $0x10] ss:$8 sps:$4 sm:$0xff]   ;;  %v1459_v17 = vld [vmem:[%s1912_s0 + $0x24] ss:$8 sps:$4 sm:$0xff]   ;;  %v1463_v19 = vld [vmem:[%s1912_s0 + $0x20] ss:$8 sps:$4 sm:$0xff]  }
  0x6a   : > { %1022 = vmatpush1.bf16.msra.mxu0 %v1452_v12  ;;  %970 = vmatprep.subr.bf16.mxu1 %v1453_v13  ;;  %v1458_v16 = vld [vmem:[%s1912_s0 + $0x110] ss:$8 sps:$4 sm:$0xff]   ;;  %v1461_v18 = vld [vmem:[%s1912_s0 + $0x124] ss:$8 sps:$4 sm:$0xff]   ;;  %v1464_v20 = vld [vmem:[%s1912_s0 + $0x120] ss:$8 sps:$4 sm:$0xff]  }
  0x6b   : > { %1023 = vmatprep.subr.bf16.mxu0 %v1455_v14  ;;  %v1465_v21 = vld [vmem:[%s1912_s0 + $0x34] ss:$8 sps:$4 sm:$0xff]   ;;  %v1469_v23 = vld [vmem:[%s1912_s0 + $0x30] ss:$8 sps:$4 sm:$0xff]   ;;  %v1471_v25 = vld [vmem:[%s1912_s0 + $0x44] ss:$8 sps:$4 sm:$0xff]  }
  0x6c   : > { %v1467_v22 = vld [vmem:[%s1912_s0 + $0x134] ss:$8 sps:$4 sm:$0xff]   ;;  %v1470_v24 = vld [vmem:[%s1912_s0 + $0x130] ss:$8 sps:$4 sm:$0xff]   ;;  %v1473_v26 = vld [vmem:[%s1912_s0 + $0x144] ss:$8 sps:$4 sm:$0xff]  }
  0x6d   : > { %971 = vmatpush1.bf16.msra.mxu1 %v1457_v15  ;;  %v1475_v27 = vld [vmem:[%s1912_s0 + $0x40] ss:$8 sps:$4 sm:$0xff]   ;;  %v1477_v29 = vld [vmem:[%s1912_s0 + $0x54] ss:$8 sps:$4 sm:$0xff]   ;;  %v1481_v31 = vld [vmem:[%s1912_s0 + $0x50] ss:$8 sps:$4 sm:$0xff]  }
  0x6e   : > { %1024 = vmatpush1.bf16.msra.mxu0 %v1458_v16  ;;  %972 = vmatprep.subr.bf16.mxu1 %v1459_v17  ;;  %v1476_v28 = vld [vmem:[%s1912_s0 + $0x140] ss:$8 sps:$4 sm:$0xff]   ;;  %v1479_v30 = vld [vmem:[%s1912_s0 + $0x154] ss:$8 sps:$4 sm:$0xff]   ;;  %v1482_v32 = vld [vmem:[%s1912_s0 + $0x150] ss:$8 sps:$4 sm:$0xff]  }
  0x6f   : > { %1025 = vmatprep.subr.bf16.mxu0 %v1461_v18  ;;  %v1483_v33 = vld [vmem:[%s1912_s0 + $0x64] ss:$8 sps:$4 sm:$0xff]   ;;  %v1487_v35 = vld [vmem:[%s1912_s0 + $0x60] ss:$8 sps:$4 sm:$0xff]   ;;  %v1489_v37 = vld [vmem:[%s1912_s0 + $0x74] ss:$8 sps:$4 sm:$0xff]  }
  0x70   : > { %v1485_v34 = vld [vmem:[%s1912_s0 + $0x164] ss:$8 sps:$4 sm:$0xff]   ;;  %v1488_v36 = vld [vmem:[%s1912_s0 + $0x160] ss:$8 sps:$4 sm:$0xff]   ;;  %v1491_v38 = vld [vmem:[%s1912_s0 + $0x174] ss:$8 sps:$4 sm:$0xff]  }
  0x71   : > { %973 = vmatpush1.bf16.msra.mxu1 %v1463_v19  ;;  %v1493_v39 = vld [vmem:[%s1912_s0 + $0x70] ss:$8 sps:$4 sm:$0xff]   ;;  %v1495_v41 = vld [vmem:[%s1912_s0 + $0x84] ss:$8 sps:$4 sm:$0xff]   ;;  %v1499_v43 = vld [vmem:[%s1912_s0 + $0x80] ss:$8 sps:$4 sm:$0xff]  }
  0x72   : > { %1026 = vmatpush1.bf16.msra.mxu0 %v1464_v20  ;;  %974 = vmatprep.subr.bf16.mxu1 %v1465_v21  ;;  %v1494_v40 = vld [vmem:[%s1912_s0 + $0x170] ss:$8 sps:$4 sm:$0xff]   ;;  %v1497_v42 = vld [vmem:[%s1912_s0 + $0x184] ss:$8 sps:$4 sm:$0xff]   ;;  %v1500_v44 = vld [vmem:[%s1912_s0 + $0x180] ss:$8 sps:$4 sm:$0xff]  }
  0x73   : > { %1027 = vmatprep.subr.bf16.mxu0 %v1467_v22  ;;  %v1501_v45 = vld [vmem:[%s1912_s0 + $0x94] ss:$8 sps:$4 sm:$0xff]   ;;  %v1505_v47 = vld [vmem:[%s1912_s0 + $0x90] ss:$8 sps:$4 sm:$0xff]   ;;  %v1507_v49 = vld [vmem:[%s1912_s0 + $0xa4] ss:$8 sps:$4 sm:$0xff]  }
  0x74   : > { %v1503_v46 = vld [vmem:[%s1912_s0 + $0x194] ss:$8 sps:$4 sm:$0xff]   ;;  %v1506_v48 = vld [vmem:[%s1912_s0 + $0x190] ss:$8 sps:$4 sm:$0xff]   ;;  %v1509_v50 = vld [vmem:[%s1912_s0 + $0x1a4] ss:$8 sps:$4 sm:$0xff]  }
  0x75   : > { %975 = vmatpush1.bf16.msra.mxu1 %v1469_v23  ;;  %v1511_v51 = vld [vmem:[%s1912_s0 + $0xa0] ss:$8 sps:$4 sm:$0xff]   ;;  %v1513_v53 = vld [vmem:[%s1912_s0 + $0xb4] ss:$8 sps:$4 sm:$0xff]   ;;  %v1517_v55 = vld [vmem:[%s1912_s0 + $0xb0] ss:$8 sps:$4 sm:$0xff]  }
  0x76   : > { %1028 = vmatpush1.bf16.msra.mxu0 %v1470_v24  ;;  %976 = vmatprep.subr.bf16.mxu1 %v1471_v25  ;;  %v1512_v52 = vld [vmem:[%s1912_s0 + $0x1a0] ss:$8 sps:$4 sm:$0xff]   ;;  %v1515_v54 = vld [vmem:[%s1912_s0 + $0x1b4] ss:$8 sps:$4 sm:$0xff]   ;;  %v1518_v56 = vld [vmem:[%s1912_s0 + $0x1b0] ss:$8 sps:$4 sm:$0xff]  }
  0x77   : > { %1029 = vmatprep.subr.bf16.mxu0 %v1473_v26  ;;  %v1519_v57 = vld [vmem:[%s1912_s0 + $0xc4] ss:$8 sps:$4 sm:$0xff]   ;;  %v1523_v61 = vld [vmem:[%s1912_s0 + $0xc0] ss:$8 sps:$4 sm:$0xff]   ;;  %v1525_v63 = vld [vmem:[%s1912_s0 + $0xd4] ss:$8 sps:$4 sm:$0xff]  }
  0x78   : > { %v1545_v58 = vld [vmem:[%s1910_s8 + $0x4] ss:$16 sps:$4 sm:$0xff]   ;;  %v1548_v60 = vld [vmem:[%s1910_s8 + $0xc] ss:$16 sps:$4 sm:$0xff]   ;;  %v1524_v62 = vld [vmem:[%s1912_s0 + $0x1c0] ss:$8 sps:$4 sm:$0xff]  }
  0x79   : > { %977 = vmatpush1.bf16.msra.mxu1 %v1475_v27  ;;  %v1521_v59 = vld [vmem:[%s1912_s0 + $0x1c4] ss:$8 sps:$4 sm:$0xff]   ;;  %1000 = vmatprep.mubr.bf16.mxu1 %v1545_v58  ;;  %v1527_v0 = vld [vmem:[%s1912_s0 + $0x1d4] ss:$8 sps:$4 sm:$0xff]   ;;  %v1529_v1 = vld [vmem:[%s1912_s0 + $0xd0] ss:$8 sps:$4 sm:$0xff]  }
  0x7a   : > { %1030 = vmatpush1.bf16.msra.mxu0 %v1476_v28  ;;  %978 = vmatprep.subr.bf16.mxu1 %v1477_v29  ;;  %v1530_v2 = vld [vmem:[%s1912_s0 + $0x1d0] ss:$8 sps:$4 sm:$0xff]   ;;  %v1531_v3 = vld [vmem:[%s1912_s0 + $0xe4] ss:$8 sps:$4 sm:$0xff]   ;;  %v1535_v5 = vld [vmem:[%s1912_s0 + $0xe0] ss:$8 sps:$4 sm:$0xff]  }
  0x7b   : > { %1031 = vmatprep.subr.bf16.mxu0 %v1479_v30  ;;  %1053 = vmatprep.mubr.bf16.mxu0 %v1548_v60  ;;  %v1533_v4 = vld [vmem:[%s1912_s0 + $0x1e4] ss:$8 sps:$4 sm:$0xff]   ;;  %v1536_v6 = vld [vmem:[%s1912_s0 + $0x1e0] ss:$8 sps:$4 sm:$0xff]   ;;  %v1537_v7 = vld [vmem:[%s1912_s0 + $0xf4] ss:$8 sps:$4 sm:$0xff]  }
  0x7c   : > { %v1539_v8 = vld [vmem:[%s1912_s0 + $0x1f4] ss:$8 sps:$4 sm:$0xff]   ;;  %v1541_v9 = vld [vmem:[%s1912_s0 + $0xf0] ss:$8 sps:$4 sm:$0xff]   ;;  %v528_v18 = vld [vmem:[#allocation2] sm:$0xff]  ;;  %p1341_p4 = scmp.ne.s32.totalorder %s1625_s15, 7 }
  0x7d   : > { %979 = vmatpush1.bf16.msra.mxu1 %v1481_v31  ;;  %v1542_v10 = vld [vmem:[%s1912_s0 + $0x1f0] ss:$8 sps:$4 sm:$0xff]   ;;  %v1549_v13 = vld [vmem:[%s1910_s8 + $0x24] ss:$16 sps:$4 sm:$0xff]   ;;  %v1551_v14 = vld [vmem:[%s1910_s8 + $0x2c] ss:$16 sps:$4 sm:$0xff]  }
  0x7e   : > { %1032 = vmatpush1.bf16.msra.mxu0 %v1482_v32  ;;  %980 = vmatprep.subr.bf16.mxu1 %v1483_v33  ;;  %v1543_v11 = vld [vmem:[%s1910_s8] ss:$16 sps:$4 sm:$0xff]   ;;  %v1546_v12 = vld [vmem:[%s1910_s8 + $0x8] ss:$16 sps:$4 sm:$0xff]  }
  0x7f   : > { %1033 = vmatprep.subr.bf16.mxu0 %v1485_v34  ;;  %v1553_v15 = vld [vmem:[%s1910_s8 + $0x20] ss:$16 sps:$4 sm:$0xff]   ;;  %v1554_v16 = vld [vmem:[%s1910_s8 + $0x28] ss:$16 sps:$4 sm:$0xff]  }
  0x80   : > { %v529_v22 = vld [vmem:[#allocation2 + $0x8] sm:$0xff]  ;;  %v530_v26 = vld [vmem:[#allocation2 + $0x10] sm:$0xff]  ;;  %v531_v31 = vld [vmem:[#allocation2 + $0x18] sm:$0xff] }
  0x81   : > { %981 = vmatpush1.bf16.msra.mxu1 %v1487_v35 }
  0x82   : > { %1034 = vmatpush1.bf16.msra.mxu0 %v1488_v36  ;;  %982 = vmatprep.subr.bf16.mxu1 %v1489_v37 }
  0x83   : > { %1035 = vmatprep.subr.bf16.mxu0 %v1491_v38  ;;  %v532_v38 = vld [vmem:[#allocation2 + $0x20] sm:$0xff] }
  0x85   : > { %983 = vmatpush1.bf16.msra.mxu1 %v1493_v39 }
  0x86   : > { %1036 = vmatpush1.bf16.msra.mxu0 %v1494_v40  ;;  %984 = vmatprep.subr.bf16.mxu1 %v1495_v41 }
  0x87   : > { %1037 = vmatprep.subr.bf16.mxu0 %v1497_v42  ;;  %v533_v42 = vld [vmem:[#allocation2 + $0x28] sm:$0xff] }
  0x89   : > { %985 = vmatpush1.bf16.msra.mxu1 %v1499_v43 }
  0x8a   : > { %1038 = vmatpush1.bf16.msra.mxu0 %v1500_v44  ;;  %986 = vmatprep.subr.bf16.mxu1 %v1501_v45 }
  0x8b   : > { %1039 = vmatprep.subr.bf16.mxu0 %v1503_v46  ;;  %v534_v46 = vld [vmem:[#allocation2 + $0x30] sm:$0xff] }
  0x8d   : > { %987 = vmatpush1.bf16.msra.mxu1 %v1505_v47 }
  0x8e   : > { %1040 = vmatpush1.bf16.msra.mxu0 %v1506_v48  ;;  %988 = vmatprep.subr.bf16.mxu1 %v1507_v49 }
  0x8f   : > { %1041 = vmatprep.subr.bf16.mxu0 %v1509_v50 }
  0x91   : > { %989 = vmatpush1.bf16.msra.mxu1 %v1511_v51  ;;  %v535_v51 = vld [vmem:[#allocation2 + $0x38] sm:$0xff] }
  0x92   : > { %1042 = vmatpush1.bf16.msra.mxu0 %v1512_v52  ;;  %990 = vmatprep.subr.bf16.mxu1 %v1513_v53 }
  0x93   : > { %1043 = vmatprep.subr.bf16.mxu0 %v1515_v54 }
  0x95   : > { %991 = vmatpush1.bf16.msra.mxu1 %v1517_v55 }
  0x96   : > { %1044 = vmatpush1.bf16.msra.mxu0 %v1518_v56  ;;  %992 = vmatprep.subr.bf16.mxu1 %v1519_v57 }
  0x97   : > { %1045 = vmatprep.subr.bf16.mxu0 %v1521_v59 }
  0x99   : > { %993 = vmatpush1.bf16.msra.mxu1 %v1523_v61 }
  0x9a   : > { %1046 = vmatpush1.bf16.msra.mxu0 %v1524_v62  ;;  %994 = vmatprep.subr.bf16.mxu1 %v1525_v63 }
  0x9b   : > { %1047 = vmatprep.subr.bf16.mxu0 %v1527_v0 }
  0x9d   : > { %995 = vmatpush1.bf16.msra.mxu1 %v1529_v1 }
  0x9e   : > { %1048 = vmatpush1.bf16.msra.mxu0 %v1530_v2  ;;  %996 = vmatprep.subr.bf16.mxu1 %v1531_v3 }
  0x9f   : > { %1049 = vmatprep.subr.bf16.mxu0 %v1533_v4 }
  0xa1   : > { %997 = vmatpush1.bf16.msra.mxu1 %v1535_v5 }
  0xa2   : > { %1050 = vmatpush1.bf16.msra.mxu0 %v1536_v6  ;;  %998 = vmatprep.subr.bf16.mxu1 %v1537_v7 }
  0xa3   : > { %1051 = vmatprep.subr.bf16.mxu0 %v1539_v8 }
  0xa5   : > { %999 = vmatpush1.bf16.msra.mxu1 %v1541_v9 }
  0xa6   : > { %1052 = vmatpush1.bf16.msra.mxu0 %v1542_v10 }
  0xa8   : > { %1001 = vmatmul.mubr.bf16.vlgmr.msra.gmra.mrb[0].mxu1 %v1543_v11 }
  0xa9   : > { %1054 = vmatmul.mubr.bf16.vlgmr.msra.gmra.mrb[0].mxu0 %v1546_v12  ;;  %1010 = vmatprep.mubr.bf16.mxu1 %v1549_v13 }
  0xaa   : > { %1063 = vmatprep.mubr.bf16.mxu0 %v1551_v14 }
  0xb0   : > { %1011 = vmatmul.mubr.bf16.gmra.mrb[4].mxu1 %v1553_v15 }
  0xb1   : > { %1064 = vmatmul.mubr.bf16.gmra.mrb[4].mxu0 %v1554_v16 }
 0x17b   : > { %v1002_v17 = vpop.f32.mrb[0].mxu1 }
 0x17c   : > { %v1055_v19 = vpop.f32.mrb[0].mxu0  ;;  %v1004_v21 = vpop.f32.mrb[1].mxu1 }
 0x17d   : > { %v1056_v20 = vadd.f32 %v1055_v19, %v1002_v17  ;;  %v1057_v23 = vpop.f32.mrb[1].mxu0  ;;  %v1006_v25 = vpop.f32.mrb[2].mxu1 }
 0x17e   : > { %v1058_v24 = vadd.f32 %v1057_v23, %v1004_v21  ;;  %v1059_v27 = vpop.f32.mrb[2].mxu0  ;;  %v1008_v30 = vpop.f32.mrb[3].mxu1 }
 0x17f   : > { %v1074_v28 = vadd.f32 %v1056_v20, %v528_v18  ;;  %v1060_v29 = vadd.f32 %v1059_v27, %v1006_v25  ;;  %v1061_v32 = vpop.f32.mrb[3].mxu0 }
 0x180   : > { %v1075_v33 = vadd.f32 %v1058_v24, %v529_v22  ;;  %v1062_v34 = vadd.f32 %v1061_v32, %v1008_v30 }
 0x181   : > { %1082 = vst [vmem:[#allocation2] sm:$0xff] %v1074_v28  ;;  %v1076_v35 = vadd.f32 %v1060_v29, %v530_v26 }
 0x182   : > { %1083 = vst [vmem:[#allocation2 + $0x8] sm:$0xff] %v1075_v33  ;;  %v1077_v36 = vadd.f32 %v1062_v34, %v531_v31 }
 0x183   : > { %1084 = vst [vmem:[#allocation2 + $0x10] sm:$0xff] %v1076_v35  ;;  %v1012_v37 = vpop.f32.mrb[4].mxu1 }
 0x184   : > { %1085 = vst [vmem:[#allocation2 + $0x18] sm:$0xff] %v1077_v36  ;;  %v1065_v39 = vpop.f32.mrb[4].mxu0  ;;  %v1014_v41 = vpop.f32.mrb[5].mxu1 }
 0x185   : > { %v1066_v40 = vadd.f32 %v1065_v39, %v1012_v37  ;;  %v1067_v43 = vpop.f32.mrb[5].mxu0  ;;  %v1016_v45 = vpop.f32.mrb[6].mxu1 }
 0x186   : > { %v1068_v44 = vadd.f32 %v1067_v43, %v1014_v41  ;;  %v1069_v47 = vpop.f32.mrb[6].mxu0  ;;  %v1018_v50 = vpop.f32.mrb[7].mxu1  ;;  %1093 = sbr.rel (%p1341_p4) target bundleno = 405 (0x195), region = 97 }
 0x187   : > { %v1078_v48 = vadd.f32 %v1066_v40, %v532_v38  ;;  %v1070_v49 = vadd.f32 %v1069_v47, %v1016_v45  ;;  %v1071_v52 = vpop.f32.mrb[7].mxu0 }
 0x188   : > { %v1079_v53 = vadd.f32 %v1068_v44, %v533_v42  ;;  %v1072_v54 = vadd.f32 %v1071_v52, %v1018_v50  ;;  %v1094_v57 = vld [vmem:[#allocation2] sm:$0xff] (!%p1341_p4) }
 0x189   : > { %1086 = vst [vmem:[#allocation2 + $0x20] sm:$0xff] %v1078_v48  ;;  %v1080_v55 = vadd.f32 %v1070_v49, %v534_v46  ;;  %v1095_v58 = vld [vmem:[#allocation2 + $0x8] sm:$0xff] (!%p1341_p4)  ;;  %1102 = vst [vmem:[%s1914_s23] sm:$0xff] (!%p1341_p4), %v1094_v57 }
 0x18a   : > { %1087 = vst [vmem:[#allocation2 + $0x28] sm:$0xff] %v1079_v53  ;;  %v1081_v56 = vadd.f32 %v1072_v54, %v535_v51  ;;  %v1096_v59 = vld [vmem:[#allocation2 + $0x10] sm:$0xff] (!%p1341_p4)  ;;  %1103 = vst [vmem:[%s1914_s23 + $0x8] sm:$0xff] (!%p1341_p4), %v1095_v58 }
 0x18b   : > { %1088 = vst [vmem:[#allocation2 + $0x30] sm:$0xff] %v1080_v55  ;;  %1104 = vst [vmem:[%s1914_s23 + $0x10] sm:$0xff] (!%p1341_p4), %v1096_v59  ;;  %v1097_v60 = vld [vmem:[#allocation2 + $0x18] sm:$0xff] (!%p1341_p4) }
 0x18c   : > { %1089 = vst [vmem:[#allocation2 + $0x38] sm:$0xff] %v1081_v56  ;;  %1105 = vst [vmem:[%s1914_s23 + $0x18] sm:$0xff] (!%p1341_p4), %v1097_v60 }
 0x190   : > { %v1098_v61 = vld [vmem:[#allocation2 + $0x20] sm:$0xff] }
 0x191   : > { %v1099_v62 = vld [vmem:[#allocation2 + $0x28] sm:$0xff]  ;;  %1106 = vst [vmem:[%s1914_s23 + $0x20] sm:$0xff] %v1098_v61 }
 0x192   : > { %1107 = vst [vmem:[%s1914_s23 + $0x28] sm:$0xff] %v1099_v62  ;;  %v1100_v63 = vld [vmem:[#allocation2 + $0x30] sm:$0xff] }
 0x193   : > { %v1101_v0 = vld [vmem:[#allocation2 + $0x38] sm:$0xff]  ;;  %1108 = vst [vmem:[%s1914_s23 + $0x30] sm:$0xff] %v1100_v63 }
 0x194   : > { %1109 = vst [vmem:[%s1914_s23 + $0x38] sm:$0xff] %v1101_v0 }
 0x195 PF: > { %1116 = sbr.rel (!%p1753_p12) target bundleno = 414 (0x19e), region = 101  ;;  %s1349_s9 = sshll.u32 (%p1753_p12), %s1629_s16, 4 }
 0x196   : > { %s1122_s15 = scalar_lea.vmem (%p1753_p12), %s2047_s2, %s1349_s9 }
 0x198   : > { %v1135_v1 = vld [vmem:[%s1914_s23] sm:$0xff] (%p1753_p12) }
 0x199   : > { %v1137_v2 = vld [vmem:[%s1914_s23 + $0x8] sm:$0xff] (%p1753_p12)  ;;  %v1143_v5 = vld [vmem:[%s1914_s23 + $0x20] sm:$0xff] (%p1753_p12)  ;;  %1136 = vst [vmem:[%s1122_s15] sm:$0xff] (%p1753_p12), %v1135_v1 }
 0x19a   : > { %v1139_v3 = vld [vmem:[%s1914_s23 + $0x10] sm:$0xff] (%p1753_p12)  ;;  %v1145_v6 = vld [vmem:[%s1914_s23 + $0x28] sm:$0xff] (%p1753_p12)  ;;  %1138 = vst [vmem:[%s1122_s15 + $0x8] sm:$0xff] (%p1753_p12), %v1137_v2  ;;  %1144 = vst [vmem:[%s1122_s15 + $0x40] sm:$0xff] (%p1753_p12), %v1143_v5 }
 0x19b   : > { %v1141_v4 = vld [vmem:[%s1914_s23 + $0x18] sm:$0xff] (%p1753_p12)  ;;  %1140 = vst [vmem:[%s1122_s15 + $0x20] sm:$0xff] (%p1753_p12), %v1139_v3  ;;  %1146 = vst [vmem:[%s1122_s15 + $0x48] sm:$0xff] (%p1753_p12), %v1145_v6  ;;  %v1147_v7 = vld [vmem:[%s1914_s23 + $0x30] sm:$0xff] (%p1753_p12) }
 0x19c   : > { %1142 = vst [vmem:[%s1122_s15 + $0x28] sm:$0xff] %v1141_v4  ;;  %v1149_v8 = vld [vmem:[%s1914_s23 + $0x38] sm:$0xff]  ;;  %1148 = vst [vmem:[%s1122_s15 + $0x60] sm:$0xff] %v1147_v7 }
 0x19d   : > { %1150 = vst [vmem:[%s1122_s15 + $0x68] sm:$0xff] %v1149_v8 }
 0x19e PF: > { %s12_s19 = sadd.s32 1, %s1641_s19   ;;  %s2053_s9 = smov %s1605_s10 }
 0x19f   : > { %p9_p5 = scmp.ge.s32.totalorder %s12_s19, 18   ;;  %s2054_s10 = smov %s1751_s5 }
 0x1a0   : > { %s2055_s11 = smov %s1613_s12  ;;  %s2056_s12 = smov %s1748_s4 }
 0x1a1   : > { %s2057_s13 = smov %s1621_s14  ;;  %s2058_s14 = smov %s1734_s27 }
 0x1a2   : > { %s2059_s15 = smov %s1633_s17  ;;  %s2060_s16 = smov %s1637_s18 }
 0x1a3   : > { %s2061_s17 = smov %s2064_s21  ;;  %s2062_s18 = smov %s2068_s22 }
 0x1a4   :  { %11 = sbr.rel (!%p9_p5) target bundleno = 8 (0x8), region = 163 }

// kernel: patch_discriminator.14
= control target key start
LH: loop header
LB: loop body
LE: loop exit
PB: predicated region body
PF: predicated region fallthrough
CT: control target
= control target key end

     0   :  { %s519_s6 = smov 0   ;;  %s521_s7 = smov 0   ;;  %s636_s0 = inlined_call_operand.vmem [shape: f32[2,9,512], index: 0, kind: input, shape index: {}]   ;;  %s637_s1 = inlined_call_operand.vmem [shape: bf16[2,9,512], index: 1, kind: output, shape index: {}]  }
   0x1   :  { %s523_s8 = smov 0   ;;  %s525_s9 = smov 0  }
   0x2   :  { %s527_s10 = smov 0   ;;  %s529_s11 = smov 0  }
   0x3   :  { %s531_s12 = smov 0  }
   0x4 LB: > { %s20_s13 = sadd.s32 1, %s499_s10  ;;  %s23_s14 = sadd.s32 1, %s503_s11  ;;  %s507_s12 = sphi %s531_s12, %s11_s12   ;;  %s503_s11 = sphi %s529_s11, %s648_s11   ;;  %s499_s10 = sphi %s527_s10, %s647_s10   ;;  %s495_s9 = sphi %s525_s9, %s646_s9   ;;  %s491_s8 = sphi %s523_s8, %s645_s8   ;;  %s487_s7 = sphi %s521_s7, %s644_s7   ;;  %s483_s6 = sphi %s519_s6, %s643_s6  }
   0x5   : > { %p21_p0 = scmp.ge.s32.totalorder %s20_s13, 2  ;;  %s372_s15 = sadd.s32 4294967295, %s507_s12  }
   0x6   : > { %p39_p1 = scmp.ne.s32.totalorder %s487_s7, %s483_s6  ;;  %p40_p2 = scmp.eq.s32.totalorder %s507_s12, 0 }
   0x7   : > { %s650_s13 = smov (%p21_p0, %s20_s13), 0  ;;  %s652_s14 = smov (!%p21_p0, %s23_s14), %s503_s11 }
   0x8   : > { %p25_p3 = scmp.ge.s32.totalorder %s652_s14, 2  ;;  %p71_p4 = scmp.eq.s32.totalorder %s372_s15, 3 }
   0x9   : > { %s28_s16 = ssub.s32 %s499_s10, %s650_s13  ;;  %p41_p5 = por %p40_p2, %p39_p1 }
   0xa   : > { %s654_s14 = smov (%p25_p3, %s652_s14), 0  ;;  %p567_p6 = por %p71_p4, %p39_p1 }
   0xb   : > { %s27_s18 = ssub.s32 %s503_s11, %s654_s14  ;;  %s32_s20 = sadd.s32 1, %s487_s7 }
   0xc   : > { %s29_s19 = sor.u32 %s28_s16, %s27_s18  ;;  %p375_p8 = scmp.ge.s32.totalorder %s507_s12, 4 }
   0xd   : > { %p30_p7 = scmp.eq.s32.totalorder %s29_s19, 0 }
   0xe   : > { %93 = sbr.rel (%p375_p8) target bundleno = 30 (0x1e), region = 16 }
   0xf   : > { %s575_s21 = scalar_select %p30_p7, %s487_s7, %s32_s20  }
  0x15   : > { %96 = sbr.rel (!%p41_p5) target bundleno = 30 (0x1e), region = 20  ;;  %s98_s22 = sand.u32 (%p41_p5), 1, %s487_s7  }
  0x16   : > { %s377_s23 = sshll.u32 (%p41_p5), %s499_s10, 1  ;;  %s376_s24 = sshll.u32 (%p41_p5), %s98_s22, 5 }
  0x17   : > { %s378_s25 = sshll.u32 (%p41_p5), %s503_s11, 3  ;;  %s100_s2 = scalar_lea.vmem (%p41_p5), [#allocation2], %s376_s24 }
  0x18   : > { %s103_s26 = sadd.s32 (%p41_p5), %s378_s25, %s377_s23 }
  0x19   : > { %s379_s27 = sshll.u32 (%p41_p5), %s103_s26, 3 }
  0x1a   : > { %s105_s30 = scalar_lea.vmem (%p41_p5), %s636_s0, %s379_s27 }
  0x1b   : > { %v118_v0 = vld [vmem:[%s105_s30] sm:$0xff] (%p41_p5)  ;;  %v120_v1 = vld [vmem:[%s105_s30 + $0x8] sm:$0xff] (%p41_p5) }
  0x1c   : > { %v122_v2 = vld [vmem:[%s105_s30 + $0x20] sm:$0xff]  ;;  %119 = vst [vmem:[%s100_s2] sm:$0xff] %v118_v0  ;;  %121 = vst [vmem:[%s100_s2 + $0x8] sm:$0xff] %v120_v1  ;;  %v124_v3 = vld [vmem:[%s105_s30 + $0x28] sm:$0xff] }
  0x1d   : > { %123 = vst [vmem:[%s100_s2 + $0x10] sm:$0xff] %v122_v2  ;;  %125 = vst [vmem:[%s100_s2 + $0x18] sm:$0xff] %v124_v3 }
  0x1e PF: > { %p380_p9 = scmp.ge.s32.totalorder %s507_s12, 1  ;;  %p130_p10 = scmp.lt.s32.totalorder %s507_s12, 5 }
  0x20   : > { %p131_p11 = pnand %p380_p9, %p130_p10 }
  0x21   : > { %s137_s3 = sand.u32 (!%p131_p11), 1, %s483_s6   ;;  %vm161_vm0 = vcmask (!%p131_p11), 1040384   ;;  %vm241_vm1 = vsmask.f32 (!%p131_p11), 256  ;;  %vm243_vm2 = vcmask (!%p131_p11), 1044484  }
  0x22   : > { %134 = sbr.rel (%p131_p11) target bundleno = 106 (0x6a), region = 43  ;;  %s381_s4 = sshll.u32 (!%p131_p11), %s137_s3, 5  ;;  %vm244_vm3 = vsmask.f32 (!%p131_p11), 4352  ;;  %vm596_vm4 = vmand (!%p131_p11), %vm161_vm0, %vm241_vm1 }
  0x23   : > { %s139_s5 = scalar_lea.vmem (!%p131_p11), [#allocation2], %s381_s4  ;;  %s382_s15 = sshll.u32 (!%p131_p11), %s137_s3, 4  ;;  %vm600_vm7 = vmand (!%p131_p11), %vm243_vm2, %vm244_vm3 }
  0x24   : > { %v157_v4 = vld [vmem:[%s139_s5] sm:$0xff] (!%p131_p11)  ;;  %v158_v5 = vld [vmem:[%s139_s5 + $0x8] sm:$0xff] (!%p131_p11)  ;;  %v159_v6 = vld [vmem:[%s139_s5 + $0x10] sm:$0x1] (!%p131_p11)  ;;  %s154_s6 = scalar_lea.vmem (!%p131_p11), [#allocation3], %s382_s15 }
  0x25   : > { %v160_v7 = vld [vmem:[%s139_s5 + $0x18] sm:$0x1] (!%p131_p11)  ;;  %v162_v8 = vsel (!%p131_p11), %vm161_vm0, %v159_v6, 0.0  ;;  %vm246_vm10 = vmor (!%p131_p11), %vm600_vm7, %vm596_vm4 }
  0x26   : > { %v163_v9 = vadd.f32 (!%p131_p11), %v162_v8, %v157_v4  ;;  %v170_v10 = vsel (!%p131_p11), %vm161_vm0, %v160_v7, 0.0 }
  0x27   : > { %v171_v11 = vadd.f32 (!%p131_p11), %v170_v10, %v158_v5 }
  0x28   : > { %v164_v12 = vrot.slane (!%p131_p11), %v163_v9, 4 }
  0x29   : > { %v172_v13 = vrot.slane %v171_v11, 4  ;;  %s386_s16 = sshll.u32 (%p567_p6), %s491_s8, 1  ;;  %s387_s18 = sshll.u32 (%p567_p6), %s495_s9, 3 }
  0x2a   : > { %v165_v14 = vadd.f32 %v164_v12, %v163_v9  ;;  %s259_s19 = sadd.s32 (%p567_p6), %s387_s18, %s386_s16 }
  0x2b   : > { %v173_v15 = vadd.f32 %v172_v13, %v171_v11  ;;  %s388_s20 = sshll.u32 (%p567_p6), %s259_s19, 2 }
  0x2c   : > { %v166_v16 = vrot.slane %v165_v14, 2  ;;  %s261_s24 = scalar_lea.vmem (%p567_p6), %s637_s1, %s388_s20 }
  0x2d   : > { %v174_v17 = vrot.slane %v173_v15, 2 }
  0x2e   : > { %v167_v18 = vadd.f32 %v166_v16, %v165_v14 }
  0x2f   : > { %v175_v19 = vadd.f32 %v174_v17, %v173_v15 }
  0x30   : > { %v168_v20 = vrot.slane %v167_v18, 1 }
  0x31   : > { %v176_v21 = vrot.slane %v175_v19, 1 }
  0x32   : > { %v169_v22 = vadd.f32 %v168_v20, %v167_v18 }
  0x33   : > { %v177_v23 = vadd.f32 %v176_v21, %v175_v19 }
  0x34   : > { %v179_v24 = vmul.f32 0.11111111, %v169_v22 }
  0x35   : > { %v180_v25 = vmul.f32 0.11111111, %v177_v23 }
  0x36   : > { %v181_v26 = vsub.f32 %v157_v4, %v179_v24  ;;  %v183_v27 = vsub.f32 %v159_v6, %v179_v24  ;;  %v247_v6 = vld [vmem:[%s154_s6 + $0x8] sm:$0x11] }
  0x37   : > { %v182_v28 = vsub.f32 %v158_v5, %v180_v25  ;;  %v184_v29 = vsub.f32 %v160_v7, %v180_v25 }
  0x38   : > { %v185_v30 = vmul.f32 %v181_v26, %v181_v26  ;;  %v187_v31 = vmul.f32 %v183_v27, %v183_v27 }
  0x39   : > { %v186_v32 = vmul.f32 %v182_v28, %v182_v28  ;;  %v188_v33 = vmul.f32 %v184_v29, %v184_v29 }
  0x3a   : > { %v189_v34 = vsel %vm161_vm0, %v187_v31, 0.0 }
  0x3b   : > { %v190_v35 = vadd.f32 %v189_v34, %v185_v30  ;;  %v197_v36 = vsel %vm161_vm0, %v188_v33, 0.0 }
  0x3c   : > { %v198_v37 = vadd.f32 %v197_v36, %v186_v32 }
  0x3d   : > { %v191_v38 = vrot.slane %v190_v35, 4 }
  0x3e   : > { %v199_v39 = vrot.slane %v198_v37, 4 }
  0x3f   : > { %v192_v40 = vadd.f32 %v191_v38, %v190_v35 }
  0x40   : > { %v200_v41 = vadd.f32 %v199_v39, %v198_v37 }
  0x41   : > { %v193_v42 = vrot.slane %v192_v40, 2 }
  0x42   : > { %v201_v43 = vrot.slane %v200_v41, 2 }
  0x43   : > { %v194_v44 = vadd.f32 %v193_v42, %v192_v40 }
  0x44   : > { %v202_v45 = vadd.f32 %v201_v43, %v200_v41 }
  0x45   : > { %v195_v46 = vrot.slane %v194_v44, 1 }
  0x46   : > { %v203_v47 = vrot.slane %v202_v45, 1 }
  0x47   : > { %v196_v48 = vadd.f32 %v195_v46, %v194_v44 }
  0x48   : > { %v204_v49 = vadd.f32 %v203_v47, %v202_v45 }
  0x49   : > { %v205_v50 = vmul.f32 0.11111111, %v196_v48 }
  0x4a   : > { %v206_v51 = vmul.f32 0.11111111, %v204_v49 }
  0x4b   : > { %v207_v52 = vadd.f32 1e-05, %v205_v50 }
  0x4c   : > { %v208_v53 = vadd.f32 1e-05, %v206_v51 }
  0x4d   : > { %449 = vrsqrt.f32 %v207_v52 }
  0x4e   : > { %451 = vrsqrt.f32 %v208_v53 }
  0x57   : > { %v450_v54 = vpop.eup %449 }
  0x58   : > { %v452_v55 = vpop.eup %451  ;;  %v211_v56 = vmul.f32 %v450_v54, %v181_v26  ;;  %v213_v57 = vmul.f32 %v450_v54, %v183_v27 }
  0x59   : > { %v212_v58 = vmul.f32 %v452_v55, %v182_v28  ;;  %v214_v59 = vmul.f32 %v452_v55, %v184_v29 }
  0x5a   : > { %vm215_vm5 = vcmp.ge.f32.partialorder %v211_v56, 0.0  ;;  %v219_v61 = vmul.f32 0.2, %v211_v56  ;;  %vm217_vm6 = vcmp.ge.f32.partialorder %v213_v57, 0.0  ;;  %v221_v62 = vmul.f32 0.2, %v213_v57 }
  0x5b   : > { %vm216_vm8 = vcmp.ge.f32.partialorder %v212_v58, 0.0  ;;  %v220_v0 = vmul.f32 0.2, %v212_v58  ;;  %vm218_vm9 = vcmp.ge.f32.partialorder %v214_v59, 0.0  ;;  %v222_v1 = vmul.f32 0.2, %v214_v59 }
  0x5c   : > { %v223_v2 = vsel %vm215_vm5, %v211_v56, %v219_v61  ;;  %v225_v3 = vsel %vm217_vm6, %v213_v57, %v221_v62  ;;  %256 = sbr.rel (!%p567_p6) target bundleno = 106 (0x6a), region = 51 }
  0x5d   : > { %v224_v4 = vsel %vm216_vm8, %v212_v58, %v220_v0  ;;  %v226_v5 = vsel %vm218_vm9, %v214_v59, %v222_v1 }
  0x5e   : > { %v391_v7 = vpack.c.bf16 %v224_v4, %v223_v2  ;;  %v392_v8 = vpack.c.bf16 %v226_v5, %v225_v3 }
  0x60   : > { %239 = vst [vmem:[%s154_s6] sm:$0xff] %v391_v7  ;;  %v248_v9 = vsel %vm246_vm10, %v392_v8, %v247_v6 }
  0x61   : > { %249 = vst [vmem:[%s154_s6 + $0x8] sm:$0x11] %v248_v9 }
  0x67   : > { %v291_v10 = vld [vmem:[%s154_s6] sm:$0xff] }
  0x68   : > { %v293_v11 = vld [vmem:[%s154_s6 + $0x8] sm:$0xff]  ;;  %292 = vst [vmem:[%s261_s24] sm:$0xff] %v291_v10 }
  0x69   : > { %294 = vst [vmem:[%s261_s24 + $0x10] sm:$0xff] %v293_v11 }
  0x6a PF: > { %s11_s12 = sadd.s32 1, %s507_s12   ;;  %s643_s6 = smov %s487_s7 }
  0x6b   : > { %p8_p12 = scmp.ge.s32.totalorder %s11_s12, 6   ;;  %s644_s7 = smov %s575_s21 }
  0x6c   : > { %s645_s8 = smov %s499_s10  ;;  %s646_s9 = smov %s503_s11 }
  0x6d   : > { %s647_s10 = smov %s650_s13  ;;  %s648_s11 = smov %s654_s14 }
  0x6e   :  { %10 = sbr.rel (!%p8_p12) target bundleno = 4 (0x4), region = 120 }

// kernel: patch_discriminator.15
= control target key start
LH: loop header
LB: loop body
LE: loop exit
PB: predicated region body
PF: predicated region fallthrough
CT: control target
= control target key end

     0   :  { %s617_s0 = inlined_call_operand.vmem [shape: bf16[16,8192], index: 0, kind: input, shape index: {}]   ;;  %s618_s1 = inlined_call_operand.vmem [shape: bf16[1,8192], index: 1, kind: input, shape index: {}]   ;;  %s619_s2 = inlined_call_operand.<no memory space> [shape: f32[1,1], index: 2, kind: input, shape index: {}]   ;;  %s620_s3 = inlined_call_operand.vmem [shape: f32[16,1], index: 3, kind: output, shape index: {}]  }
   0x1   :  { %v8_v0 = vstv %s619_s2 }
   0x2   :  { %9 = vst [vmem:[#allocation3] sm:$0x1] %v8_v0 }
   0x3   :  { %s540_s14 = smov 0   ;;  %s542_s15 = smov 0  }
   0x4   :  { %s544_s16 = smov 0   ;;  %s546_s17 = smov 0  }
   0x5   :  { %s548_s18 = smov 0  }
   0x6 LB: > { %s24_s2 = sadd.s32 1, %s510_s17  ;;  %p43_p1 = scmp.ne.s32.totalorder %s502_s15, %s498_s14  ;;  %s514_s18 = sphi %s548_s18, %s15_s18   ;;  %s510_s17 = sphi %s546_s17, %s624_s17   ;;  %s506_s16 = sphi %s544_s16, %s623_s16   ;;  %s502_s15 = sphi %s542_s15, %s622_s15   ;;  %s498_s14 = sphi %s540_s14, %s621_s14  }
   0x7   : > { %p25_p0 = scmp.ge.s32.totalorder %s24_s2, 16  ;;  %p44_p2 = scmp.eq.s32.totalorder %s514_s18, 0 }
   0x8   : > { %s36_s20 = sadd.s32 1, %s502_s15  ;;  %p420_p5 = scmp.ge.s32.totalorder %s514_s18, 16 }
   0x9   : > { %s626_s2 = smov (%p25_p0, %s24_s2), 0  ;;  %p45_p3 = por %p44_p2, %p43_p1 }
   0xa   : > { %s32_s19 = ssub.s32 %s510_s17, %s626_s2  ;;  %145 = sbr.rel (%p420_p5) target bundleno = 24 (0x18), region = 20 }
   0xb   : > { %p34_p4 = scmp.eq.s32.totalorder %s32_s19, 0 }
   0xd   : > { %s575_s21 = scalar_select %p34_p4, %s502_s15, %s36_s20  }
  0x11   : > { %148 = sbr.rel (!%p45_p3) target bundleno = 24 (0x18), region = 24  ;;  %s150_s22 = sand.u32 (%p45_p3), 1, %s502_s15  }
  0x12   : > { %s434_s23 = sshll.u32 (%p45_p3), %s510_s17, 4  ;;  %s421_s24 = sshll.u32 (%p45_p3), %s150_s22, 5 }
  0x13   : > { %s158_s27 = scalar_lea.vmem (%p45_p3), %s617_s0, %s434_s23  ;;  %s152_s28 = scalar_lea.vmem (%p45_p3), [#allocation4], %s421_s24 }
  0x14   : > { %v171_v1 = vld [vmem:[%s158_s27] sm:$0xff] (%p45_p3)  ;;  %v173_v2 = vld [vmem:[%s158_s27 + $0x8] sm:$0xff] (%p45_p3) }
  0x15   : > { %v175_v3 = vld [vmem:[%s158_s27 + $0x100] sm:$0xff] (%p45_p3)  ;;  %172 = vst [vmem:[%s152_s28] sm:$0xff] (%p45_p3), %v171_v1  ;;  %174 = vst [vmem:[%s152_s28 + $0x8] sm:$0xff] (%p45_p3), %v173_v2  ;;  %v177_v4 = vld [vmem:[%s158_s27 + $0x108] sm:$0xff] (%p45_p3) }
  0x16   : > { %176 = vst [vmem:[%s152_s28 + $0x10] sm:$0xff] (%p45_p3), %v175_v3  ;;  %178 = vst [vmem:[%s152_s28 + $0x18] sm:$0xff] (%p45_p3), %v177_v4 }
  0x18 PF: > { %p424_p6 = scmp.ge.s32.totalorder %s514_s18, 1  ;;  %p191_p7 = scmp.lt.s32.totalorder %s514_s18, 17 }
  0x1a   : > { %p192_p8 = pnand %p424_p6, %p191_p7 }
  0x1b   : > { %s198_s29 = sand.u32 (!%p192_p8), 1, %s498_s14   ;;  %s426_s30 = sshll.u32 (!%p192_p8), %s506_s16, 2 }
  0x1c   : > { %195 = sbr.rel (%p192_p8) target bundleno = 219 (0xdb), region = 51  ;;  %s425_s4 = sshll.u32 (!%p192_p8), %s198_s29, 5 }
  0x1d   : > { %p228_p9 = scmp.lt.s32.totalorder (!%p192_p8), %s426_s30, 63  ;;  %s200_s8 = scalar_lea.vmem (!%p192_p8), [#allocation4], %s425_s4 }
  0x1e   : > { %p427_p10 = scmp.ne.s32.totalorder (!%p192_p8), %s506_s16, 0 }
  0x23   : > { %s628_s30 = smov (!%p228_p9, %s426_s30), 63  ;;  %241 = sbr.rel (%p427_p10) target bundleno = 42 (0x2a), region = 59 }
  0x24   : > { %s230_s7 = scalar_lea.vmem %s618_s1, %s628_s30  ;;  %vm242_vm0 = vcmask (!%p427_p10), 7168   ;;  %v516_v5 = vmov (!%p427_p10), 0.0  }
  0x25   : > { %243 = vst.msk [vmem:[#allocation2] sm:$0xff] (!%p427_p10), %vm242_vm0, %v516_v5  ;;  %244 = vst.msk [vmem:[#allocation2 + $0x8] sm:$0xff] (!%p427_p10), %vm242_vm0, %v516_v5 }
  0x2a PF: > { %v257_v6 = vld [vmem:[%s230_s7] sm:$0xf]  ;;  %v260_v7 = vlaneseq  ;;  %v245_v8 = vld [vmem:[%s200_s8] sm:$0xff]  ;;  %v248_v17 = vld [vmem:[%s200_s8 + $0x18] sm:$0xff]  ;;  %vm318_vm1 = vcmask 7168   ;;  %p428_p11 = scmp.ne.s32.totalorder %s506_s16, 15 }
  0x2b   : > { %v246_v9 = vld [vmem:[%s200_s8 + $0x8] sm:$0xff]  ;;  %v258_v10 = vunpack.c.l.bf16 %v257_v6  ;;  %v247_v16 = vld [vmem:[%s200_s8 + $0x10] sm:$0xff]  ;;  %v249_v18 = vunpack.c.l.bf16 %v245_v8  ;;  %v250_v19 = vunpack.c.h.bf16 %v245_v8  ;;  %v255_v28 = vunpack.c.l.bf16 %v248_v17  ;;  %v429_v55 = vld [vmem:[#allocation3] ss:$0 sm:$0xff] (!%p428_p11) }
  0x2c   : > { %v261_v11 = vshrl.u32 %v260_v7, 7  ;;  %v251_v20 = vunpack.c.l.bf16 %v246_v9  ;;  %v252_v25 = vunpack.c.h.bf16 %v246_v9  ;;  %v253_v26 = vunpack.c.l.bf16 %v247_v16  ;;  %v304_v48 = vld [vmem:[#allocation2] sm:$0xff]  ;;  %v305_v51 = vld [vmem:[#allocation2 + $0x8] sm:$0xff] }
  0x2d   : > { %v254_v27 = vunpack.c.h.bf16 %v247_v16  ;;  %v256_v36 = vunpack.c.h.bf16 %v248_v17 }
  0x2e   : > { %v262_v12 = vsub.s32 0, %v261_v11  ;;  %v266_v13 = vsub.s32 2, %v261_v11  ;;  %v270_v14 = vsub.s32 4, %v261_v11  ;;  %v274_v15 = vsub.s32 6, %v261_v11 }
  0x30   : > { %v263_v21 = vrot.slane %v258_v10, %v262_v12  ;;  %v267_v22 = vrot.slane %v258_v10, %v266_v13  ;;  %v271_v23 = vrot.slane %v258_v10, %v270_v14  ;;  %v275_v24 = vrot.slane %v258_v10, %v274_v15 }
  0x32   : > { %v283_v29 = vrot.slane %v263_v21, %v262_v12  ;;  %v287_v30 = vrot.slane %v267_v22, %v262_v12  ;;  %v291_v31 = vrot.slane %v271_v23, %v262_v12  ;;  %v295_v32 = vrot.slane %v275_v24, %v262_v12 }
  0x34   : > { %v296_v33 = vmul.f32 %v283_v29, %v249_v18  ;;  %v297_v34 = vmul.f32 %v287_v30, %v250_v19  ;;  %v298_v35 = vmul.f32 %v291_v31, %v251_v20  ;;  %v300_v37 = vmul.f32 %v283_v29, %v253_v26 }
  0x35   : > { %v301_v38 = vmul.f32 %v287_v30, %v254_v27  ;;  %v302_v39 = vmul.f32 %v291_v31, %v255_v28  ;;  %v299_v40 = vmul.f32 %v295_v32, %v252_v25  ;;  %v303_v44 = vmul.f32 %v295_v32, %v256_v36 }
  0x36   : > { %v306_v41 = vadd.f32 %v297_v34, %v296_v33 }
  0x37   : > { %v311_v42 = vadd.f32 %v301_v38, %v300_v37 }
  0x38   : > { %v307_v43 = vadd.f32 %v306_v41, %v298_v35 }
  0x39   : > { %v312_v45 = vadd.f32 %v311_v42, %v302_v39 }
  0x3a   : > { %v308_v46 = vadd.f32 %v307_v43, %v299_v40 }
  0x3b   : > { %v313_v47 = vadd.f32 %v312_v45, %v303_v44 }
  0x3c   : > { %309 = vadd.xlane.f32.xlu0 %v308_v46 }
  0x40   : > { %314 = vadd.xlane.f32.xlu0 %v313_v47 }
  0xc9   : > { %v310_v49 = vpop.xlane.xlu0 %309 }
  0xca   : > { %v316_v50 = vadd.f32 %v310_v49, %v304_v48  ;;  %324 = sbr.rel (%p428_p11) target bundleno = 219 (0xdb), region = 63 }
  0xcc   : > { %319 = vst.msk [vmem:[#allocation2] sm:$0xff] %vm318_vm1, %v316_v50 }
  0xcd   : > { %v315_v52 = vpop.xlane.xlu0 %314 }
  0xce   : > { %v317_v53 = vadd.f32 %v315_v52, %v305_v51 }
  0xd0   : > { %320 = vst.msk [vmem:[#allocation2 + $0x8] sm:$0xff] %vm318_vm1, %v317_v53 }
  0xd3   : > { %v325_v54 = vld [vmem:[#allocation2] sm:$0xff] }
  0xd4   : > { %v334_v57 = vadd.f32 %v429_v55, %v325_v54 }
  0xd6   : > { %336 = vst.msk [vmem:[%s620_s3] sm:$0xff] %vm318_vm1, %v334_v57 }
  0xd7   : > { %v326_v56 = vld [vmem:[#allocation2 + $0x8] sm:$0xff] }
  0xd8   : > { %v335_v58 = vadd.f32 %v429_v55, %v326_v56 }
  0xda   : > { %337 = vst.msk [vmem:[%s620_s3 + $0x8] sm:$0xff] %vm318_vm1, %v335_v58 }
  0xdb PF: > { %s15_s18 = sadd.s32 1, %s514_s18   ;;  %s621_s14 = smov %s502_s15 }
  0xdc   : > { %p12_p12 = scmp.ge.s32.totalorder %s15_s18, 18   ;;  %s622_s15 = smov %s575_s21 }
  0xdd   : > { %s623_s16 = smov %s510_s17  ;;  %s624_s17 = smov %s626_s2 }
  0xde   :  { %14 = sbr.rel (!%p12_p12) target bundleno = 6 (0x6), region = 101 }

</bundles_post_ra>
